<compile_context>
chip_gen: v7x
topology: tpu7x:2x2x1
jax: 0.10.0
libtpu: 0.0.40
codegen_flags: <defaults>
</compile_context>

<pallas_src>
import functools

import jax
import jax.numpy as jnp
from jax.experimental import pallas as pl
from jax.experimental.pallas import tpu as pltpu

_LANE = 128
_EPS = 1e-5  # PyTorch BatchNorm2d default


def _round_up(a, b):
    return (a + b - 1) // b * b


def _conv_tile(x, w):
    """3x3 conv of one halo strip as 9 f32-accumulated MXU matmuls.

    x: (TH+2, W+2, Cin) f32 halo strip (spatially zero-padded)
    w: (9*Cin, Cpad) f32, rows ordered (kh, kw, cin), Cout lane-padded to Cpad
    returns (TH*W, Cpad) f32 conv output for the TH*W strip pixels
    """
    th = x.shape[0] - 2
    wd = x.shape[1] - 2
    cin = x.shape[2]
    cpad = w.shape[1]
    acc = jnp.zeros((th * wd, cpad), jnp.float32)
    for kh in range(3):
        for kw in range(3):
            tap = x[kh:kh + th, kw:kw + wd, :].reshape(th * wd, cin)
            wk = w[(kh * 3 + kw) * cin:(kh * 3 + kw + 1) * cin, :]
            acc = acc + jnp.dot(tap, wk, preferred_element_type=jnp.float32)
    return acc


def _stats_kernel(x_ref, w_ref, s_ref, *, num_ht, tile_h, height, width):
    """Per-strip conv recompute -> partial BN stats (row 0: sum, row 1: sum of squares)."""
    acc = _conv_tile(x_ref[0], w_ref[...])
    if height % tile_h != 0:
        # last strip of each image carries rows past H; mask them out of the stats
        ht = pl.program_id(0) % num_ht
        valid_rows = jnp.minimum(height - ht * tile_h, tile_h) * width
        rows = jax.lax.broadcasted_iota(jnp.int32, acc.shape, 0)
        acc = jnp.where(rows < valid_rows, acc, 0.0)
    ssum = jnp.sum(acc, axis=0, keepdims=True)       # (1, Cpad)
    ssq = jnp.sum(acc * acc, axis=0, keepdims=True)  # (1, Cpad)
    r = jax.lax.broadcasted_iota(jnp.int32, s_ref.shape, 0)
    s_ref[...] = jnp.where(r == 0, ssum, 0.0) + jnp.where(r == 1, ssq, 0.0)


def _fused_conv_bn_relu_kernel(x_ref, w_ref, p_ref, o_ref):
    """Recompute conv for the strip and fuse BN scale/shift + ReLU into the store."""
    acc = _conv_tile(x_ref[0], w_ref[...])
    scale = p_ref[0:1, :]   # (1, Cpad): gamma * rsqrt(var + eps)
    shift = p_ref[1:2, :]   # (1, Cpad): beta - mean * scale
    o_ref[0] = jnp.maximum(acc * scale + shift, 0.0)


def _pick_tile_h(height, width, cin, cpad, vmem_budget):
    """Rows-per-strip so the lane-dense output block is ~>=1 MiB but fits the VMEM budget."""
    cin_l = _round_up(cin, _LANE)
    target_rows = 2048
    th = max(1, min(height, target_rows // max(width, 1)))

    def est(t):
        in_blk = (t + 2) * _round_up(width + 2, 8) * cin_l * 4
        out_blk = _round_up(t * width, 8) * cpad * 4
        w_blk = _round_up(9 * cin, 8) * cpad * 4
        stats_blk = 8 * cpad * 4
        # double-buffered pipeline blocks + in-kernel tap copies / accumulator headroom
        work = 2 * t * width * cin_l * 4 + 2 * out_blk
        return 2 * (in_blk + out_blk + w_blk + stats_blk) + work

    while th > 1 and est(th) > vmem_budget:
        th = max(1, th // 2)
    return th


def normal_conv_block(x_nchw, weight_oihw, bias, gamma, beta, *, padding=1):
    """Forward pass of NormalConvBlock (kernel_size=3, stride=1). NCHW in / NCHW out."""
    N, Cin, H, W = x_nchw.shape
    Cout, _, KH, KW = weight_oihw.shape
    assert (KH, KW) == (3, 3) and padding == 1, "specialized to the module defaults"
    del bias  # exactly cancelled by training-mode BN mean subtraction

    Cpad = max(_LANE, _round_up(Cout, _LANE))

    # generation-appropriate VMEM limit (v5e/v6e: 128 MiB physical -> ~96; v7x: 64 -> ~48)
    try:
        vmem_cap = int(pltpu.get_tpu_info().vmem_capacity_bytes)
    except Exception:
        vmem_cap = 64 * 1024 * 1024
    vmem_limit = max(32 * 1024 * 1024, min(vmem_cap * 3 // 4, 100 * 1024 * 1024))

    TH = _pick_tile_h(H, W, Cin, Cpad, vmem_limit // 2)
    num_ht = pl.cdiv(H, TH)
    Hp = num_ht * TH
    NT = N * num_ht        # grid size: parallel row-strip tiles (shards across v7x cores)
    R = N * H * W          # valid pixel count for batch statistics

    # --- glue: NCHW -> NHWC, spatial halo pad, per-tile halo strips (~1x input traffic)
    x = jnp.transpose(x_nchw, (0, 2, 3, 1)).astype(jnp.float32)          # (N, H, W, Cin)
    xp = jnp.pad(x, ((0, 0), (1, 1 + Hp - H), (1, 1), (0, 0)))           # (N, Hp+2, W+2, Cin)
    strips = jnp.stack([xp[:, t * TH:t * TH + TH + 2] for t in range(num_ht)], axis=1)
    strips = strips.reshape(NT, TH + 2, W + 2, Cin)

    # weights OIHW -> (9*Cin, Cpad), rows ordered (kh, kw, cin), Cout lane-padded
    w = jnp.transpose(weight_oihw.astype(jnp.float32), (2, 3, 1, 0)).reshape(9 * Cin, Cout)
    w = jnp.pad(w, ((0, 0), (0, Cpad - Cout)))

    cparams = pltpu.CompilerParams(
        dimension_semantics=("parallel",),
        vmem_limit_bytes=vmem_limit,
    )
    strip_spec = pl.BlockSpec((1, TH + 2, W + 2, Cin), lambda i: (i, 0, 0, 0))
    w_spec = pl.BlockSpec((9 * Cin, Cpad), lambda i: (0, 0))

    # --- pass 1: per-strip partial BN statistics (conv output never written to HBM)
    stats = pl.pallas_call(
        functools.partial(_stats_kernel, num_ht=num_ht, tile_h=TH, height=H, width=W),
        grid=(NT,),
        in_specs=[strip_spec, w_spec],
        out_specs=pl.BlockSpec((8, Cpad), lambda i: (i, 0)),
        out_shape=jax.ShapeDtypeStruct((NT * 8, Cpad), jnp.float32),
        compiler_params=cparams,
    )(strips, w)

    # --- finalize: tiny reduction -> folded per-channel scale/shift
    stats = stats.reshape(NT, 8, Cpad)
    ssum = jnp.sum(stats[:, 0, :], axis=0)
    ssq = jnp.sum(stats[:, 1, :], axis=0)
    mean = ssum / R
    var = jnp.maximum(ssq / R - mean * mean, 0.0)   # biased batch variance (training mode)
    gamma_p = jnp.pad(gamma.astype(jnp.float32), (0, Cpad - Cout))
    beta_p = jnp.pad(beta.astype(jnp.float32), (0, Cpad - Cout))
    scale = gamma_p * jax.lax.rsqrt(var + _EPS)
    shift = beta_p - mean * scale
    params = jnp.zeros((8, Cpad), jnp.float32).at[0].set(scale).at[1].set(shift)

    # --- pass 2: recompute conv (free under the DMA bound) fused with BN FMA + ReLU
    y = pl.pallas_call(
        _fused_conv_bn_relu_kernel,
        grid=(NT,),
        in_specs=[strip_spec, w_spec, pl.BlockSpec((8, Cpad), lambda i: (0, 0))],
        out_specs=pl.BlockSpec((1, TH * W, Cpad), lambda i: (i, 0, 0)),
        out_shape=jax.ShapeDtypeStruct((NT, TH * W, Cpad), jnp.float32),
        compiler_params=cparams,
    )(strips, w, params)

    # --- glue: strip row/channel padding, NHWC -> NCHW
    y = y.reshape(N, Hp, W, Cpad)[:, :H, :, :Cout]
    return jnp.transpose(y, (0, 3, 1, 2))


def _reference(x_nchw, weight_oihw, bias, gamma, beta):
    y = jax.lax.conv_general_dilated(
        x_nchw, weight_oihw, window_strides=(1, 1),
        padding=((1, 1), (1, 1)),
        dimension_numbers=("NCHW", "OIHW", "NCHW"),
    )
    y = y + bias[None, :, None, None]
    mean = y.mean(axis=(0, 2, 3), keepdims=True)
    var = ((y - mean) ** 2).mean(axis=(0, 2, 3), keepdims=True)
    y = (y - mean) * jax.lax.rsqrt(var + _EPS)
    y = y * gamma[None, :, None, None] + beta[None, :, None, None]
    return jnp.maximum(y, 0.0)


if __name__ == "__main__":
    N, Cin, Cout, H, W = 2, 4, 8, 16, 16

    key = jax.random.PRNGKey(0)
    kx, kw, kb, kg, kbt = jax.random.split(key, 5)

    x = jax.random.normal(kx, (N, Cin, H, W), dtype=jnp.float32)
    weight = 0.1 * jax.random.normal(kw, (Cout, Cin, 3, 3), dtype=jnp.float32)
    bias = 0.1 * jax.random.normal(kb, (Cout,), dtype=jnp.float32)
    gamma = 1.0 + 0.1 * jax.random.normal(kg, (Cout,), dtype=jnp.float32)
    beta = 0.1 * jax.random.normal(kbt, (Cout,), dtype=jnp.float32)

    run = jax.jit(normal_conv_block)
    out = jax.block_until_ready(run(x, weight, bias, gamma, beta))
    ref = jax.block_until_ready(_reference(x, weight, bias, gamma, beta))

    assert out.shape == (N, Cout, H, W)
    max_err = float(jnp.max(jnp.abs(out - ref)))
    assert jnp.allclose(out, ref, atol=1e-4, rtol=1e-4), f"max abs err {max_err}"
    print("KERNEL_OK")
</pallas_src>

<mosaic_0001>
module attributes {stable_mosaic.version = 11 : i64} {
  func.func @_stats_kernel(%arg0: i32, %arg1: memref<1x18x18x4xf32, #tpu.memory_space<vmem>>, %arg2: memref<36x128xf32, #tpu.memory_space<vmem>>, %arg3: memref<8x128xf32, #tpu.memory_space<vmem>>) attributes {dimension_semantics = [#tpu.dimension_semantics<parallel>], iteration_bounds = array<i64: 2>, scalar_prefetch = 0 : i64, scratch_operands = 0 : i64, tpu.core_type = #tpu.core_type<tc>, window_params = [{transform_indices = @transform_0, window_bounds = array<i64: 1, 18, 18, 4>}, {pipeline_mode = #tpu.pipeline_mode<synchronous>, transform_indices = @transform_1, window_bounds = array<i64: 36, 128>}, {transform_indices = @transform_2, window_bounds = array<i64: 8, 128>}]} {
    %c0 = arith.constant 0 : index
    %c0_0 = arith.constant 0 : index
    %c0_1 = arith.constant 0 : index
    %c0_2 = arith.constant 0 : index
    %0 = vector.load %arg1[%c0, %c0_0, %c0_1, %c0_2] : memref<1x18x18x4xf32, #tpu.memory_space<vmem>>, vector<1x18x18x4xf32>
    %1 = vector.shape_cast %0 : vector<1x18x18x4xf32> to vector<18x18x4xf32>
    %c0_3 = arith.constant 0 : index
    %c0_4 = arith.constant 0 : index
    %2 = vector.load %arg2[%c0_3, %c0_4] : memref<36x128xf32, #tpu.memory_space<vmem>>, vector<36x128xf32>
    %cst = arith.constant 0.000000e+00 : f32
    %3 = vector.broadcast %cst : f32 to vector<256x128xf32>
    %4 = vector.extract_strided_slice %1 {offsets = [0, 0, 0], sizes = [16, 16, 4], strides = [1, 1, 1]} : vector<18x18x4xf32> to vector<16x16x4xf32>
    %5 = vector.shape_cast %4 : vector<16x16x4xf32> to vector<256x4xf32>
    %6 = vector.extract_strided_slice %2 {offsets = [0, 0], sizes = [4, 128], strides = [1, 1]} : vector<36x128xf32> to vector<4x128xf32>
    %cst_5 = arith.constant dense<0.000000e+00> : vector<256x128xf32>
    %7 = tpu.matmul %5, %6, %cst_5 {dimension_numbers = #tpu.dot_dimension_numbers<[1], [0], [0], [1], [0, 0, 1, 1], [], []>} : vector<256x4xf32>, vector<4x128xf32>, vector<256x128xf32> -> vector<256x128xf32>
    %8 = arith.addf %3, %7 : vector<256x128xf32>
    %9 = vector.extract_strided_slice %1 {offsets = [0, 1, 0], sizes = [16, 16, 4], strides = [1, 1, 1]} : vector<18x18x4xf32> to vector<16x16x4xf32>
    %10 = vector.shape_cast %9 : vector<16x16x4xf32> to vector<256x4xf32>
    %11 = vector.extract_strided_slice %2 {offsets = [4, 0], sizes = [4, 128], strides = [1, 1]} : vector<36x128xf32> to vector<4x128xf32>
    %cst_6 = arith.constant dense<0.000000e+00> : vector<256x128xf32>
    %12 = tpu.matmul %10, %11, %cst_6 {dimension_numbers = #tpu.dot_dimension_numbers<[1], [0], [0], [1], [0, 0, 1, 1], [], []>} : vector<256x4xf32>, vector<4x128xf32>, vector<256x128xf32> -> vector<256x128xf32>
    %13 = arith.addf %8, %12 : vector<256x128xf32>
    %14 = vector.extract_strided_slice %1 {offsets = [0, 2, 0], sizes = [16, 16, 4], strides = [1, 1, 1]} : vector<18x18x4xf32> to vector<16x16x4xf32>
    %15 = vector.shape_cast %14 : vector<16x16x4xf32> to vector<256x4xf32>
    %16 = vector.extract_strided_slice %2 {offsets = [8, 0], sizes = [4, 128], strides = [1, 1]} : vector<36x128xf32> to vector<4x128xf32>
    %cst_7 = arith.constant dense<0.000000e+00> : vector<256x128xf32>
    %17 = tpu.matmul %15, %16, %cst_7 {dimension_numbers = #tpu.dot_dimension_numbers<[1], [0], [0], [1], [0, 0, 1, 1], [], []>} : vector<256x4xf32>, vector<4x128xf32>, vector<256x128xf32> -> vector<256x128xf32>
    %18 = arith.addf %13, %17 : vector<256x128xf32>
    %19 = vector.extract_strided_slice %1 {offsets = [1, 0, 0], sizes = [16, 16, 4], strides = [1, 1, 1]} : vector<18x18x4xf32> to vector<16x16x4xf32>
    %20 = vector.shape_cast %19 : vector<16x16x4xf32> to vector<256x4xf32>
    %21 = vector.extract_strided_slice %2 {offsets = [12, 0], sizes = [4, 128], strides = [1, 1]} : vector<36x128xf32> to vector<4x128xf32>
    %cst_8 = arith.constant dense<0.000000e+00> : vector<256x128xf32>
    %22 = tpu.matmul %20, %21, %cst_8 {dimension_numbers = #tpu.dot_dimension_numbers<[1], [0], [0], [1], [0, 0, 1, 1], [], []>} : vector<256x4xf32>, vector<4x128xf32>, vector<256x128xf32> -> vector<256x128xf32>
    %23 = arith.addf %18, %22 : vector<256x128xf32>
    %24 = vector.extract_strided_slice %1 {offsets = [1, 1, 0], sizes = [16, 16, 4], strides = [1, 1, 1]} : vector<18x18x4xf32> to vector<16x16x4xf32>
    %25 = vector.shape_cast %24 : vector<16x16x4xf32> to vector<256x4xf32>
    %26 = vector.extract_strided_slice %2 {offsets = [16, 0], sizes = [4, 128], strides = [1, 1]} : vector<36x128xf32> to vector<4x128xf32>
    %cst_9 = arith.constant dense<0.000000e+00> : vector<256x128xf32>
    %27 = tpu.matmul %25, %26, %cst_9 {dimension_numbers = #tpu.dot_dimension_numbers<[1], [0], [0], [1], [0, 0, 1, 1], [], []>} : vector<256x4xf32>, vector<4x128xf32>, vector<256x128xf32> -> vector<256x128xf32>
    %28 = arith.addf %23, %27 : vector<256x128xf32>
    %29 = vector.extract_strided_slice %1 {offsets = [1, 2, 0], sizes = [16, 16, 4], strides = [1, 1, 1]} : vector<18x18x4xf32> to vector<16x16x4xf32>
    %30 = vector.shape_cast %29 : vector<16x16x4xf32> to vector<256x4xf32>
    %31 = vector.extract_strided_slice %2 {offsets = [20, 0], sizes = [4, 128], strides = [1, 1]} : vector<36x128xf32> to vector<4x128xf32>
    %cst_10 = arith.constant dense<0.000000e+00> : vector<256x128xf32>
    %32 = tpu.matmul %30, %31, %cst_10 {dimension_numbers = #tpu.dot_dimension_numbers<[1], [0], [0], [1], [0, 0, 1, 1], [], []>} : vector<256x4xf32>, vector<4x128xf32>, vector<256x128xf32> -> vector<256x128xf32>
    %33 = arith.addf %28, %32 : vector<256x128xf32>
    %34 = vector.extract_strided_slice %1 {offsets = [2, 0, 0], sizes = [16, 16, 4], strides = [1, 1, 1]} : vector<18x18x4xf32> to vector<16x16x4xf32>
    %35 = vector.shape_cast %34 : vector<16x16x4xf32> to vector<256x4xf32>
    %36 = vector.extract_strided_slice %2 {offsets = [24, 0], sizes = [4, 128], strides = [1, 1]} : vector<36x128xf32> to vector<4x128xf32>
    %cst_11 = arith.constant dense<0.000000e+00> : vector<256x128xf32>
    %37 = tpu.matmul %35, %36, %cst_11 {dimension_numbers = #tpu.dot_dimension_numbers<[1], [0], [0], [1], [0, 0, 1, 1], [], []>} : vector<256x4xf32>, vector<4x128xf32>, vector<256x128xf32> -> vector<256x128xf32>
    %38 = arith.addf %33, %37 : vector<256x128xf32>
    %39 = vector.extract_strided_slice %1 {offsets = [2, 1, 0], sizes = [16, 16, 4], strides = [1, 1, 1]} : vector<18x18x4xf32> to vector<16x16x4xf32>
    %40 = vector.shape_cast %39 : vector<16x16x4xf32> to vector<256x4xf32>
    %41 = vector.extract_strided_slice %2 {offsets = [28, 0], sizes = [4, 128], strides = [1, 1]} : vector<36x128xf32> to vector<4x128xf32>
    %cst_12 = arith.constant dense<0.000000e+00> : vector<256x128xf32>
    %42 = tpu.matmul %40, %41, %cst_12 {dimension_numbers = #tpu.dot_dimension_numbers<[1], [0], [0], [1], [0, 0, 1, 1], [], []>} : vector<256x4xf32>, vector<4x128xf32>, vector<256x128xf32> -> vector<256x128xf32>
    %43 = arith.addf %38, %42 : vector<256x128xf32>
    %44 = vector.extract_strided_slice %1 {offsets = [2, 2, 0], sizes = [16, 16, 4], strides = [1, 1, 1]} : vector<18x18x4xf32> to vector<16x16x4xf32>
    %45 = vector.shape_cast %44 : vector<16x16x4xf32> to vector<256x4xf32>
    %46 = vector.extract_strided_slice %2 {offsets = [32, 0], sizes = [4, 128], strides = [1, 1]} : vector<36x128xf32> to vector<4x128xf32>
    %cst_13 = arith.constant dense<0.000000e+00> : vector<256x128xf32>
    %47 = tpu.matmul %45, %46, %cst_13 {dimension_numbers = #tpu.dot_dimension_numbers<[1], [0], [0], [1], [0, 0, 1, 1], [], []>} : vector<256x4xf32>, vector<4x128xf32>, vector<256x128xf32> -> vector<256x128xf32>
    %48 = arith.addf %43, %47 : vector<256x128xf32>
    %cst_14 = arith.constant dense<0.000000e+00> : vector<128xf32>
    %49 = vector.multi_reduction <add>, %48, %cst_14 [0] : vector<256x128xf32> to vector<128xf32>
    %50 = vector.shape_cast %49 : vector<128xf32> to vector<1x128xf32>
    %51 = arith.mulf %48, %48 : vector<256x128xf32>
    %cst_15 = arith.constant dense<0.000000e+00> : vector<128xf32>
    %52 = vector.multi_reduction <add>, %51, %cst_15 [0] : vector<256x128xf32> to vector<128xf32>
    %53 = vector.shape_cast %52 : vector<128xf32> to vector<1x128xf32>
    %54 = tpu.iota {dimensions = array<i32: 0>} : vector<8x128xi32>
    %c0_i32 = arith.constant 0 : i32
    %55 = vector.broadcast %c0_i32 : i32 to vector<8x128xi32>
    %56 = arith.cmpi eq, %54, %55 : vector<8x128xi32>
    %cst_16 = arith.constant 0.000000e+00 : f32
    %57 = vector.shape_cast %50 : vector<1x128xf32> to vector<1x128xf32>
    %58 = vector.broadcast %57 : vector<1x128xf32> to vector<8x128xf32>
    %59 = vector.broadcast %cst_16 : f32 to vector<8x128xf32>
    %60 = arith.select %56, %58, %59 : vector<8x128xi1>, vector<8x128xf32>
    %c1_i32 = arith.constant 1 : i32
    %61 = vector.broadcast %c1_i32 : i32 to vector<8x128xi32>
    %62 = arith.cmpi eq, %54, %61 : vector<8x128xi32>
    %cst_17 = arith.constant 0.000000e+00 : f32
    %63 = vector.shape_cast %53 : vector<1x128xf32> to vector<1x128xf32>
    %64 = vector.broadcast %63 : vector<1x128xf32> to vector<8x128xf32>
    %65 = vector.broadcast %cst_17 : f32 to vector<8x128xf32>
    %66 = arith.select %62, %64, %65 : vector<8x128xi1>, vector<8x128xf32>
    %67 = arith.addf %60, %66 : vector<8x128xf32>
    %c0_18 = arith.constant 0 : index
    %c0_19 = arith.constant 0 : index
    %68 = vector.load %arg3[%c0_18, %c0_19] : memref<8x128xf32, #tpu.memory_space<vmem>>, vector<8x128xf32>
    tpu.vector_store %arg3[%c0_18, %c0_19], %67 {strides = array<i32>} : memref<8x128xf32, #tpu.memory_space<vmem>>, vector<8x128xf32>,
    return
  }
  func.func @transform_0(%arg0: i32) -> (i32, i32, i32, i32) {
    %c0_i32 = arith.constant 0 : i32
    %c0_i32_0 = arith.constant 0 : i32
    %c0_i32_1 = arith.constant 0 : i32
    %c0_i32_2 = arith.constant 0 : i32
    return %arg0, %c0_i32, %c0_i32_0, %c0_i32_1 : i32, i32, i32, i32
  }
  func.func @transform_1(%arg0: i32) -> (i32, i32) {
    %c0_i32 = arith.constant 0 : i32
    %c0_i32_0 = arith.constant 0 : i32
    %c0_i32_1 = arith.constant 0 : i32
    return %c0_i32, %c0_i32_0 : i32, i32
  }
  func.func @transform_2(%arg0: i32) -> (i32, i32) {
    %c0_i32 = arith.constant 0 : i32
    %c0_i32_0 = arith.constant 0 : i32
    return %arg0, %c0_i32 : i32, i32
  }
}

module attributes {stable_mosaic.version = 11 : i64} {
  func.func @_fused_conv_bn_relu_kernel(%arg0: i32, %arg1: memref<1x18x18x4xf32, #tpu.memory_space<vmem>>, %arg2: memref<36x128xf32, #tpu.memory_space<vmem>>, %arg3: memref<8x128xf32, #tpu.memory_space<vmem>>, %arg4: memref<1x256x128xf32, #tpu.memory_space<vmem>>) attributes {dimension_semantics = [#tpu.dimension_semantics<parallel>], iteration_bounds = array<i64: 2>, scalar_prefetch = 0 : i64, scratch_operands = 0 : i64, tpu.core_type = #tpu.core_type<tc>, window_params = [{transform_indices = @transform_0, window_bounds = array<i64: 1, 18, 18, 4>}, {pipeline_mode = #tpu.pipeline_mode<synchronous>, transform_indices = @transform_1, window_bounds = array<i64: 36, 128>}, {pipeline_mode = #tpu.pipeline_mode<synchronous>, transform_indices = @transform_2, window_bounds = array<i64: 8, 128>}, {transform_indices = @transform_3, window_bounds = array<i64: 1, 256, 128>}]} {
    %c0 = arith.constant 0 : index
    %c0_0 = arith.constant 0 : index
    %c0_1 = arith.constant 0 : index
    %c0_2 = arith.constant 0 : index
    %0 = vector.load %arg1[%c0, %c0_0, %c0_1, %c0_2] : memref<1x18x18x4xf32, #tpu.memory_space<vmem>>, vector<1x18x18x4xf32>
    %1 = vector.shape_cast %0 : vector<1x18x18x4xf32> to vector<18x18x4xf32>
    %c0_3 = arith.constant 0 : index
    %c0_4 = arith.constant 0 : index
    %2 = vector.load %arg2[%c0_3, %c0_4] : memref<36x128xf32, #tpu.memory_space<vmem>>, vector<36x128xf32>
    %cst = arith.constant 0.000000e+00 : f32
    %3 = vector.broadcast %cst : f32 to vector<256x128xf32>
    %4 = vector.extract_strided_slice %1 {offsets = [0, 0, 0], sizes = [16, 16, 4], strides = [1, 1, 1]} : vector<18x18x4xf32> to vector<16x16x4xf32>
    %5 = vector.shape_cast %4 : vector<16x16x4xf32> to vector<256x4xf32>
    %6 = vector.extract_strided_slice %2 {offsets = [0, 0], sizes = [4, 128], strides = [1, 1]} : vector<36x128xf32> to vector<4x128xf32>
    %cst_5 = arith.constant dense<0.000000e+00> : vector<256x128xf32>
    %7 = tpu.matmul %5, %6, %cst_5 {dimension_numbers = #tpu.dot_dimension_numbers<[1], [0], [0], [1], [0, 0, 1, 1], [], []>} : vector<256x4xf32>, vector<4x128xf32>, vector<256x128xf32> -> vector<256x128xf32>
    %8 = arith.addf %3, %7 : vector<256x128xf32>
    %9 = vector.extract_strided_slice %1 {offsets = [0, 1, 0], sizes = [16, 16, 4], strides = [1, 1, 1]} : vector<18x18x4xf32> to vector<16x16x4xf32>
    %10 = vector.shape_cast %9 : vector<16x16x4xf32> to vector<256x4xf32>
    %11 = vector.extract_strided_slice %2 {offsets = [4, 0], sizes = [4, 128], strides = [1, 1]} : vector<36x128xf32> to vector<4x128xf32>
    %cst_6 = arith.constant dense<0.000000e+00> : vector<256x128xf32>
    %12 = tpu.matmul %10, %11, %cst_6 {dimension_numbers = #tpu.dot_dimension_numbers<[1], [0], [0], [1], [0, 0, 1, 1], [], []>} : vector<256x4xf32>, vector<4x128xf32>, vector<256x128xf32> -> vector<256x128xf32>
    %13 = arith.addf %8, %12 : vector<256x128xf32>
    %14 = vector.extract_strided_slice %1 {offsets = [0, 2, 0], sizes = [16, 16, 4], strides = [1, 1, 1]} : vector<18x18x4xf32> to vector<16x16x4xf32>
    %15 = vector.shape_cast %14 : vector<16x16x4xf32> to vector<256x4xf32>
    %16 = vector.extract_strided_slice %2 {offsets = [8, 0], sizes = [4, 128], strides = [1, 1]} : vector<36x128xf32> to vector<4x128xf32>
    %cst_7 = arith.constant dense<0.000000e+00> : vector<256x128xf32>
    %17 = tpu.matmul %15, %16, %cst_7 {dimension_numbers = #tpu.dot_dimension_numbers<[1], [0], [0], [1], [0, 0, 1, 1], [], []>} : vector<256x4xf32>, vector<4x128xf32>, vector<256x128xf32> -> vector<256x128xf32>
    %18 = arith.addf %13, %17 : vector<256x128xf32>
    %19 = vector.extract_strided_slice %1 {offsets = [1, 0, 0], sizes = [16, 16, 4], strides = [1, 1, 1]} : vector<18x18x4xf32> to vector<16x16x4xf32>
    %20 = vector.shape_cast %19 : vector<16x16x4xf32> to vector<256x4xf32>
    %21 = vector.extract_strided_slice %2 {offsets = [12, 0], sizes = [4, 128], strides = [1, 1]} : vector<36x128xf32> to vector<4x128xf32>
    %cst_8 = arith.constant dense<0.000000e+00> : vector<256x128xf32>
    %22 = tpu.matmul %20, %21, %cst_8 {dimension_numbers = #tpu.dot_dimension_numbers<[1], [0], [0], [1], [0, 0, 1, 1], [], []>} : vector<256x4xf32>, vector<4x128xf32>, vector<256x128xf32> -> vector<256x128xf32>
    %23 = arith.addf %18, %22 : vector<256x128xf32>
    %24 = vector.extract_strided_slice %1 {offsets = [1, 1, 0], sizes = [16, 16, 4], strides = [1, 1, 1]} : vector<18x18x4xf32> to vector<16x16x4xf32>
    %25 = vector.shape_cast %24 : vector<16x16x4xf32> to vector<256x4xf32>
    %26 = vector.extract_strided_slice %2 {offsets = [16, 0], sizes = [4, 128], strides = [1, 1]} : vector<36x128xf32> to vector<4x128xf32>
    %cst_9 = arith.constant dense<0.000000e+00> : vector<256x128xf32>
    %27 = tpu.matmul %25, %26, %cst_9 {dimension_numbers = #tpu.dot_dimension_numbers<[1], [0], [0], [1], [0, 0, 1, 1], [], []>} : vector<256x4xf32>, vector<4x128xf32>, vector<256x128xf32> -> vector<256x128xf32>
    %28 = arith.addf %23, %27 : vector<256x128xf32>
    %29 = vector.extract_strided_slice %1 {offsets = [1, 2, 0], sizes = [16, 16, 4], strides = [1, 1, 1]} : vector<18x18x4xf32> to vector<16x16x4xf32>
    %30 = vector.shape_cast %29 : vector<16x16x4xf32> to vector<256x4xf32>
    %31 = vector.extract_strided_slice %2 {offsets = [20, 0], sizes = [4, 128], strides = [1, 1]} : vector<36x128xf32> to vector<4x128xf32>
    %cst_10 = arith.constant dense<0.000000e+00> : vector<256x128xf32>
    %32 = tpu.matmul %30, %31, %cst_10 {dimension_numbers = #tpu.dot_dimension_numbers<[1], [0], [0], [1], [0, 0, 1, 1], [], []>} : vector<256x4xf32>, vector<4x128xf32>, vector<256x128xf32> -> vector<256x128xf32>
    %33 = arith.addf %28, %32 : vector<256x128xf32>
    %34 = vector.extract_strided_slice %1 {offsets = [2, 0, 0], sizes = [16, 16, 4], strides = [1, 1, 1]} : vector<18x18x4xf32> to vector<16x16x4xf32>
    %35 = vector.shape_cast %34 : vector<16x16x4xf32> to vector<256x4xf32>
    %36 = vector.extract_strided_slice %2 {offsets = [24, 0], sizes = [4, 128], strides = [1, 1]} : vector<36x128xf32> to vector<4x128xf32>
    %cst_11 = arith.constant dense<0.000000e+00> : vector<256x128xf32>
    %37 = tpu.matmul %35, %36, %cst_11 {dimension_numbers = #tpu.dot_dimension_numbers<[1], [0], [0], [1], [0, 0, 1, 1], [], []>} : vector<256x4xf32>, vector<4x128xf32>, vector<256x128xf32> -> vector<256x128xf32>
    %38 = arith.addf %33, %37 : vector<256x128xf32>
    %39 = vector.extract_strided_slice %1 {offsets = [2, 1, 0], sizes = [16, 16, 4], strides = [1, 1, 1]} : vector<18x18x4xf32> to vector<16x16x4xf32>
    %40 = vector.shape_cast %39 : vector<16x16x4xf32> to vector<256x4xf32>
    %41 = vector.extract_strided_slice %2 {offsets = [28, 0], sizes = [4, 128], strides = [1, 1]} : vector<36x128xf32> to vector<4x128xf32>
    %cst_12 = arith.constant dense<0.000000e+00> : vector<256x128xf32>
    %42 = tpu.matmul %40, %41, %cst_12 {dimension_numbers = #tpu.dot_dimension_numbers<[1], [0], [0], [1], [0, 0, 1, 1], [], []>} : vector<256x4xf32>, vector<4x128xf32>, vector<256x128xf32> -> vector<256x128xf32>
    %43 = arith.addf %38, %42 : vector<256x128xf32>
    %44 = vector.extract_strided_slice %1 {offsets = [2, 2, 0], sizes = [16, 16, 4], strides = [1, 1, 1]} : vector<18x18x4xf32> to vector<16x16x4xf32>
    %45 = vector.shape_cast %44 : vector<16x16x4xf32> to vector<256x4xf32>
    %46 = vector.extract_strided_slice %2 {offsets = [32, 0], sizes = [4, 128], strides = [1, 1]} : vector<36x128xf32> to vector<4x128xf32>
    %cst_13 = arith.constant dense<0.000000e+00> : vector<256x128xf32>
    %47 = tpu.matmul %45, %46, %cst_13 {dimension_numbers = #tpu.dot_dimension_numbers<[1], [0], [0], [1], [0, 0, 1, 1], [], []>} : vector<256x4xf32>, vector<4x128xf32>, vector<256x128xf32> -> vector<256x128xf32>
    %48 = arith.addf %43, %47 : vector<256x128xf32>
    %c0_14 = arith.constant 0 : index
    %c0_15 = arith.constant 0 : index
    %49 = vector.load %arg3[%c0_14, %c0_15] : memref<8x128xf32, #tpu.memory_space<vmem>>, vector<1x128xf32>
    %c1 = arith.constant 1 : index
    %c0_16 = arith.constant 0 : index
    %50 = vector.load %arg3[%c1, %c0_16] : memref<8x128xf32, #tpu.memory_space<vmem>>, vector<1x128xf32>
    %51 = vector.broadcast %49 : vector<1x128xf32> to vector<256x128xf32>
    %52 = arith.mulf %48, %51 : vector<256x128xf32>
    %53 = vector.broadcast %50 : vector<1x128xf32> to vector<256x128xf32>
    %54 = arith.addf %52, %53 : vector<256x128xf32>
    %cst_17 = arith.constant 0.000000e+00 : f32
    %55 = vector.broadcast %cst_17 : f32 to vector<256x128xf32>
    %56 = arith.maximumf %54, %55 : vector<256x128xf32>
    %c0_18 = arith.constant 0 : index
    %c0_19 = arith.constant 0 : index
    %c0_20 = arith.constant 0 : index
    %57 = vector.load %arg4[%c0_18, %c0_19, %c0_20] : memref<1x256x128xf32, #tpu.memory_space<vmem>>, vector<1x256x128xf32>
    %58 = vector.shape_cast %57 : vector<1x256x128xf32> to vector<256x128xf32>
    %59 = vector.shape_cast %56 : vector<256x128xf32> to vector<1x256x128xf32>
    tpu.vector_store %arg4[%c0_18, %c0_19, %c0_20], %59 {strides = array<i32>} : memref<1x256x128xf32, #tpu.memory_space<vmem>>, vector<1x256x128xf32>,
    return
  }
  func.func @transform_0(%arg0: i32) -> (i32, i32, i32, i32) {
    %c0_i32 = arith.constant 0 : i32
    %c0_i32_0 = arith.constant 0 : i32
    %c0_i32_1 = arith.constant 0 : i32
    %c0_i32_2 = arith.constant 0 : i32
    return %arg0, %c0_i32, %c0_i32_0, %c0_i32_1 : i32, i32, i32, i32
  }
  func.func @transform_1(%arg0: i32) -> (i32, i32) {
    %c0_i32 = arith.constant 0 : i32
    %c0_i32_0 = arith.constant 0 : i32
    %c0_i32_1 = arith.constant 0 : i32
    return %c0_i32, %c0_i32_0 : i32, i32
  }
  func.func @transform_2(%arg0: i32) -> (i32, i32) {
    %c0_i32 = arith.constant 0 : i32
    %c0_i32_0 = arith.constant 0 : i32
    %c0_i32_1 = arith.constant 0 : i32
    return %c0_i32, %c0_i32_0 : i32, i32
  }
  func.func @transform_3(%arg0: i32) -> (i32, i32, i32) {
    %c0_i32 = arith.constant 0 : i32
    %c0_i32_0 = arith.constant 0 : i32
    %c0_i32_1 = arith.constant 0 : i32
    return %arg0, %c0_i32, %c0_i32_0 : i32, i32, i32
  }
}

</mosaic_0001>

<bundles_post_ra>
// kernel: normal_conv_block.2
= control target key start
LH: loop header
LB: loop body
LE: loop exit
PB: predicated region body
PF: predicated region fallthrough
CT: control target
= control target key end

     0   :  { %s4441_s9 = smov 0   ;;  %s5564_s0 = inlined_call_operand.vmem [shape: f32[2,18,18,4], index: 0, kind: input, shape index: {}]   ;;  %s5565_s1 = inlined_call_operand.vmem [shape: f32[36,128], index: 1, kind: input, shape index: {}]   ;;  %s5566_s2 = inlined_call_operand.vmem [shape: f32[16,128], index: 2, kind: output, shape index: {}]  }
   0x1 LB: > { %s3098_s10 = sadd.s32 4294967295, %s4424_s9   ;;  %p3102_p0 = scmp.ge.s32.totalorder %s4424_s9, 1  ;;  %s4424_s9 = sphi %s4441_s9, %s12_s9  }
   0x2   : > { %p112_p1 = scmp.lt.s32.totalorder %s4424_s9, 3 }
   0x4   : > { %p113_p2 = pnand %p3102_p0, %p112_p1 }
   0x6   : > { %116 = sbr.rel (%p113_p2) target bundleno = 546 (0x222), region = 28 }
   0xd   : > { %v196_v0 = vld [vmem:[%s5565_s1] sm:$0xff]  ;;  %vm397_vm0 = vcmask 1043456   ;;  %v4455_v1 = vld [vmem:[%s5565_s1 + $0x10] sm:$0xff]  ;;  %p133_p3 = scmp.lt.s32.totalorder %s3098_s10, 1  ;;  %vm249_vm1 = vcmask 1046528   ;;  %vm332_vm2 = vcmask 31744  }
   0xe   : > { %v331_v2 = vrot.slane %v196_v0, 4  ;;  %3901 = vmatprep.subr.msk.mxu0 %vm397_vm0, %v4455_v1  ;;  %v1862_v3 = vrot.slane %v4455_v1, 4  ;;  %v4537_v33 = vld [vmem:[%s5565_s1 + $0x18] sm:$0xff]  ;;  %v4547_v35 = vld [vmem:[%s5565_s1 + $0x8] sm:$0xff]  ;;  %vm916_vm3 = vcmask 1045504  }
   0xf   : > { %3902 = vmatpush3.msk.msra.mxu0 %vm397_vm0, %v4455_v1  ;;  %s5746_s10 = smov (!%p133_p3, %s3098_s10), 1 }
  0x10   : > { %3701 = vmatprep.subr.msk.mxu1 %vm397_vm0, %v331_v2  ;;  %3951 = vmatprep.subr.msk.mxu0 %vm397_vm0, %v1862_v3  ;;  %s4409_s15 = smul.u32 432, %s5746_s10  ;;  %s3104_s25 = sshll.u32 %s5746_s10, 3 }
  0x11   : > { %3702 = vmatpush3.msk.msra.mxu1 %vm397_vm0, %v331_v2  ;;  %s141_s28 = scalar_lea.vmem %s5566_s2, %s3104_s25 }
  0x12   : > { %3751 = vmatprep.subr.msk.mxu1 %vm397_vm0, %v196_v0  ;;  %s4472_s18 = scalar_lea.vmem %s5564_s0, %s4409_s15 }
  0x13   : > { %v4475_v4 = vld [vmem:[%s4472_s18] sm:$0xff]  ;;  %v4478_v5 = vld [vmem:[%s4472_s18 + $0x8] sm:$0xff]  ;;  %v4481_v6 = vld [vmem:[%s4472_s18 + $0x18] sm:$0xff] }
  0x14   : > { %5640 = vst [vmem:[#allocation2_spill] sm:$0xff] %v4481_v6  ;;  %v250_v7 = vrot.slane %v4475_v4, 1  ;;  %v251_v8 = vrot.slane %v4478_v5, 1  ;;  %v4486_v9 = vld [vmem:[%s4472_s18 + $0x20] sm:$0xff]  ;;  %v255_v10 = vrot.slane %v4481_v6, 1  ;;  %v4498_v15 = vld [vmem:[%s4472_s18 + $0x30] sm:$0xff] }
  0x15   : > { %5641 = vst [vmem:[#allocation3_spill] sm:$0xff] %v4486_v9  ;;  %v4490_v11 = vld [vmem:[%s4472_s18 + $0x10] sm:$0x3]  ;;  %v256_v12 = vrot.slane %v4486_v9, 1  ;;  %v4495_v14 = vld [vmem:[%s4472_s18 + $0x28] sm:$0x3] }
  0x16   : > { %v253_v13 = vrot.slane %v4490_v11, 1  ;;  %v252_v16 = vsel %vm249_vm1, %v250_v7, %v251_v8  ;;  %v258_v17 = vrot.slane %v4495_v14, 1  ;;  %v4503_v18 = vld [vmem:[%s4472_s18 + $0x38] sm:$0xff]  ;;  %v260_v19 = vrot.slane %v4498_v15, 1  ;;  %v4507_v20 = vld [vmem:[%s4472_s18 + $0x40] sm:$0x3] }
  0x17   : > { %3703 = vmatprep.mubr.msk.f32.mxu1 %vm332_vm2, %v252_v16  ;;  %v257_v21 = vsel %vm249_vm1, %v255_v10, %v256_v12  ;;  %v261_v23 = vrot.slane %v4503_v18, 1  ;;  %v263_v24 = vrot.slane %v4507_v20, 1  ;;  %v4515_v25 = vld [vmem:[%s4472_s18 + $0x48] sm:$0xff]  ;;  %v4518_v26 = vld [vmem:[%s4472_s18 + $0x50] sm:$0xff]  ;;  %v4521_v27 = vld [vmem:[%s4472_s18 + $0x58] sm:$0x3] }
  0x18   : > { %v254_v22 = vsel %vm249_vm1, %v251_v8, %v253_v13  ;;  %3903 = vmatprep.mubr.msk.f32.mxu0 %vm332_vm2, %v257_v21  ;;  %v259_v28 = vsel %vm249_vm1, %v256_v12, %v258_v17  ;;  %v265_v29 = vrot.slane %v4515_v25, 1  ;;  %v266_v30 = vrot.slane %v4518_v26, 1  ;;  %v4529_v31 = vld [vmem:[%s4472_s18 + $0x60] sm:$0xff]  ;;  %v4532_v32 = vld [vmem:[%s4472_s18 + $0x68] sm:$0xff]  ;;  %v4563_v41 = vld [vmem:[%s4472_s18 + $0x70] sm:$0x3] }
  0x19   : > { %3704 = vmatmul.mubr.msk.f32.vlgmr.msra.gmra.mrb[0].mxu1 %vm332_vm2, %v254_v22  ;;  %3904 = vmatmul.mubr.msk.f32.vlgmr.msra.gmra.mrb[0].mxu0 %vm332_vm2, %v259_v28  ;;  %v4542_v34 = vsel %vm249_vm1, %v260_v19, %v261_v23  ;;  %v4552_v36 = vsel %vm249_vm1, %v261_v23, %v263_v24  ;;  %v268_v37 = vrot.slane %v4521_v27, 1  ;;  %v270_v39 = vrot.slane %v4529_v31, 1  ;;  %v4569_v42 = vld [vmem:[%s4472_s18 + $0x78] sm:$0xff]  ;;  %v4572_v43 = vld [vmem:[%s4472_s18 + $0x80] sm:$0xff]  ;;  %v4592_v49 = vld [vmem:[%s4472_s18 + $0x88] sm:$0x3] }
  0x1a   : > { %3752 = vmatpush3.msk.msra.mxu1 %vm397_vm0, %v196_v0  ;;  %5642 = vst [vmem:[#allocation4_spill] sm:$0xff] %v4542_v34  ;;  %3952 = vmatpush3.msk.msra.mxu0 %vm397_vm0, %v1862_v3  ;;  %5643 = vst [vmem:[#allocation5_spill] sm:$0xff] %v4552_v36  ;;  %v4558_v38 = vsel %vm249_vm1, %v265_v29, %v266_v30  ;;  %v271_v40 = vrot.slane %v4532_v32, 1  ;;  %v273_v45 = vrot.slane %v4563_v41, 1  ;;  %v275_v47 = vrot.slane %v4569_v42, 1  ;;  %v4597_v50 = vld [vmem:[%s4472_s18 + $0x90] sm:$0xff] }
  0x1b   : > { %3706 = vmatprep.mubr.msk.f32.mxu1 %vm332_vm2, %v257_v21  ;;  %3906 = vmatprep.mubr.msk.f32.mxu0 %vm332_vm2, %v4542_v34  ;;  %5644 = vst [vmem:[#allocation6_spill] sm:$0xff] %v4558_v38  ;;  %v4583_v44 = vsel %vm249_vm1, %v266_v30, %v268_v37  ;;  %v276_v48 = vrot.slane %v4572_v43, 1  ;;  %v4600_v51 = vld [vmem:[%s4472_s18 + $0x98] sm:$0xff]  ;;  %v278_v53 = vrot.slane %v4592_v49, 1  ;;  %v280_v55 = vrot.slane %v4597_v50, 1  ;;  %v4623_v58 = vld [vmem:[%s4472_s18 + $0xa8] sm:$0xff] }
  0x1c   : > { %4001 = vmatprep.subr.msk.mxu0 %vm397_vm0, %v4537_v33  ;;  %3801 = vmatprep.subr.msk.mxu1 %vm397_vm0, %v4547_v35  ;;  %5645 = vst [vmem:[#allocation7_spill] sm:$0xff] %v4583_v44  ;;  %v4587_v46 = vsel %vm249_vm1, %v270_v39, %v271_v40  ;;  %v4609_v52 = vsel %vm249_vm1, %v271_v40, %v273_v45  ;;  %v281_v56 = vrot.slane %v4600_v51, 1  ;;  %v4618_v57 = vld [vmem:[%s4472_s18 + $0xa0] sm:$0x3]  ;;  %v4626_v59 = vld [vmem:[%s4472_s18 + $0xb0] sm:$0xff]  ;;  %v285_v63 = vrot.slane %v4623_v58, 1 }
  0x1d   : > { %3707 = vmatmul.mubr.msk.f32.gmra.mrb[2].mxu1 %vm332_vm2, %v259_v28  ;;  %3907 = vmatmul.mubr.msk.f32.gmra.mrb[2].mxu0 %vm332_vm2, %v4552_v36  ;;  %5646 = vst [vmem:[#allocation8_spill] sm:$0xff] %v4587_v46  ;;  %5647 = vst [vmem:[#allocation9_spill] sm:$0xff] %v4609_v52  ;;  %v4613_v54 = vsel %vm249_vm1, %v275_v47, %v276_v48  ;;  %v4635_v60 = vsel %vm249_vm1, %v276_v48, %v278_v53  ;;  %v283_v61 = vrot.slane %v4618_v57, 1  ;;  %v4644_v2 = vld [vmem:[%s4472_s18 + $0xb8] sm:$0x3]  ;;  %v4649_v3 = vld [vmem:[%s4472_s18 + $0xc0] sm:$0xff] }
  0x1e   : > { %3709 = vmatprep.mubr.msk.f32.mxu1 %vm332_vm2, %v4542_v34  ;;  %3909 = vmatprep.mubr.msk.f32.mxu0 %vm332_vm2, %v4558_v38  ;;  %5648 = vst [vmem:[#allocation10_spill] sm:$0xff] %v4613_v54  ;;  %5649 = vst [vmem:[#allocation11_spill] sm:$0xff] %v4635_v60  ;;  %v4639_v62 = vsel %vm249_vm1, %v280_v55, %v281_v56  ;;  %v286_v0 = vrot.slane %v4626_v59, 1  ;;  %v4652_v7 = vld [vmem:[%s4472_s18 + $0xc8] sm:$0xff]  ;;  %v288_v10 = vrot.slane %v4644_v2, 1  ;;  %v290_v13 = vrot.slane %v4649_v3, 1 }
  0x1f   : > { %5650 = vst [vmem:[#allocation12_spill] sm:$0xff] %v4639_v62  ;;  %v4661_v8 = vsel %vm249_vm1, %v281_v56, %v283_v61  ;;  %v291_v16 = vrot.slane %v4652_v7, 1  ;;  %v4670_v17 = vld [vmem:[%s4472_s18 + $0xd0] sm:$0x3]  ;;  %v922_v23 = vrot.slane %v4481_v6, 2  ;;  %v923_v24 = vrot.slane %v4486_v9, 2 }
  0x20   : > { %5651 = vst [vmem:[#allocation13_spill] sm:$0xff] %v4661_v8  ;;  %v4665_v12 = vsel %vm249_vm1, %v285_v63, %v286_v0  ;;  %v4681_v19 = vsel %vm249_vm1, %v286_v0, %v288_v10  ;;  %v293_v21 = vrot.slane %v4670_v17, 1  ;;  %v4690_v28 = vld [vmem:[%s4472_s18 + $0xd8] sm:$0xff]  ;;  %v4693_v29 = vld [vmem:[%s4472_s18 + $0xe0] sm:$0xff]  ;;  %v925_v30 = vrot.slane %v4495_v14, 2  ;;  %v4718_v53 = vld [vmem:[%s4472_s18 + $0xf0] sm:$0xff] }
  0x21   : > { %3710 = vmatmul.mubr.msk.f32.gmra.mrb[4].mxu1 %vm332_vm2, %v4552_v36  ;;  %3910 = vmatmul.mubr.msk.f32.gmra.mrb[4].mxu0 %vm332_vm2, %v4583_v44  ;;  %5652 = vst [vmem:[#allocation14_spill] sm:$0xff] %v4665_v12  ;;  %5653 = vst [vmem:[#allocation15_spill] sm:$0xff] %v4681_v19  ;;  %v4685_v22 = vsel %vm249_vm1, %v290_v13, %v291_v16  ;;  %v295_v39 = vrot.slane %v4690_v28, 1  ;;  %v296_v40 = vrot.slane %v4693_v29, 1  ;;  %v4710_v45 = vld [vmem:[%s4472_s18 + $0xe8] sm:$0x3] }
  0x22   : > { %3712 = vmatprep.mubr.msk.f32.mxu1 %vm332_vm2, %v4558_v38  ;;  %3912 = vmatprep.mubr.msk.f32.mxu0 %vm332_vm2, %v4587_v46  ;;  %5654 = vst [vmem:[#allocation16_spill] sm:$0xff] %v4685_v22  ;;  %v4705_v37 = vsel %vm249_vm1, %v291_v16, %v293_v21  ;;  %v4713_v47 = vsel %vm916_vm3, %v922_v23, %v923_v24  ;;  %v927_v48 = vrot.slane %v4498_v15, 2  ;;  %v928_v14 = vrot.slane %v4503_v18, 2  ;;  %v4721_v55 = vld [vmem:[%s4472_s18 + $0xf8] sm:$0xff]  ;;  %v4742_v16 = vld [vmem:[%s4472_s18 + $0x100] sm:$0x3] }
  0x23   : > { %5655 = vst [vmem:[#allocation17_spill] sm:$0xff] %v4705_v37  ;;  %v298_v56 = vrot.slane %v4710_v45, 1  ;;  %v930_v61 = vrot.slane %v4507_v20, 2  ;;  %v4734_v63 = vsel %vm916_vm3, %v923_v24, %v925_v30  ;;  %v4737_v0 = vsel %vm249_vm1, %v295_v39, %v296_v40  ;;  %v4751_v30 = vld [vmem:[%s4472_s18 + $0x108] sm:$0xff]  ;;  %v4754_v39 = vld [vmem:[%s4472_s18 + $0x110] sm:$0xff] }
  0x24   : > { %5656 = vst [vmem:[#allocation18_spill] sm:$0xff] %v4737_v0  ;;  %v300_v10 = vrot.slane %v4718_v53, 1  ;;  %v301_v13 = vrot.slane %v4721_v55, 1  ;;  %v4746_v23 = vsel %vm916_vm3, %v927_v48, %v928_v14  ;;  %v932_v20 = vrot.slane %v4515_v25, 2  ;;  %v4853_v36 = vld [vmem:[%s4472_s18 + $0x148] sm:$0x3] }
  0x25   : > { %3713 = vmatmul.mubr.msk.f32.gmra.mrb[6].mxu1 %vm332_vm2, %v4583_v44  ;;  %3913 = vmatmul.mubr.msk.f32.gmra.mrb[6].mxu0 %vm332_vm2, %v4609_v52  ;;  %v933_v24 = vrot.slane %v4518_v26, 2  ;;  %v4763_v48 = vsel %vm249_vm1, %v296_v40, %v298_v56  ;;  %v4766_v21 = vsel %vm916_vm3, %v928_v14, %v930_v61  ;;  %v306_v40 = vrot.slane %v4754_v39, 1  ;;  %v4780_v56 = vld [vmem:[%s4472_s18 + $0x118] sm:$0x3] }
  0x26   : > { %3715 = vmatprep.mubr.msk.f32.mxu1 %vm332_vm2, %v4587_v46  ;;  %3915 = vmatprep.mubr.msk.f32.mxu0 %vm332_vm2, %v4613_v54  ;;  %5657 = vst [vmem:[#allocation19_spill] sm:$0xff] %v4763_v48  ;;  %5658 = vst [vmem:[#allocation20_spill] sm:$0xff] %v4766_v21  ;;  %v937_v61 = vrot.slane %v4529_v31, 2  ;;  %v4826_v46 = vld [vmem:[%s4472_s18 + $0x138] sm:$0xff]  ;;  %v945_v44 = vrot.slane %v4592_v49, 2  ;;  %v950_v34 = vrot.slane %v4618_v57, 2 }
  0x27   : > { %v4783_v14 = vsel %vm916_vm3, %v932_v20, %v933_v24  ;;  %v315_v38 = vrot.slane %v4826_v46, 1  ;;  %v952_v57 = vrot.slane %v4623_v58, 2 }
  0x28   : > { %5660 = vst [vmem:[#allocation22_spill] sm:$0xff] %v4783_v14 }
  0x29   : > { %3716 = vmatmul.mubr.msk.f32.gmra.mrb[8].mxu1 %vm332_vm2, %v4609_v52  ;;  %3916 = vmatmul.mubr.msk.f32.gmra.mrb[8].mxu0 %vm332_vm2, %v4635_v60  ;;  %v4818_v52 = vld [vmem:[%s4472_s18 + $0x130] sm:$0x3] }
  0x2a   : > { %3718 = vmatprep.mubr.msk.f32.mxu1 %vm332_vm2, %v4613_v54  ;;  %3918 = vmatprep.mubr.msk.f32.mxu0 %vm332_vm2, %v4639_v62 }
  0x2d   : > { %3719 = vmatmul.mubr.msk.f32.gmra.mrb[10].mxu1 %vm332_vm2, %v4635_v60  ;;  %3919 = vmatmul.mubr.msk.f32.gmra.mrb[10].mxu0 %vm332_vm2, %v4661_v8  ;;  %v940_v60 = vrot.slane %v4563_v41, 2  ;;  %v942_v41 = vrot.slane %v4569_v42, 2 }
  0x2e   : > { %3721 = vmatprep.mubr.msk.f32.mxu1 %vm332_vm2, %v4639_v62  ;;  %3921 = vmatprep.mubr.msk.f32.mxu0 %vm332_vm2, %v4665_v12  ;;  %v308_v62 = vrot.slane %v4780_v56, 1 }
  0x31   : > { %3722 = vmatmul.mubr.msk.f32.gmra.mrb[12].mxu1 %vm332_vm2, %v4661_v8  ;;  %3922 = vmatmul.mubr.msk.f32.gmra.mrb[12].mxu0 %vm332_vm2, %v4681_v19  ;;  %v4788_v8 = vld [vmem:[%s4472_s18 + $0x120] sm:$0xff] }
  0x32   : > { %3724 = vmatprep.mubr.msk.f32.mxu1 %vm332_vm2, %v4665_v12  ;;  %3924 = vmatprep.mubr.msk.f32.mxu0 %vm332_vm2, %v4685_v22  ;;  %v938_v12 = vrot.slane %v4532_v32, 2  ;;  %v310_v54 = vrot.slane %v4788_v8, 1 }
  0x35   : > { %3725 = vmatmul.mubr.msk.f32.gmra.mrb[14].mxu1 %vm332_vm2, %v4681_v19  ;;  %3925 = vmatmul.mubr.msk.f32.gmra.mrb[14].mxu0 %vm332_vm2, %v4705_v37  ;;  %v935_v19 = vrot.slane %v4521_v27, 2  ;;  %v5661_v27 = vrot.slane %v4537_v33, 4 }
  0x36   : > { %3727 = vmatprep.mubr.msk.f32.mxu1 %vm332_vm2, %v4685_v22  ;;  %3953 = vmatprep.mubr.msk.f32.mxu0 %vm332_vm2, %v4713_v47  ;;  %v303_v22 = vrot.slane %v4742_v16, 1 }
  0x38   : > { %v4803_v20 = vsel %vm249_vm1, %v301_v13, %v303_v22  ;;  %v4821_v22 = vsel %vm916_vm3, %v937_v61, %v938_v12  ;;  %v313_v61 = vrot.slane %v4818_v52, 1 }
  0x39   : > { %3728 = vmatmul.mubr.msk.f32.gmra.mrb[16].mxu1 %vm332_vm2, %v4705_v37  ;;  %3954 = vmatmul.mubr.msk.f32.vlgmr.msra.gmra.mrb[0].mxu0 %vm332_vm2, %v4734_v63  ;;  %v4774_v37 = vsel %vm249_vm1, %v300_v10, %v301_v13  ;;  %v4791_v10 = vld [vmem:[%s4472_s18 + $0x128] sm:$0xff]  ;;  %5662 = vst [vmem:[#allocation23_spill] sm:$0xff] %v4803_v20  ;;  %5665 = vst [vmem:[#allocation26_spill] sm:$0xff] %v4821_v22  ;;  %v943_v13 = vrot.slane %v4572_v43, 2 }
  0x3a   : > { %3730 = vmatprep.mubr.msk.f32.mxu1 %vm332_vm2, %v4737_v0  ;;  %4002 = vmatpush3.msk.msra.mxu0 %vm397_vm0, %v4537_v33  ;;  %5659 = vst [vmem:[#allocation21_spill] sm:$0xff] %v4774_v37  ;;  %v305_v0 = vrot.slane %v4751_v30, 1 }
  0x3b   : > { %3956 = vmatprep.mubr.msk.f32.mxu0 %vm332_vm2, %v4746_v23  ;;  %4051 = vmatprep.subr.msk.mxu0 %vm397_vm0, %v5661_v27  ;;  %v4810_v27 = vsel %vm916_vm3, %v933_v24, %v935_v19  ;;  %v4829_v19 = vld [vmem:[%s4472_s18 + $0x140] sm:$0xff]  ;;  %v4841_v24 = vsel %vm916_vm3, %v938_v12, %v940_v60  ;;  %v947_v60 = vrot.slane %v4597_v50, 2  ;;  %v948_v12 = vrot.slane %v4600_v51, 2 }
  0x3c   : > { %5663 = vst [vmem:[#allocation24_spill] sm:$0xff] %v4810_v27  ;;  %5667 = vst [vmem:[#allocation28_spill] sm:$0xff] %v4841_v24 }
  0x3d   : > { %3731 = vmatmul.mubr.msk.f32.gmra.mrb[18].mxu1 %vm332_vm2, %v4763_v48  ;;  %3957 = vmatmul.mubr.msk.f32.gmra.mrb[2].mxu0 %vm332_vm2, %v4766_v21  ;;  %v4813_v48 = vsel %vm249_vm1, %v305_v0, %v306_v40  ;;  %v4838_v0 = vsel %vm249_vm1, %v306_v40, %v308_v62  ;;  %v4856_v62 = vsel %vm916_vm3, %v942_v41, %v943_v13  ;;  %v4861_v40 = vld [vmem:[%s4472_s18 + $0x150] sm:$0xff]  ;;  %v318_v41 = vrot.slane %v4853_v36, 1  ;;  %v4923_v21 = vld [vmem:[%s4472_s18 + $0x178] sm:$0x3] }
  0x3e   : > { %3733 = vmatprep.mubr.msk.f32.mxu1 %vm332_vm2, %v4774_v37  ;;  %3959 = vmatprep.mubr.msk.f32.mxu0 %vm332_vm2, %v4783_v14  ;;  %5664 = vst [vmem:[#allocation25_spill] sm:$0xff] %v4813_v48  ;;  %v311_v37 = vrot.slane %v4791_v10, 1  ;;  %5666 = vst [vmem:[#allocation27_spill] sm:$0xff] %v4838_v0 }
  0x3f   : > { %5669 = vst [vmem:[#allocation30_spill] sm:$0xff] %v4856_v62 }
  0x40   : > { %v4873_v49 = vsel %vm249_vm1, %v311_v37, %v313_v61  ;;  %v953_v61 = vrot.slane %v4626_v59, 2 }
  0x41   : > { %3734 = vmatmul.mubr.msk.f32.gmra.mrb[20].mxu1 %vm332_vm2, %v4803_v20  ;;  %3960 = vmatmul.mubr.msk.f32.gmra.mrb[4].mxu0 %vm332_vm2, %v4810_v27  ;;  %v4847_v20 = vsel %vm249_vm1, %v310_v54, %v311_v37  ;;  %v4864_v54 = vld [vmem:[%s4472_s18 + $0x158] sm:$0xff]  ;;  %5670 = vst [vmem:[#allocation31_spill] sm:$0xff] %v4873_v49  ;;  %v4888_v27 = vld [vmem:[%s4472_s18 + $0x160] sm:$0x3]  ;;  %v4891_v37 = vsel %vm916_vm3, %v947_v60, %v948_v12 }
  0x42   : > { %3736 = vmatprep.mubr.msk.f32.mxu1 %vm332_vm2, %v4813_v48  ;;  %3962 = vmatprep.mubr.msk.f32.mxu0 %vm332_vm2, %v4821_v22  ;;  %5668 = vst [vmem:[#allocation29_spill] sm:$0xff] %v4847_v20  ;;  %v316_v48 = vrot.slane %v4829_v19, 1  ;;  %v4880_v22 = vsel %vm916_vm3, %v943_v13, %v945_v44  ;;  %v4899_v44 = vld [vmem:[%s4472_s18 + $0x170] sm:$0xff]  ;;  %v4911_v13 = vsel %vm916_vm3, %v948_v12, %v950_v34  ;;  %v323_v60 = vrot.slane %v4888_v27, 1 }
  0x43   : > { %5671 = vst [vmem:[#allocation32_spill] sm:$0xff] %v4880_v22  ;;  %5673 = vst [vmem:[#allocation34_spill] sm:$0xff] %v4899_v44  ;;  %v957_v34 = vrot.slane %v4649_v3, 2  ;;  %v958_v12 = vrot.slane %v4652_v7, 2 }
  0x44   : > { %5675 = vst [vmem:[#allocation36_spill] sm:$0xff] %v4911_v13 }
  0x45   : > { %3737 = vmatmul.mubr.msk.f32.gmra.mrb[22].mxu1 %vm332_vm2, %v4838_v0  ;;  %3963 = vmatmul.mubr.msk.f32.gmra.mrb[6].mxu0 %vm332_vm2, %v4841_v24  ;;  %v4883_v0 = vsel %vm249_vm1, %v315_v38, %v316_v48  ;;  %v320_v24 = vrot.slane %v4861_v40, 1  ;;  %v4908_v38 = vsel %vm249_vm1, %v316_v48, %v318_v41  ;;  %v4926_v48 = vsel %vm916_vm3, %v952_v57, %v953_v61 }
  0x46   : > { %3739 = vmatprep.mubr.msk.f32.mxu1 %vm332_vm2, %v4847_v20  ;;  %3965 = vmatprep.mubr.msk.f32.mxu0 %vm332_vm2, %v4856_v62  ;;  %5672 = vst [vmem:[#allocation33_spill] sm:$0xff] %v4883_v0  ;;  %v321_v20 = vrot.slane %v4864_v54, 1  ;;  %v4896_v62 = vld [vmem:[%s4472_s18 + $0x168] sm:$0xff]  ;;  %5674 = vst [vmem:[#allocation35_spill] sm:$0xff] %v4908_v38 }
  0x48   : > { %v4917_v14 = vsel %vm249_vm1, %v320_v24, %v321_v20  ;;  %v328_v24 = vrot.slane %v4923_v21, 1 }
  0x49   : > { %3740 = vmatmul.mubr.msk.f32.gmra.mrb[24].mxu1 %vm332_vm2, %v4873_v49  ;;  %3966 = vmatmul.mubr.msk.f32.gmra.mrb[8].mxu0 %vm332_vm2, %v4880_v22  ;;  %5676 = vst [vmem:[#allocation37_spill] sm:$0xff] %v4917_v14  ;;  %v955_v49 = vrot.slane %v4644_v2, 2  ;;  %v325_v22 = vrot.slane %v4896_v62, 1  ;;  %v4937_v2 = vsel %vm249_vm1, %v321_v20, %v323_v60  ;;  %v963_v20 = vrot.slane %v4693_v29, 2 }
  0x4a   : > { %3742 = vmatprep.mubr.msk.f32.mxu1 %vm332_vm2, %v4883_v0  ;;  %3968 = vmatprep.mubr.msk.f32.mxu0 %vm332_vm2, %v4891_v37  ;;  %v326_v0 = vrot.slane %v4899_v44, 1  ;;  %5677 = vst [vmem:[#allocation38_spill] sm:$0xff] %v4937_v2  ;;  %v967_v60 = vrot.slane %v4718_v53, 2 }
  0x4b   : > { %v4943_v41 = vsel %vm916_vm3, %v953_v61, %v955_v49  ;;  %v965_v49 = vrot.slane %v4710_v45, 2 }
  0x4c   : > { %v4946_v57 = vsel %vm249_vm1, %v325_v22, %v326_v0  ;;  %v4961_v22 = vsel %vm249_vm1, %v326_v0, %v328_v24  ;;  %v973_v24 = vrot.slane %v4754_v39, 2  ;;  %v978_v0 = vrot.slane %v4791_v10, 2 }
  0x4d   : > { %3743 = vmatmul.mubr.msk.f32.gmra.mrb[26].mxu1 %vm332_vm2, %v4908_v38  ;;  %3969 = vmatmul.mubr.msk.f32.gmra.mrb[10].mxu0 %vm332_vm2, %v4911_v13  ;;  %5678 = vst [vmem:[#allocation39_spill] sm:$0xff] %v4946_v57  ;;  %v960_v38 = vrot.slane %v4670_v17, 2  ;;  %v4950_v13 = vsel %vm916_vm3, %v957_v34, %v958_v12  ;;  %5679 = vst [vmem:[#allocation40_spill] sm:$0xff] %v4961_v22  ;;  %v968_v34 = vrot.slane %v4721_v55, 2 }
  0x4e   : > { %3745 = vmatprep.mubr.msk.f32.mxu1 %vm332_vm2, %v4917_v14  ;;  %3971 = vmatprep.mubr.msk.f32.mxu0 %vm332_vm2, %v4926_v48  ;;  %v962_v14 = vrot.slane %v4690_v28, 2  ;;  %v4983_v45 = vsel %vm916_vm3, %v963_v20, %v965_v49 }
  0x4f   : > { %v4966_v17 = vsel %vm916_vm3, %v958_v12, %v960_v38  ;;  %v4988_v38 = vsel %vm916_vm3, %v967_v60, %v968_v34  ;;  %v972_v12 = vrot.slane %v4751_v30, 2  ;;  %v977_v60 = vrot.slane %v4788_v8, 2 }
  0x50   : > { %v4970_v61 = vsel %vm916_vm3, %v962_v14, %v963_v20  ;;  %v970_v14 = vrot.slane %v4742_v16, 2  ;;  %v975_v20 = vrot.slane %v4780_v56, 2 }
  0x51   : > { %3746 = vmatmul.mubr.msk.f32.gmra.mrb[28].mxu1 %vm332_vm2, %v4937_v2  ;;  %3972 = vmatmul.mubr.msk.f32.gmra.mrb[12].mxu0 %vm332_vm2, %v4943_v41  ;;  %v5007_v49 = vsel %vm916_vm3, %v972_v12, %v973_v24  ;;  %v983_v12 = vrot.slane %v4829_v19, 2  ;;  %v993_v2 = vrot.slane %v4899_v44, 2 }
  0x52   : > { %3748 = vmatprep.mubr.msk.f32.mxu1 %vm332_vm2, %v4946_v57  ;;  %3974 = vmatprep.mubr.msk.f32.mxu0 %vm332_vm2, %v4950_v13  ;;  %v5003_v16 = vsel %vm916_vm3, %v968_v34, %v970_v14  ;;  %5680 = vst [vmem:[#allocation41_spill] sm:$0xff] %v5007_v49  ;;  %v5023_v56 = vsel %vm916_vm3, %v973_v24, %v975_v20  ;;  %v980_v34 = vrot.slane %v4818_v52, 2  ;;  %v985_v24 = vrot.slane %v4853_v36, 2 }
  0x53   : > { %v5027_v14 = vsel %vm916_vm3, %v977_v60, %v978_v0  ;;  %v987_v60 = vrot.slane %v4861_v40, 2  ;;  %v988_v57 = vrot.slane %v4864_v54, 2 }
  0x54   : > { %v5040_v52 = vsel %vm916_vm3, %v978_v0, %v980_v34  ;;  %v5057_v36 = vsel %vm916_vm3, %v983_v12, %v985_v24  ;;  %v990_v0 = vrot.slane %v4888_v27, 2 }
  0x55   : > { %3749 = vmatmul.mubr.msk.f32.gmra.mrb[30].mxu1 %vm332_vm2, %v4961_v22  ;;  %3975 = vmatmul.mubr.msk.f32.gmra.mrb[14].mxu0 %vm332_vm2, %v4966_v17  ;;  %v5681_v22 = vrot.slane %v4547_v35, 4  ;;  %5682 = vst [vmem:[#allocation42_spill] sm:$0xff] %v5040_v52  ;;  %5684 = vst [vmem:[#allocation44_spill] sm:$0xff] %v5057_v36  ;;  %v5061_v34 = vsel %vm916_vm3, %v987_v60, %v988_v57 }
  0x56   : > { %3753 = vmatprep.mubr.msk.f32.mxu1 %vm332_vm2, %v4475_v4  ;;  %3977 = vmatprep.mubr.msk.f32.mxu0 %vm332_vm2, %v4970_v61  ;;  %5685 = vst [vmem:[#allocation45_spill] sm:$0xff] %v5061_v34  ;;  %v5080_v27 = vsel %vm916_vm3, %v988_v57, %v990_v0 }
  0x57   : > { %5686 = vst [vmem:[#allocation46_spill] sm:$0xff] %v5080_v27 }
  0x59   : > { %3754 = vmatmul.mubr.msk.f32.vlgmr.msra.gmra.mrb[0].mxu1 %vm332_vm2, %v4478_v5  ;;  %3978 = vmatmul.mubr.msk.f32.gmra.mrb[16].mxu0 %vm332_vm2, %v4983_v45 }
  0x5a   : > { %3802 = vmatpush3.msk.msra.mxu1 %vm397_vm0, %v4547_v35  ;;  %3756 = vmatprep.mubr.msk.f32.mxu1 %vm332_vm2, %v4481_v6  ;;  %v5071_v6 = vld [vmem:[%s4472_s18 + $0x188] sm:$0xff] }
  0x5b   : > { %3980 = vmatprep.mubr.msk.f32.mxu0 %vm332_vm2, %v4988_v38  ;;  %3851 = vmatprep.subr.msk.mxu1 %vm397_vm0, %v5681_v22  ;;  %v982_v22 = vrot.slane %v4826_v46, 2 }
  0x5d   : > { %3757 = vmatmul.mubr.msk.f32.gmra.mrb[2].mxu1 %vm332_vm2, %v4486_v9  ;;  %3981 = vmatmul.mubr.msk.f32.gmra.mrb[18].mxu0 %vm332_vm2, %v5003_v16  ;;  %v5044_v20 = vsel %vm916_vm3, %v982_v22, %v983_v12  ;;  %v992_v22 = vrot.slane %v4896_v62, 2  ;;  %v5068_v9 = vld [vmem:[%s4472_s18 + $0x180] sm:$0xff]  ;;  %v995_v12 = vrot.slane %v4923_v21, 2 }
  0x5e   : > { %3759 = vmatprep.mubr.msk.f32.mxu1 %vm332_vm2, %v4498_v15  ;;  %3983 = vmatprep.mubr.msk.f32.mxu0 %vm332_vm2, %v5007_v49  ;;  %5683 = vst [vmem:[#allocation43_spill] sm:$0xff] %v5044_v20  ;;  %v1857_v60 = vrot.slane %v5068_v9, 2 }
  0x5f   : > { %v5084_v24 = vsel %vm916_vm3, %v992_v22, %v993_v2  ;;  %v5100_v21 = vsel %vm916_vm3, %v993_v2, %v995_v12  ;;  %v5691_v22 = vrot.slane %v4537_v33, 4  ;;  %v917_v33 = vrot.slane %v4475_v4, 2 }
  0x60   : > { %5687 = vst [vmem:[#allocation47_spill] sm:$0xff] %v5084_v24  ;;  %5688 = vst [vmem:[#allocation48_spill] sm:$0xff] %v5100_v21  ;;  %v918_v12 = vrot.slane %v4478_v5, 2  ;;  %v5692_v5 = vrot.slane %v4547_v35, 4  ;;  %v5694_v35 = vld [vmem:[#allocation22_spill] sm:$0xff] }
  0x61   : > { %3760 = vmatmul.mubr.msk.f32.gmra.mrb[4].mxu1 %vm332_vm2, %v4503_v18  ;;  %3984 = vmatmul.mubr.msk.f32.gmra.mrb[20].mxu0 %vm332_vm2, %v5023_v56 }
  0x62   : > { %3762 = vmatprep.mubr.msk.f32.mxu1 %vm332_vm2, %v4515_v25  ;;  %3986 = vmatprep.mubr.msk.f32.mxu0 %vm332_vm2, %v5027_v14 }
  0x65   : > { %3763 = vmatmul.mubr.msk.f32.gmra.mrb[6].mxu1 %vm332_vm2, %v4518_v26  ;;  %3987 = vmatmul.mubr.msk.f32.gmra.mrb[22].mxu0 %vm332_vm2, %v5040_v52  ;;  %v5089_v52 = vld [vmem:[%s4472_s18 + $0x190] sm:$0x3] }
  0x66   : > { %3765 = vmatprep.mubr.msk.f32.mxu1 %vm332_vm2, %v4529_v31  ;;  %3989 = vmatprep.mubr.msk.f32.mxu0 %vm332_vm2, %v5044_v20  ;;  %v1858_v20 = vrot.slane %v5071_v6, 2  ;;  %v1860_v57 = vrot.slane %v5089_v52, 2 }
  0x68   : > { %v5104_v0 = vsel %vm916_vm3, %v1857_v60, %v1858_v20  ;;  %v5115_v2 = vsel %vm916_vm3, %v1858_v20, %v1860_v57  ;;  %v5130_v20 = vld [vmem:[%s5565_s1 + $0x20] sm:$0xf]  ;;  %v920_v60 = vrot.slane %v4490_v11, 2  ;;  %v919_v57 = vsel %vm916_vm3, %v917_v33, %v918_v12  ;;  %v5693_v11 = vld [vmem:[#allocation20_spill] sm:$0xff] }
  0x69   : > { %3766 = vmatmul.mubr.msk.f32.gmra.mrb[8].mxu1 %vm332_vm2, %v4532_v32  ;;  %3990 = vmatmul.mubr.msk.f32.gmra.mrb[24].mxu0 %vm332_vm2, %v5057_v36  ;;  %5689 = vst [vmem:[#allocation49_spill] sm:$0xff] %v5104_v0  ;;  %5690 = vst [vmem:[#allocation50_spill] sm:$0xff] %v5115_v2  ;;  %v5698_v33 = vld [vmem:[#allocation30_spill] sm:$0xff] }
  0x6a   : > { %3768 = vmatprep.mubr.msk.f32.mxu1 %vm332_vm2, %v4569_v42  ;;  %3992 = vmatprep.mubr.msk.f32.mxu0 %vm332_vm2, %v5061_v34  ;;  %v921_v4 = vsel %vm916_vm3, %v918_v12, %v920_v60  ;;  %v5699_v12 = vld [vmem:[#allocation32_spill] sm:$0xff]  ;;  %v5256_v60 = vld [vmem:[%s4472_s18 + $0x198] sm:$0xff] }
  0x6d   : > { %3769 = vmatmul.mubr.msk.f32.gmra.mrb[10].mxu1 %vm332_vm2, %v4572_v43  ;;  %3993 = vmatmul.mubr.msk.f32.gmra.mrb[26].mxu0 %vm332_vm2, %v5080_v27 }
  0x6e   : > { %3771 = vmatprep.mubr.msk.f32.mxu1 %vm332_vm2, %v4597_v50  ;;  %3995 = vmatprep.mubr.msk.f32.mxu0 %vm332_vm2, %v5084_v24 }
  0x71   : > { %3772 = vmatmul.mubr.msk.f32.gmra.mrb[12].mxu1 %vm332_vm2, %v4600_v51  ;;  %3996 = vmatmul.mubr.msk.f32.gmra.mrb[28].mxu0 %vm332_vm2, %v5100_v21 }
  0x72   : > { %3774 = vmatprep.mubr.msk.f32.mxu1 %vm332_vm2, %v4623_v58  ;;  %3998 = vmatprep.mubr.msk.f32.mxu0 %vm332_vm2, %v5104_v0  ;;  %v5703_v0 = vld [vmem:[#allocation6_spill] sm:$0xff] }
  0x75   : > { %3775 = vmatmul.mubr.msk.f32.gmra.mrb[14].mxu1 %vm332_vm2, %v4626_v59  ;;  %3999 = vmatmul.mubr.msk.f32.gmra.mrb[30].mxu0 %vm332_vm2, %v5115_v2  ;;  %v5702_v2 = vld [vmem:[#allocation5_spill] sm:$0xff] }
  0x76   : > { %3777 = vmatprep.mubr.msk.f32.mxu1 %vm332_vm2, %v4649_v3  ;;  %4003 = vmatprep.mubr.msk.f32.mxu0 %vm332_vm2, %v4498_v15 }
  0x79   : > { %3778 = vmatmul.mubr.msk.f32.gmra.mrb[16].mxu1 %vm332_vm2, %v4652_v7  ;;  %4004 = vmatmul.mubr.msk.f32.vlgmr.msra.gmra.mrb[0].mxu0 %vm332_vm2, %v4503_v18 }
  0x7a   : > { %3780 = vmatprep.mubr.msk.f32.mxu1 %vm332_vm2, %v4690_v28  ;;  %4052 = vmatpush3.msk.msra.mxu0 %vm397_vm0, %v5691_v22  ;;  %v5697_v22 = vld [vmem:[#allocation28_spill] sm:$0xff] }
  0x7b   : > { %4006 = vmatprep.mubr.msk.f32.mxu0 %vm332_vm2, %v4515_v25  ;;  %4101 = vmatprep.subr.msk.mxu0 %vm397_vm0, %v5130_v20 }
  0x7d   : > { %3781 = vmatmul.mubr.msk.f32.gmra.mrb[18].mxu1 %vm332_vm2, %v4693_v29  ;;  %4007 = vmatmul.mubr.msk.f32.gmra.mrb[2].mxu0 %vm332_vm2, %v4518_v26 }
  0x7e   : > { %3783 = vmatprep.mubr.msk.f32.mxu1 %vm332_vm2, %v4718_v53  ;;  %4009 = vmatprep.mubr.msk.f32.mxu0 %vm332_vm2, %v4529_v31 }
  0x81   : > { %3784 = vmatmul.mubr.msk.f32.gmra.mrb[20].mxu1 %vm332_vm2, %v4721_v55  ;;  %4010 = vmatmul.mubr.msk.f32.gmra.mrb[4].mxu0 %vm332_vm2, %v4532_v32 }
  0x82   : > { %3786 = vmatprep.mubr.msk.f32.mxu1 %vm332_vm2, %v4751_v30  ;;  %4012 = vmatprep.mubr.msk.f32.mxu0 %vm332_vm2, %v4569_v42 }
  0x85   : > { %3787 = vmatmul.mubr.msk.f32.gmra.mrb[22].mxu1 %vm332_vm2, %v4754_v39  ;;  %4013 = vmatmul.mubr.msk.f32.gmra.mrb[6].mxu0 %vm332_vm2, %v4572_v43 }
  0x86   : > { %3789 = vmatprep.mubr.msk.f32.mxu1 %vm332_vm2, %v4788_v8  ;;  %4015 = vmatprep.mubr.msk.f32.mxu0 %vm332_vm2, %v4597_v50 }
  0x89   : > { %3790 = vmatmul.mubr.msk.f32.gmra.mrb[24].mxu1 %vm332_vm2, %v4791_v10  ;;  %4016 = vmatmul.mubr.msk.f32.gmra.mrb[8].mxu0 %vm332_vm2, %v4600_v51 }
  0x8a   : > { %3792 = vmatprep.mubr.msk.f32.mxu1 %vm332_vm2, %v4826_v46  ;;  %4018 = vmatprep.mubr.msk.f32.mxu0 %vm332_vm2, %v4623_v58 }
  0x8d   : > { %3793 = vmatmul.mubr.msk.f32.gmra.mrb[26].mxu1 %vm332_vm2, %v4829_v19  ;;  %4019 = vmatmul.mubr.msk.f32.gmra.mrb[10].mxu0 %vm332_vm2, %v4626_v59 }
  0x8e   : > { %3795 = vmatprep.mubr.msk.f32.mxu1 %vm332_vm2, %v4861_v40  ;;  %4021 = vmatprep.mubr.msk.f32.mxu0 %vm332_vm2, %v4649_v3 }
  0x91   : > { %3796 = vmatmul.mubr.msk.f32.gmra.mrb[28].mxu1 %vm332_vm2, %v4864_v54  ;;  %4022 = vmatmul.mubr.msk.f32.gmra.mrb[12].mxu0 %vm332_vm2, %v4652_v7 }
  0x92   : > { %3798 = vmatprep.mubr.msk.f32.mxu1 %vm332_vm2, %v4896_v62  ;;  %4024 = vmatprep.mubr.msk.f32.mxu0 %vm332_vm2, %v4690_v28 }
  0x95   : > { %3799 = vmatmul.mubr.msk.f32.gmra.mrb[30].mxu1 %vm332_vm2, %v4899_v44  ;;  %4025 = vmatmul.mubr.msk.f32.gmra.mrb[14].mxu0 %vm332_vm2, %v4693_v29 }
  0x96   : > { %3803 = vmatprep.mubr.msk.f32.mxu1 %vm332_vm2, %v919_v57  ;;  %4027 = vmatprep.mubr.msk.f32.mxu0 %vm332_vm2, %v4718_v53  ;;  %v5700_v57 = vld [vmem:[#allocation36_spill] sm:$0xff] }
  0x99   : > { %3804 = vmatmul.mubr.msk.f32.vlgmr.msra.gmra.mrb[0].mxu1 %vm332_vm2, %v921_v4  ;;  %4028 = vmatmul.mubr.msk.f32.gmra.mrb[16].mxu0 %vm332_vm2, %v4721_v55  ;;  %v5267_v4 = vld [vmem:[%s4472_s18 + $0x1a0] sm:$0xff] }
  0x9a   : > { %3852 = vmatpush3.msk.msra.mxu1 %vm397_vm0, %v5692_v5  ;;  %3806 = vmatprep.mubr.msk.f32.mxu1 %vm332_vm2, %v4713_v47  ;;  %v5695_v47 = vld [vmem:[#allocation24_spill] sm:$0xff] }
  0x9b   : > { %4030 = vmatprep.mubr.msk.f32.mxu0 %vm332_vm2, %v4751_v30  ;;  %4151 = vmatprep.subr.msk.mxu1 %vm397_vm0, %v4455_v1  ;;  %v5701_v5 = vld [vmem:[#allocation4_spill] sm:$0xff] }
  0x9d   : > { %3807 = vmatmul.mubr.msk.f32.gmra.mrb[2].mxu1 %vm332_vm2, %v4734_v63  ;;  %4031 = vmatmul.mubr.msk.f32.gmra.mrb[18].mxu0 %vm332_vm2, %v4754_v39  ;;  %v5696_v63 = vld [vmem:[#allocation26_spill] sm:$0xff] }
  0x9e   : > { %3809 = vmatprep.mubr.msk.f32.mxu1 %vm332_vm2, %v4746_v23  ;;  %4033 = vmatprep.mubr.msk.f32.mxu0 %vm332_vm2, %v4788_v8 }
  0xa1   : > { %3810 = vmatmul.mubr.msk.f32.gmra.mrb[4].mxu1 %vm332_vm2, %v5693_v11  ;;  %4034 = vmatmul.mubr.msk.f32.gmra.mrb[20].mxu0 %vm332_vm2, %v4791_v10 }
  0xa2   : > { %3812 = vmatprep.mubr.msk.f32.mxu1 %vm332_vm2, %v5694_v35  ;;  %4036 = vmatprep.mubr.msk.f32.mxu0 %vm332_vm2, %v4826_v46 }
  0xa5   : > { %3813 = vmatmul.mubr.msk.f32.gmra.mrb[6].mxu1 %vm332_vm2, %v5695_v47  ;;  %4037 = vmatmul.mubr.msk.f32.gmra.mrb[22].mxu0 %vm332_vm2, %v4829_v19 }
  0xa6   : > { %3815 = vmatprep.mubr.msk.f32.mxu1 %vm332_vm2, %v5696_v63  ;;  %4039 = vmatprep.mubr.msk.f32.mxu0 %vm332_vm2, %v4861_v40 }
  0xa9   : > { %3816 = vmatmul.mubr.msk.f32.gmra.mrb[8].mxu1 %vm332_vm2, %v5697_v22  ;;  %4040 = vmatmul.mubr.msk.f32.gmra.mrb[24].mxu0 %vm332_vm2, %v4864_v54 }
  0xaa   : > { %3818 = vmatprep.mubr.msk.f32.mxu1 %vm332_vm2, %v5698_v33  ;;  %4042 = vmatprep.mubr.msk.f32.mxu0 %vm332_vm2, %v4896_v62 }
  0xad   : > { %3819 = vmatmul.mubr.msk.f32.gmra.mrb[10].mxu1 %vm332_vm2, %v5699_v12  ;;  %4043 = vmatmul.mubr.msk.f32.gmra.mrb[26].mxu0 %vm332_vm2, %v4899_v44  ;;  %v5704_v44 = vld [vmem:[#allocation7_spill] sm:$0xff] }
  0xae   : > { %3821 = vmatprep.mubr.msk.f32.mxu1 %vm332_vm2, %v4891_v37  ;;  %4045 = vmatprep.mubr.msk.f32.mxu0 %vm332_vm2, %v5068_v9 }
  0xb1   : > { %3822 = vmatmul.mubr.msk.f32.gmra.mrb[12].mxu1 %vm332_vm2, %v5700_v57  ;;  %4046 = vmatmul.mubr.msk.f32.gmra.mrb[28].mxu0 %vm332_vm2, %v5071_v6 }
  0xb2   : > { %3824 = vmatprep.mubr.msk.f32.mxu1 %vm332_vm2, %v4926_v48  ;;  %4048 = vmatprep.mubr.msk.f32.mxu0 %vm332_vm2, %v5256_v60 }
  0xb5   : > { %3825 = vmatmul.mubr.msk.f32.gmra.mrb[14].mxu1 %vm332_vm2, %v4943_v41  ;;  %4049 = vmatmul.mubr.msk.f32.gmra.mrb[30].mxu0 %vm332_vm2, %v5267_v4 }
  0xb6   : > { %3827 = vmatprep.mubr.msk.f32.mxu1 %vm332_vm2, %v4950_v13  ;;  %4053 = vmatprep.mubr.msk.f32.mxu0 %vm332_vm2, %v5701_v5  ;;  %v5705_v5 = vld [vmem:[#allocation8_spill] sm:$0xff] }
  0xb9   : > { %3828 = vmatmul.mubr.msk.f32.gmra.mrb[16].mxu1 %vm332_vm2, %v4966_v17  ;;  %4054 = vmatmul.mubr.msk.f32.vlgmr.msra.gmra.mrb[0].mxu0 %vm332_vm2, %v5702_v2  ;;  %v5706_v2 = vld [vmem:[#allocation9_spill] sm:$0xff] }
  0xba   : > { %3830 = vmatprep.mubr.msk.f32.mxu1 %vm332_vm2, %v4970_v61  ;;  %4102 = vmatpush3.msk.msra.mxu0 %vm397_vm0, %v5130_v20  ;;  %v5709_v20 = vld [vmem:[#allocation12_spill] sm:$0xff] }
  0xbb   : > { %4056 = vmatprep.mubr.msk.f32.mxu0 %vm332_vm2, %v5703_v0  ;;  %v5707_v0 = vld [vmem:[#allocation10_spill] sm:$0xff] }
  0xbd   : > { %3831 = vmatmul.mubr.msk.f32.gmra.mrb[18].mxu1 %vm332_vm2, %v4983_v45  ;;  %4057 = vmatmul.mubr.msk.f32.gmra.mrb[2].mxu0 %vm332_vm2, %v5704_v44  ;;  %v5708_v44 = vld [vmem:[#allocation11_spill] sm:$0xff] }
  0xbe   : > { %3833 = vmatprep.mubr.msk.f32.mxu1 %vm332_vm2, %v4988_v38  ;;  %4059 = vmatprep.mubr.msk.f32.mxu0 %vm332_vm2, %v5705_v5  ;;  %v5710_v5 = vld [vmem:[#allocation42_spill] sm:$0xff] }
  0xc1   : > { %3834 = vmatmul.mubr.msk.f32.gmra.mrb[20].mxu1 %vm332_vm2, %v5003_v16  ;;  %4060 = vmatmul.mubr.msk.f32.gmra.mrb[4].mxu0 %vm332_vm2, %v5706_v2  ;;  %v5711_v2 = vld [vmem:[#allocation13_spill] sm:$0xff] }
  0xc2   : > { %3836 = vmatprep.mubr.msk.f32.mxu1 %vm332_vm2, %v5007_v49  ;;  %4062 = vmatprep.mubr.msk.f32.mxu0 %vm332_vm2, %v5707_v0  ;;  %v5712_v49 = vld [vmem:[#allocation43_spill] sm:$0xff]  ;;  %v5713_v0 = vld [vmem:[#allocation14_spill] sm:$0xff] }
  0xc5   : > { %3837 = vmatmul.mubr.msk.f32.gmra.mrb[22].mxu1 %vm332_vm2, %v5023_v56  ;;  %4063 = vmatmul.mubr.msk.f32.gmra.mrb[6].mxu0 %vm332_vm2, %v5708_v44  ;;  %v5714_v44 = vld [vmem:[#allocation15_spill] sm:$0xff] }
  0xc6   : > { %3839 = vmatprep.mubr.msk.f32.mxu1 %vm332_vm2, %v5027_v14  ;;  %4065 = vmatprep.mubr.msk.f32.mxu0 %vm332_vm2, %v5709_v20  ;;  %v5715_v20 = vld [vmem:[#allocation16_spill] sm:$0xff] }
  0xc9   : > { %3840 = vmatmul.mubr.msk.f32.gmra.mrb[24].mxu1 %vm332_vm2, %v5710_v5  ;;  %4066 = vmatmul.mubr.msk.f32.gmra.mrb[8].mxu0 %vm332_vm2, %v5711_v2  ;;  %v5716_v2 = vld [vmem:[#allocation17_spill] sm:$0xff] }
  0xca   : > { %3842 = vmatprep.mubr.msk.f32.mxu1 %vm332_vm2, %v5712_v49  ;;  %4068 = vmatprep.mubr.msk.f32.mxu0 %vm332_vm2, %v5713_v0  ;;  %v5717_v0 = vld [vmem:[#allocation18_spill] sm:$0xff] }
  0xcd   : > { %3843 = vmatmul.mubr.msk.f32.gmra.mrb[26].mxu1 %vm332_vm2, %v5057_v36  ;;  %4069 = vmatmul.mubr.msk.f32.gmra.mrb[10].mxu0 %vm332_vm2, %v5714_v44  ;;  %v5718_v44 = vld [vmem:[#allocation19_spill] sm:$0xff] }
  0xce   : > { %3845 = vmatprep.mubr.msk.f32.mxu1 %vm332_vm2, %v5061_v34  ;;  %4071 = vmatprep.mubr.msk.f32.mxu0 %vm332_vm2, %v5715_v20  ;;  %v5719_v34 = vld [vmem:[#allocation2_spill] sm:$0xff]  ;;  %v5720_v20 = vld [vmem:[#allocation21_spill] sm:$0xff]  ;;  %v5394_v36 = vld [vmem:[%s4472_s18 + $0x1a8] sm:$0x3] }
  0xd1   : > { %3846 = vmatmul.mubr.msk.f32.gmra.mrb[28].mxu1 %vm332_vm2, %v5080_v27  ;;  %4072 = vmatmul.mubr.msk.f32.gmra.mrb[12].mxu0 %vm332_vm2, %v5716_v2  ;;  %v5721_v27 = vld [vmem:[#allocation3_spill] sm:$0xff] }
  0xd2   : > { %3848 = vmatprep.mubr.msk.f32.mxu1 %vm332_vm2, %v5084_v24  ;;  %4074 = vmatprep.mubr.msk.f32.mxu0 %vm332_vm2, %v5717_v0  ;;  %v5722_v2 = vld [vmem:[#allocation23_spill] sm:$0xff]  ;;  %v5730_v24 = vld [vmem:[#allocation38_spill] sm:$0xff] }
  0xd5   : > { %3849 = vmatmul.mubr.msk.f32.gmra.mrb[30].mxu1 %vm332_vm2, %v5100_v21  ;;  %4075 = vmatmul.mubr.msk.f32.gmra.mrb[14].mxu0 %vm332_vm2, %v5718_v44  ;;  %v5723_v21 = vld [vmem:[#allocation25_spill] sm:$0xff] }
  0xd6   : > { %3853 = vmatprep.mubr.msk.f32.mxu1 %vm332_vm2, %v5719_v34  ;;  %4077 = vmatprep.mubr.msk.f32.mxu0 %vm332_vm2, %v5720_v20  ;;  %v5724_v34 = vld [vmem:[#allocation27_spill] sm:$0xff] }
  0xd9   : > { %3854 = vmatmul.mubr.msk.f32.vlgmr.msra.gmra.mrb[0].mxu1 %vm332_vm2, %v5721_v27  ;;  %4078 = vmatmul.mubr.msk.f32.gmra.mrb[16].mxu0 %vm332_vm2, %v5722_v2  ;;  %v5725_v27 = vld [vmem:[#allocation29_spill] sm:$0xff] }
  0xda   : > { %4152 = vmatpush3.msk.msra.mxu1 %vm397_vm0, %v4455_v1  ;;  %3856 = vmatprep.mubr.msk.f32.mxu1 %vm332_vm2, %v4498_v15  ;;  %v5726_v1 = vld [vmem:[#allocation31_spill] sm:$0xff]  ;;  %v5727_v15 = vld [vmem:[#allocation33_spill] sm:$0xff] }
  0xdb   : > { %4080 = vmatprep.mubr.msk.f32.mxu0 %vm332_vm2, %v5723_v21 }
  0xdd   : > { %3857 = vmatmul.mubr.msk.f32.gmra.mrb[2].mxu1 %vm332_vm2, %v4503_v18  ;;  %4081 = vmatmul.mubr.msk.f32.gmra.mrb[18].mxu0 %vm332_vm2, %v5724_v34  ;;  %v5728_v18 = vld [vmem:[#allocation35_spill] sm:$0xff] }
  0xde   : > { %3859 = vmatprep.mubr.msk.f32.mxu1 %vm332_vm2, %v4515_v25  ;;  %4083 = vmatprep.mubr.msk.f32.mxu0 %vm332_vm2, %v5725_v27  ;;  %v5729_v25 = vld [vmem:[#allocation37_spill] sm:$0xff] }
  0xe1   : > { %3860 = vmatmul.mubr.msk.f32.gmra.mrb[4].mxu1 %vm332_vm2, %v4518_v26  ;;  %4084 = vmatmul.mubr.msk.f32.gmra.mrb[20].mxu0 %vm332_vm2, %v5726_v1  ;;  %v1588_v26 = vrot.slane %v5068_v9, 1 }
  0xe2   : > { %3862 = vmatprep.mubr.msk.f32.mxu1 %vm332_vm2, %v4529_v31  ;;  %4086 = vmatprep.mubr.msk.f32.mxu0 %vm332_vm2, %v5727_v15  ;;  %v1589_v31 = vrot.slane %v5071_v6, 1 }
  0xe4   : > { %v5391_v15 = vsel %vm249_vm1, %v1588_v26, %v1589_v31 }
  0xe5   : > { %3863 = vmatmul.mubr.msk.f32.gmra.mrb[6].mxu1 %vm332_vm2, %v4532_v32  ;;  %4087 = vmatmul.mubr.msk.f32.gmra.mrb[22].mxu0 %vm332_vm2, %v5728_v18  ;;  %v5731_v32 = vld [vmem:[#allocation39_spill] sm:$0xff]  ;;  %v2394_v18 = vrot.slane %v5267_v4, 1 }
  0xe6   : > { %3865 = vmatprep.mubr.msk.f32.mxu1 %vm332_vm2, %v4569_v42  ;;  %4089 = vmatprep.mubr.msk.f32.mxu0 %vm332_vm2, %v5729_v25  ;;  %v1591_v42 = vrot.slane %v5089_v52, 1  ;;  %v2393_v25 = vrot.slane %v5256_v60, 1  ;;  %v2396_v52 = vrot.slane %v5394_v36, 1 }
  0xe8   : > { %v2395_v26 = vsel %vm249_vm1, %v2393_v25, %v2394_v18 }
  0xe9   : > { %3866 = vmatmul.mubr.msk.f32.gmra.mrb[8].mxu1 %vm332_vm2, %v4572_v43  ;;  %4090 = vmatmul.mubr.msk.f32.gmra.mrb[24].mxu0 %vm332_vm2, %v5730_v24  ;;  %v5732_v43 = vld [vmem:[#allocation40_spill] sm:$0xff] }
  0xea   : > { %3868 = vmatprep.mubr.msk.f32.mxu1 %vm332_vm2, %v4597_v50  ;;  %4092 = vmatprep.mubr.msk.f32.mxu0 %vm332_vm2, %v5731_v32  ;;  %v5405_v50 = vsel %vm249_vm1, %v1589_v31, %v1591_v42 }
  0xed   : > { %3869 = vmatmul.mubr.msk.f32.gmra.mrb[10].mxu1 %vm332_vm2, %v4600_v51  ;;  %4093 = vmatmul.mubr.msk.f32.gmra.mrb[26].mxu0 %vm332_vm2, %v5732_v43  ;;  %v2397_v51 = vsel %vm249_vm1, %v2394_v18, %v2396_v52 }
  0xee   : > { %3871 = vmatprep.mubr.msk.f32.mxu1 %vm332_vm2, %v4623_v58  ;;  %4095 = vmatprep.mubr.msk.f32.mxu0 %vm332_vm2, %v5391_v15  ;;  %v5736_v58 = vld [vmem:[#allocation33_spill] sm:$0xff] }
  0xf1   : > { %3872 = vmatmul.mubr.msk.f32.gmra.mrb[12].mxu1 %vm332_vm2, %v4626_v59  ;;  %4096 = vmatmul.mubr.msk.f32.gmra.mrb[28].mxu0 %vm332_vm2, %v5405_v50  ;;  %v5737_v59 = vld [vmem:[#allocation45_spill] sm:$0xff] }
  0xf2   : > { %3874 = vmatprep.mubr.msk.f32.mxu1 %vm332_vm2, %v4649_v3  ;;  %4098 = vmatprep.mubr.msk.f32.mxu0 %vm332_vm2, %v2395_v26  ;;  %v5738_v3 = vld [vmem:[#allocation35_spill] sm:$0xff] }
  0xf5   : > { %3875 = vmatmul.mubr.msk.f32.gmra.mrb[14].mxu1 %vm332_vm2, %v4652_v7  ;;  %4099 = vmatmul.mubr.msk.f32.gmra.mrb[30].mxu0 %vm332_vm2, %v2397_v51  ;;  %v5739_v7 = vld [vmem:[#allocation46_spill] sm:$0xff] }
  0xf6   : > { %3877 = vmatprep.mubr.msk.f32.mxu1 %vm332_vm2, %v4690_v28  ;;  %4103 = vmatprep.mubr.msk.f32.mxu0 %vm332_vm2, %v4746_v23  ;;  %v5741_v28 = vld [vmem:[#allocation47_spill] sm:$0xff]  ;;  %v5743_v23 = vld [vmem:[#allocation49_spill] sm:$0xff] }
  0xf9   : > { %3878 = vmatmul.mubr.msk.f32.gmra.mrb[16].mxu1 %vm332_vm2, %v4693_v29  ;;  %4104 = vmatmul.mubr.msk.f32.vlgmr.msra.gmra.mrb[0].mxu0 %vm332_vm2, %v5693_v11  ;;  %v2662_v29 = vrot.slane %v5256_v60, 2 }
  0xfa   : > { %3880 = vmatprep.mubr.msk.f32.mxu1 %vm332_vm2, %v4718_v53  ;;  %4106 = vmatprep.mubr.msk.f32.mxu0 %vm332_vm2, %v5694_v35  ;;  %v2663_v53 = vrot.slane %v5267_v4, 2 }
  0xfd   : > { %3881 = vmatmul.mubr.msk.f32.gmra.mrb[18].mxu1 %vm332_vm2, %v4721_v55  ;;  %4107 = vmatmul.mubr.msk.f32.gmra.mrb[2].mxu0 %vm332_vm2, %v5695_v47  ;;  %v5742_v55 = vld [vmem:[#allocation48_spill] sm:$0xff] }
  0xfe   : > { %3883 = vmatprep.mubr.msk.f32.mxu1 %vm332_vm2, %v4751_v30  ;;  %4109 = vmatprep.mubr.msk.f32.mxu0 %vm332_vm2, %v5696_v63  ;;  %v2665_v30 = vrot.slane %v5394_v36, 2 }
 0x101   : > { %3884 = vmatmul.mubr.msk.f32.gmra.mrb[20].mxu1 %vm332_vm2, %v4754_v39  ;;  %4110 = vmatmul.mubr.msk.f32.gmra.mrb[4].mxu0 %vm332_vm2, %v5697_v22  ;;  %v2664_v39 = vsel %vm916_vm3, %v2662_v29, %v2663_v53 }
 0x102   : > { %3886 = vmatprep.mubr.msk.f32.mxu1 %vm332_vm2, %v4788_v8  ;;  %4112 = vmatprep.mubr.msk.f32.mxu0 %vm332_vm2, %v5698_v33  ;;  %v5740_v8 = vld [vmem:[#allocation37_spill] sm:$0xff] }
 0x105   : > { %3887 = vmatmul.mubr.msk.f32.gmra.mrb[22].mxu1 %vm332_vm2, %v4791_v10  ;;  %4113 = vmatmul.mubr.msk.f32.gmra.mrb[6].mxu0 %vm332_vm2, %v5699_v12  ;;  %v5744_v10 = vld [vmem:[#allocation50_spill] sm:$0xff] }
 0x106   : > { %3889 = vmatprep.mubr.msk.f32.mxu1 %vm332_vm2, %v4826_v46  ;;  %4115 = vmatprep.mubr.msk.f32.mxu0 %vm332_vm2, %v4891_v37  ;;  %v5733_v46 = vld [vmem:[#allocation34_spill] sm:$0xff] }
 0x109   : > { %3890 = vmatmul.mubr.msk.f32.gmra.mrb[24].mxu1 %vm332_vm2, %v4829_v19  ;;  %4116 = vmatmul.mubr.msk.f32.gmra.mrb[8].mxu0 %vm332_vm2, %v5700_v57  ;;  %v2666_v19 = vsel %vm916_vm3, %v2663_v53, %v2665_v30 }
 0x10a   : > { %3892 = vmatprep.mubr.msk.f32.mxu1 %vm332_vm2, %v4861_v40  ;;  %4118 = vmatprep.mubr.msk.f32.mxu0 %vm332_vm2, %v4926_v48 }
 0x10d   : > { %3893 = vmatmul.mubr.msk.f32.gmra.mrb[26].mxu1 %vm332_vm2, %v4864_v54  ;;  %4119 = vmatmul.mubr.msk.f32.gmra.mrb[10].mxu0 %vm332_vm2, %v4943_v41 }
 0x10e   : > { %3895 = vmatprep.mubr.msk.f32.mxu1 %vm332_vm2, %v4896_v62  ;;  %4121 = vmatprep.mubr.msk.f32.mxu0 %vm332_vm2, %v4950_v13 }
 0x111   : > { %3896 = vmatmul.mubr.msk.f32.gmra.mrb[28].mxu1 %vm332_vm2, %v5733_v46  ;;  %4122 = vmatmul.mubr.msk.f32.gmra.mrb[12].mxu0 %vm332_vm2, %v4966_v17 }
 0x112   : > { %3898 = vmatprep.mubr.msk.f32.mxu1 %vm332_vm2, %v5068_v9  ;;  %4124 = vmatprep.mubr.msk.f32.mxu0 %vm332_vm2, %v4970_v61  ;;  %v5734_v9 = vld [vmem:[#allocation41_spill] sm:$0xff] }
 0x115   : > { %3899 = vmatmul.mubr.msk.f32.gmra.mrb[30].mxu1 %vm332_vm2, %v5071_v6  ;;  %4125 = vmatmul.mubr.msk.f32.gmra.mrb[14].mxu0 %vm332_vm2, %v4983_v45  ;;  %v5735_v6 = vld [vmem:[#allocation44_spill] sm:$0xff] }
 0x116   : > { %3927 = vmatprep.mubr.msk.f32.mxu1 %vm332_vm2, %v5717_v0  ;;  %4127 = vmatprep.mubr.msk.f32.mxu0 %vm332_vm2, %v4988_v38 }
 0x119   : > { %3928 = vmatmul.mubr.msk.f32.vlgmr.msra.gmra.mrb[16].mxu1 %vm332_vm2, %v5718_v44  ;;  %4128 = vmatmul.mubr.msk.f32.gmra.mrb[16].mxu0 %vm332_vm2, %v5003_v16 }
 0x11a   : > { %3930 = vmatprep.mubr.msk.f32.mxu1 %vm332_vm2, %v5720_v20  ;;  %4130 = vmatprep.mubr.msk.f32.mxu0 %vm332_vm2, %v5734_v9 }
 0x11d   : > { %3931 = vmatmul.mubr.msk.f32.gmra.mrb[18].mxu1 %vm332_vm2, %v5722_v2  ;;  %4131 = vmatmul.mubr.msk.f32.gmra.mrb[18].mxu0 %vm332_vm2, %v5023_v56 }
 0x11e   : > { %3933 = vmatprep.mubr.msk.f32.mxu1 %vm332_vm2, %v5723_v21  ;;  %4133 = vmatprep.mubr.msk.f32.mxu0 %vm332_vm2, %v5027_v14 }
 0x121   : > { %3934 = vmatmul.mubr.msk.f32.gmra.mrb[20].mxu1 %vm332_vm2, %v5724_v34  ;;  %4134 = vmatmul.mubr.msk.f32.gmra.mrb[20].mxu0 %vm332_vm2, %v5710_v5 }
 0x122   : > { %3936 = vmatprep.mubr.msk.f32.mxu1 %vm332_vm2, %v5725_v27  ;;  %4136 = vmatprep.mubr.msk.f32.mxu0 %vm332_vm2, %v5712_v49 }
 0x125   : > { %3937 = vmatmul.mubr.msk.f32.gmra.mrb[22].mxu1 %vm332_vm2, %v5726_v1  ;;  %4137 = vmatmul.mubr.msk.f32.gmra.mrb[22].mxu0 %vm332_vm2, %v5735_v6 }
 0x126   : > { %3939 = vmatprep.mubr.msk.f32.mxu1 %vm332_vm2, %v5736_v58  ;;  %4139 = vmatprep.mubr.msk.f32.mxu0 %vm332_vm2, %v5737_v59 }
 0x129   : > { %3940 = vmatmul.mubr.msk.f32.gmra.mrb[24].mxu1 %vm332_vm2, %v5738_v3  ;;  %4140 = vmatmul.mubr.msk.f32.gmra.mrb[24].mxu0 %vm332_vm2, %v5739_v7 }
 0x12a   : > { %3942 = vmatprep.mubr.msk.f32.mxu1 %vm332_vm2, %v5740_v8  ;;  %4142 = vmatprep.mubr.msk.f32.mxu0 %vm332_vm2, %v5741_v28 }
 0x12d   : > { %3943 = vmatmul.mubr.msk.f32.gmra.mrb[26].mxu1 %vm332_vm2, %v5730_v24  ;;  %4143 = vmatmul.mubr.msk.f32.gmra.mrb[26].mxu0 %vm332_vm2, %v5742_v55 }
 0x12e   : > { %3945 = vmatprep.mubr.msk.f32.mxu1 %vm332_vm2, %v5731_v32  ;;  %4145 = vmatprep.mubr.msk.f32.mxu0 %vm332_vm2, %v5743_v23 }
 0x131   : > { %3946 = vmatmul.mubr.msk.f32.gmra.mrb[28].mxu1 %vm332_vm2, %v5732_v43  ;;  %4146 = vmatmul.mubr.msk.f32.gmra.mrb[28].mxu0 %vm332_vm2, %v5744_v10 }
 0x132   : > { %3948 = vmatprep.mubr.msk.f32.mxu1 %vm332_vm2, %v5391_v15  ;;  %4148 = vmatprep.mubr.msk.f32.mxu0 %vm332_vm2, %v2664_v39 }
 0x135   : > { %3949 = vmatmul.mubr.msk.f32.gmra.mrb[30].mxu1 %vm332_vm2, %v5405_v50  ;;  %4149 = vmatmul.mubr.msk.f32.gmra.mrb[30].mxu0 %vm332_vm2, %v2666_v19 }
 0x1ac   : > { %v3855_v62 = vpop.f32.mrb[0].mxu1 }
 0x1ad   : > { %v1396_v40 = vpop.f32.mrb[1].mxu1 }
 0x1b0   : > { %v3858_v54 = vpop.f32.mrb[2].mxu1 }
 0x1b1   : > { %v1406_v37 = vpop.f32.mrb[3].mxu1 }
 0x1b4   : > { %v3861_v13 = vpop.f32.mrb[4].mxu1 }
 0x1b5   : > { %v1416_v48 = vpop.f32.mrb[5].mxu1 }
 0x1b8   : > { %v3864_v41 = vpop.f32.mrb[6].mxu1 }
 0x1b9   : > { %v1426_v17 = vpop.f32.mrb[7].mxu1 }
 0x1bc   : > { %v3867_v61 = vpop.f32.mrb[8].mxu1 }
 0x1bd   : > { %v1436_v45 = vpop.f32.mrb[9].mxu1 }
 0x1c0   : > { %v3870_v38 = vpop.f32.mrb[10].mxu1 }
 0x1c1   : > { %v1446_v16 = vpop.f32.mrb[11].mxu1 }
 0x1c4   : > { %v3873_v49 = vpop.f32.mrb[12].mxu1 }
 0x1c5   : > { %v1456_v56 = vpop.f32.mrb[13].mxu1 }
 0x1c8   : > { %v5551_v14 = vpop.f32.mrb[14].mxu1 }
 0x1c9   : > { %v5553_v36 = vpop.f32.mrb[15].mxu1 }
 0x1cc   : > { %v4105_v24 = vpop.f32.mrb[0].mxu0 }
 0x1cd   : > { %v4153_v21 = vadd.f32 %v4105_v24, %v3855_v62  ;;  %v2740_v11 = vpop.f32.mrb[1].mxu0 }
 0x1ce   : > { %v4154_v35 = vadd.f32 %v2740_v11, %v1396_v40 }
 0x1cf   : > { %v2969_v47 = vmul.f32 %v4153_v21, %v4153_v21 }
 0x1d0   : > { %v2931_v63 = vadd.f32 %v4154_v35, %v4153_v21  ;;  %v2968_v22 = vmul.f32 %v4154_v35, %v4154_v35  ;;  %v4108_v33 = vpop.f32.mrb[2].mxu0 }
 0x1d1   : > { %v4155_v12 = vadd.f32 %v4108_v33, %v3858_v54  ;;  %v2750_v60 = vpop.f32.mrb[3].mxu0 }
 0x1d2   : > { %v3000_v57 = vadd.f32 %v2969_v47, %v2968_v22  ;;  %v4156_v4 = vadd.f32 %v2750_v60, %v1406_v37 }
 0x1d3   : > { %v2971_v34 = vmul.f32 %v4155_v12, %v4155_v12 }
 0x1d4   : > { %v2932_v5 = vadd.f32 %v4156_v4, %v2931_v63  ;;  %v2970_v0 = vmul.f32 %v4156_v4, %v4156_v4  ;;  %v4111_v44 = vpop.f32.mrb[4].mxu0 }
 0x1d5   : > { %v4157_v20 = vadd.f32 %v4111_v44, %v3861_v13  ;;  %v2760_v2 = vpop.f32.mrb[5].mxu0 }
 0x1d6   : > { %v3001_v27 = vadd.f32 %v3000_v57, %v2970_v0  ;;  %v4158_v1 = vadd.f32 %v2760_v2, %v1416_v48  ;;  %v2933_v15 = vadd.f32 %v4155_v12, %v2932_v5 }
 0x1d7   : > { %v2973_v50 = vmul.f32 %v4157_v20, %v4157_v20 }
 0x1d8   : > { %v2934_v18 = vadd.f32 %v4158_v1, %v2933_v15  ;;  %v2972_v25 = vmul.f32 %v4158_v1, %v4158_v1  ;;  %v3002_v31 = vadd.f32 %v3001_v27, %v2971_v34  ;;  %v4114_v32 = vpop.f32.mrb[6].mxu0 }
 0x1d9   : > { %v4159_v42 = vadd.f32 %v4114_v32, %v3864_v41  ;;  %v2770_v43 = vpop.f32.mrb[7].mxu0 }
 0x1da   : > { %v3003_v52 = vadd.f32 %v3002_v31, %v2972_v25  ;;  %v4160_v26 = vadd.f32 %v2770_v43, %v1426_v17  ;;  %v2935_v51 = vadd.f32 %v4157_v20, %v2934_v18 }
 0x1db   : > { %v2975_v7 = vmul.f32 %v4159_v42, %v4159_v42 }
 0x1dc   : > { %v2936_v46 = vadd.f32 %v4160_v26, %v2935_v51  ;;  %v2974_v9 = vmul.f32 %v4160_v26, %v4160_v26  ;;  %v3004_v6 = vadd.f32 %v3003_v52, %v2973_v50  ;;  %v4117_v58 = vpop.f32.mrb[8].mxu0 }
 0x1dd   : > { %v4161_v59 = vadd.f32 %v4117_v58, %v3867_v61  ;;  %v2780_v3 = vpop.f32.mrb[9].mxu0 }
 0x1de   : > { %v3005_v8 = vadd.f32 %v3004_v6, %v2974_v9  ;;  %v4162_v28 = vadd.f32 %v2780_v3, %v1436_v45  ;;  %v2937_v29 = vadd.f32 %v4159_v42, %v2936_v46 }
 0x1df   : > { %v2977_v19 = vmul.f32 %v4161_v59, %v4161_v59 }
 0x1e0   : > { %v2938_v53 = vadd.f32 %v4162_v28, %v2937_v29  ;;  %v2976_v55 = vmul.f32 %v4162_v28, %v4162_v28  ;;  %v3006_v23 = vadd.f32 %v3005_v8, %v2975_v7  ;;  %v4120_v30 = vpop.f32.mrb[10].mxu0 }
 0x1e1   : > { %v4163_v39 = vadd.f32 %v4120_v30, %v3870_v38  ;;  %v2790_v10 = vpop.f32.mrb[11].mxu0 }
 0x1e2   : > { %v3007_v62 = vadd.f32 %v3006_v23, %v2976_v55  ;;  %v4164_v40 = vadd.f32 %v2790_v10, %v1446_v16  ;;  %v2939_v54 = vadd.f32 %v4161_v59, %v2938_v53 }
 0x1e3   : > { %v2979_v24 = vmul.f32 %v4163_v39, %v4163_v39 }
 0x1e4   : > { %v2940_v37 = vadd.f32 %v4164_v40, %v2939_v54  ;;  %v2978_v13 = vmul.f32 %v4164_v40, %v4164_v40  ;;  %v3008_v48 = vadd.f32 %v3007_v62, %v2977_v19  ;;  %v4123_v41 = vpop.f32.mrb[12].mxu0 }
 0x1e5   : > { %v4165_v17 = vadd.f32 %v4123_v41, %v3873_v49  ;;  %v2800_v61 = vpop.f32.mrb[13].mxu0 }
 0x1e6   : > { %v3009_v21 = vadd.f32 %v3008_v48, %v2978_v13  ;;  %v4166_v45 = vadd.f32 %v2800_v61, %v1456_v56  ;;  %v2941_v11 = vadd.f32 %v4163_v39, %v2940_v37 }
 0x1e7   : > { %v2981_v12 = vmul.f32 %v4165_v17, %v4165_v17 }
 0x1e8   : > { %v2942_v35 = vadd.f32 %v4166_v45, %v2941_v11  ;;  %v2980_v47 = vmul.f32 %v4166_v45, %v4166_v45  ;;  %v3010_v63 = vadd.f32 %v3009_v21, %v2979_v24  ;;  %v4126_v22 = vpop.f32.mrb[14].mxu0 }
 0x1e9   : > { %v4167_v38 = vadd.f32 %v4126_v22, %v5551_v14  ;;  %v2810_v33 = vpop.f32.mrb[15].mxu0 }
 0x1ea   : > { %v3011_v16 = vadd.f32 %v3010_v63, %v2980_v47  ;;  %v4168_v60 = vadd.f32 %v2810_v33, %v5553_v36  ;;  %v2943_v57 = vadd.f32 %v4165_v17, %v2942_v35 }
 0x1eb   : > { %v2983_v34 = vmul.f32 %v4167_v38, %v4167_v38 }
 0x1ec   : > { %v3929_v4 = vpop.f32.mrb[16].mxu1  ;;  %v2944_v5 = vadd.f32 %v4168_v60, %v2943_v57  ;;  %v2982_v49 = vmul.f32 %v4168_v60, %v4168_v60  ;;  %v3012_v0 = vadd.f32 %v3011_v16, %v2981_v12  ;;  %v4129_v44 = vpop.f32.mrb[16].mxu0 }
 0x1ed   : > { %v1746_v20 = vpop.f32.mrb[17].mxu1  ;;  %v4169_v56 = vadd.f32 %v4129_v44, %v3929_v4  ;;  %v2820_v2 = vpop.f32.mrb[17].mxu0 }
 0x1ee   : > { %v3013_v27 = vadd.f32 %v3012_v0, %v2982_v49  ;;  %v4170_v1 = vadd.f32 %v2820_v2, %v1746_v20  ;;  %v2945_v15 = vadd.f32 %v4167_v38, %v2944_v5 }
 0x1ef   : > { %v2985_v50 = vmul.f32 %v4169_v56, %v4169_v56 }
 0x1f0   : > { %v3932_v18 = vpop.f32.mrb[18].mxu1  ;;  %v2946_v14 = vadd.f32 %v4170_v1, %v2945_v15  ;;  %v2984_v25 = vmul.f32 %v4170_v1, %v4170_v1  ;;  %v3014_v31 = vadd.f32 %v3013_v27, %v2983_v34  ;;  %v4132_v32 = vpop.f32.mrb[18].mxu0 }
 0x1f1   : > { %v1756_v42 = vpop.f32.mrb[19].mxu1  ;;  %v4171_v36 = vadd.f32 %v4132_v32, %v3932_v18  ;;  %v2830_v43 = vpop.f32.mrb[19].mxu0 }
 0x1f2   : > { %v3015_v52 = vadd.f32 %v3014_v31, %v2984_v25  ;;  %v4172_v26 = vadd.f32 %v2830_v43, %v1756_v42  ;;  %v2947_v51 = vadd.f32 %v4169_v56, %v2946_v14 }
 0x1f3   : > { %v2987_v28 = vmul.f32 %v4171_v36, %v4171_v36 }
 0x1f4   : > { %v3935_v46 = vpop.f32.mrb[20].mxu1  ;;  %v2948_v9 = vadd.f32 %v4172_v26, %v2947_v51  ;;  %v2986_v6 = vmul.f32 %v4172_v26, %v4172_v26  ;;  %v3016_v58 = vadd.f32 %v3015_v52, %v2985_v50  ;;  %v4135_v59 = vpop.f32.mrb[20].mxu0 }
 0x1f5   : > { %v1766_v3 = vpop.f32.mrb[21].mxu1  ;;  %v4173_v7 = vadd.f32 %v4135_v59, %v3935_v46  ;;  %v2840_v8 = vpop.f32.mrb[21].mxu0 }
 0x1f6   : > { %v3017_v29 = vadd.f32 %v3016_v58, %v2986_v6  ;;  %v4174_v53 = vadd.f32 %v2840_v8, %v1766_v3  ;;  %v2949_v55 = vadd.f32 %v4171_v36, %v2948_v9 }
 0x1f7   : > { %v2989_v37 = vmul.f32 %v4173_v7, %v4173_v7 }
 0x1f8   : > { %v3938_v23 = vpop.f32.mrb[22].mxu1  ;;  %v2950_v30 = vadd.f32 %v4174_v53, %v2949_v55  ;;  %v2988_v39 = vmul.f32 %v4174_v53, %v4174_v53  ;;  %v3018_v10 = vadd.f32 %v3017_v29, %v2987_v28  ;;  %v4138_v19 = vpop.f32.mrb[22].mxu0 }
 0x1f9   : > { %v1776_v62 = vpop.f32.mrb[23].mxu1  ;;  %v4175_v40 = vadd.f32 %v4138_v19, %v3938_v23  ;;  %v2850_v54 = vpop.f32.mrb[23].mxu0 }
 0x1fa   : > { %v3019_v13 = vadd.f32 %v3018_v10, %v2988_v39  ;;  %v4176_v48 = vadd.f32 %v2850_v54, %v1776_v62  ;;  %v2951_v41 = vadd.f32 %v4173_v7, %v2950_v30 }
 0x1fb   : > { %v2991_v63 = vmul.f32 %v4175_v40, %v4175_v40 }
 0x1fc   : > { %v3941_v17 = vpop.f32.mrb[24].mxu1  ;;  %v2952_v61 = vadd.f32 %v4176_v48, %v2951_v41  ;;  %v2990_v24 = vmul.f32 %v4176_v48, %v4176_v48  ;;  %v3020_v21 = vadd.f32 %v3019_v13, %v2989_v37  ;;  %v4141_v45 = vpop.f32.mrb[24].mxu0 }
 0x1fd   : > { %v1786_v11 = vpop.f32.mrb[25].mxu1  ;;  %v4177_v35 = vadd.f32 %v4141_v45, %v3941_v17  ;;  %v2860_v47 = vpop.f32.mrb[25].mxu0 }
 0x1fe   : > { %v3021_v22 = vadd.f32 %v3020_v21, %v2990_v24  ;;  %v4178_v38 = vadd.f32 %v2860_v47, %v1786_v11  ;;  %v2953_v33 = vadd.f32 %v4175_v40, %v2952_v61  ;;  %v3037_v40 = vlaneseq }
 0x1ff   : > { %v2993_v44 = vmul.f32 %v4177_v35, %v4177_v35 }
 0x200   : > { %v3944_v12 = vpop.f32.mrb[26].mxu1  ;;  %v2954_v16 = vadd.f32 %v4178_v38, %v2953_v33  ;;  %v2992_v60 = vmul.f32 %v4178_v38, %v4178_v38  ;;  %v3022_v57 = vadd.f32 %v3021_v22, %v2991_v63  ;;  %v4144_v4 = vpop.f32.mrb[26].mxu0  ;;  %v3038_v41 = vshrl.u32 %v3037_v40, 7 }
 0x201   : > { %v1796_v5 = vpop.f32.mrb[27].mxu1  ;;  %v4179_v49 = vadd.f32 %v4144_v4, %v3944_v12  ;;  %v2870_v0 = vpop.f32.mrb[27].mxu0 }
 0x202   : > { %v3023_v20 = vadd.f32 %v3022_v57, %v2992_v60  ;;  %v4180_v56 = vadd.f32 %v2870_v0, %v1796_v5  ;;  %v2955_v2 = vadd.f32 %v4177_v35, %v2954_v16  ;;  %vm3039_vm4 = vcmp.eq.s32.totalorder %v3038_v41, 0 }
 0x203   : > { %v2995_v32 = vmul.f32 %v4179_v49, %v4179_v49  ;;  %vm3041_vm5 = vcmp.eq.s32.totalorder %v3038_v41, 1 }
 0x204   : > { %v3947_v34 = vpop.f32.mrb[28].mxu1  ;;  %v2956_v27 = vadd.f32 %v4180_v56, %v2955_v2  ;;  %v2994_v1 = vmul.f32 %v4180_v56, %v4180_v56  ;;  %v3024_v15 = vadd.f32 %v3023_v20, %v2993_v44  ;;  %v4147_v18 = vpop.f32.mrb[28].mxu0 }
 0x205   : > { %v1806_v14 = vpop.f32.mrb[29].mxu1  ;;  %v4181_v25 = vadd.f32 %v4147_v18, %v3947_v34  ;;  %v2880_v31 = vpop.f32.mrb[29].mxu0 }
 0x206   : > { %v3025_v42 = vadd.f32 %v3024_v15, %v2994_v1  ;;  %v4182_v36 = vadd.f32 %v2880_v31, %v1806_v14  ;;  %v2957_v43 = vadd.f32 %v4179_v49, %v2956_v27 }
 0x207   : > { %v2997_v59 = vmul.f32 %v4181_v25, %v4181_v25 }
 0x208   : > { %v3950_v50 = vpop.f32.mrb[30].mxu1  ;;  %v2958_v52 = vadd.f32 %v4182_v36, %v2957_v43  ;;  %v2996_v26 = vmul.f32 %v4182_v36, %v4182_v36  ;;  %v3026_v51 = vadd.f32 %v3025_v42, %v2995_v32  ;;  %v4150_v46 = vpop.f32.mrb[30].mxu0 }
 0x209   : > { %v1816_v9 = vpop.f32.mrb[31].mxu1  ;;  %v4183_v6 = vadd.f32 %v4150_v46, %v3950_v50  ;;  %v2890_v58 = vpop.f32.mrb[31].mxu0 }
 0x20a   : > { %v3027_v3 = vadd.f32 %v3026_v51, %v2996_v26  ;;  %v4184_v7 = vadd.f32 %v2890_v58, %v1816_v9  ;;  %v2959_v8 = vadd.f32 %v4181_v25, %v2958_v52 }
 0x20b   : > { %v2999_v55 = vmul.f32 %v4183_v6, %v4183_v6 }
 0x20c   : > { %v2960_v28 = vadd.f32 %v4184_v7, %v2959_v8  ;;  %v2998_v29 = vmul.f32 %v4184_v7, %v4184_v7  ;;  %v3028_v53 = vadd.f32 %v3027_v3, %v2997_v59 }
 0x20e   : > { %v2961_v23 = vadd.f32 %v4183_v6, %v2960_v28  ;;  %v3029_v30 = vadd.f32 %v3028_v53, %v2998_v29 }
 0x210   : > { %v2962_v39 = vrot.slane %v2961_v23, 4  ;;  %v3030_v10 = vadd.f32 %v3029_v30, %v2999_v55 }
 0x212   : > { %v2963_v19 = vadd.f32 %v2962_v39, %v2961_v23  ;;  %v3031_v62 = vrot.slane %v3030_v10, 4 }
 0x214   : > { %v2964_v54 = vrot.slane %v2963_v19, 2  ;;  %v3032_v37 = vadd.f32 %v3031_v62, %v3030_v10 }
 0x216   : > { %v2965_v13 = vadd.f32 %v2964_v54, %v2963_v19  ;;  %v3033_v48 = vrot.slane %v3032_v37, 2 }
 0x218   : > { %v2966_v17 = vrot.slane %v2965_v13, 1  ;;  %v3034_v61 = vadd.f32 %v3033_v48, %v3032_v37 }
 0x21a   : > { %v2967_v24 = vadd.f32 %v2966_v17, %v2965_v13  ;;  %v3035_v21 = vrot.slane %v3034_v61, 1 }
 0x21c   : > { %v3036_v45 = vadd.f32 %v3035_v21, %v3034_v61  ;;  %v3040_v11 = vsel %vm3039_vm4, %v2967_v24, 0.0 }
 0x21e   : > { %v3042_v35 = vsel %vm3041_vm5, %v3036_v45, 0.0 }
 0x21f   : > { %v3043_v47 = vadd.f32 %v3042_v35, %v3040_v11 }
 0x221   : > { %3044 = vst [vmem:[%s141_s28] sm:$0xff] %v3043_v47 }
 0x222 PF: > { %s12_s9 = sadd.s32 1, %s4424_s9  }
 0x223   : > { %p9_p4 = scmp.ge.s32.totalorder %s12_s9, 4  }
 0x225   :  { %11 = sbr.rel (!%p9_p4) target bundleno = 1 (0x1), region = 58 }

// kernel: normal_conv_block.3
= control target key start
LH: loop header
LB: loop body
LE: loop exit
PB: predicated region body
PF: predicated region fallthrough
CT: control target
= control target key end

     0   :  { %s4505_s12 = smov 0   ;;  %s5748_s0 = inlined_call_operand.vmem [shape: f32[2,18,18,4], index: 0, kind: input, shape index: {}]   ;;  %s5749_s1 = inlined_call_operand.vmem [shape: f32[36,128], index: 1, kind: input, shape index: {}]   ;;  %s5750_s2 = inlined_call_operand.vmem [shape: f32[8,128], index: 2, kind: input, shape index: {}]   ;;  %s5751_s3 = inlined_call_operand.vmem [shape: f32[2,256,128], index: 3, kind: output, shape index: {}]  }
   0x1 LB: > { %s3153_s13 = sadd.s32 4294967295, %s4483_s12   ;;  %p3157_p0 = scmp.ge.s32.totalorder %s4483_s12, 1  ;;  %s4483_s12 = sphi %s4505_s12, %s13_s12  }
   0x2   : > { %p137_p1 = scmp.lt.s32.totalorder %s4483_s12, 3 }
   0x4   : > { %p138_p2 = pnand %p3157_p0, %p137_p1 }
   0x6   : > { %141 = sbr.rel (%p138_p2) target bundleno = 531 (0x213), region = 32 }
   0xd   : > { %v225_v0 = vld [vmem:[%s5749_s1] sm:$0xff]  ;;  %vm426_vm0 = vcmask 1043456   ;;  %v4519_v1 = vld [vmem:[%s5749_s1 + $0x10] sm:$0xff]  ;;  %p161_p3 = scmp.lt.s32.totalorder %s3153_s13, 1  ;;  %vm278_vm1 = vcmask 1046528   ;;  %vm361_vm2 = vcmask 31744  }
   0xe   : > { %v360_v2 = vrot.slane %v225_v0, 4  ;;  %3960 = vmatprep.subr.msk.mxu0 %vm426_vm0, %v4519_v1  ;;  %v1891_v3 = vrot.slane %v4519_v1, 4  ;;  %v4601_v33 = vld [vmem:[%s5749_s1 + $0x18] sm:$0xff]  ;;  %v4611_v35 = vld [vmem:[%s5749_s1 + $0x8] sm:$0xff]  ;;  %vm945_vm3 = vcmask 1045504  }
   0xf   : > { %3961 = vmatpush3.msk.msra.mxu0 %vm426_vm0, %v4519_v1  ;;  %s5931_s13 = smov (!%p161_p3, %s3153_s13), 1 }
  0x10   : > { %3760 = vmatprep.subr.msk.mxu1 %vm426_vm0, %v360_v2  ;;  %4010 = vmatprep.subr.msk.mxu0 %vm426_vm0, %v1891_v3  ;;  %s4468_s18 = smul.u32 432, %s5931_s13  ;;  %s3462_s5 = sshll.u32 %s5931_s13, 8 }
  0x11   : > { %3761 = vmatpush3.msk.msra.mxu1 %vm426_vm0, %v360_v2  ;;  %s5644_s8 = scalar_lea.vmem %s5751_s3, %s3462_s5 }
  0x12   : > { %3810 = vmatprep.subr.msk.mxu1 %vm426_vm0, %v225_v0  ;;  %s4536_s21 = scalar_lea.vmem %s5748_s0, %s4468_s18 }
  0x13   : > { %v4539_v4 = vld [vmem:[%s4536_s21] sm:$0xff]  ;;  %v4542_v5 = vld [vmem:[%s4536_s21 + $0x8] sm:$0xff]  ;;  %v4545_v6 = vld [vmem:[%s4536_s21 + $0x18] sm:$0xff] }
  0x14   : > { %5825 = vst [vmem:[#allocation2_spill] sm:$0xff] %v4545_v6  ;;  %v279_v7 = vrot.slane %v4539_v4, 1  ;;  %v280_v8 = vrot.slane %v4542_v5, 1  ;;  %v4550_v9 = vld [vmem:[%s4536_s21 + $0x20] sm:$0xff]  ;;  %v284_v10 = vrot.slane %v4545_v6, 1  ;;  %v4562_v15 = vld [vmem:[%s4536_s21 + $0x30] sm:$0xff] }
  0x15   : > { %5826 = vst [vmem:[#allocation3_spill] sm:$0xff] %v4550_v9  ;;  %v4554_v11 = vld [vmem:[%s4536_s21 + $0x10] sm:$0x3]  ;;  %v285_v12 = vrot.slane %v4550_v9, 1  ;;  %v4559_v14 = vld [vmem:[%s4536_s21 + $0x28] sm:$0x3] }
  0x16   : > { %v282_v13 = vrot.slane %v4554_v11, 1  ;;  %v281_v16 = vsel %vm278_vm1, %v279_v7, %v280_v8  ;;  %v287_v17 = vrot.slane %v4559_v14, 1  ;;  %v4567_v18 = vld [vmem:[%s4536_s21 + $0x38] sm:$0xff]  ;;  %v289_v19 = vrot.slane %v4562_v15, 1  ;;  %v4571_v20 = vld [vmem:[%s4536_s21 + $0x40] sm:$0x3] }
  0x17   : > { %3762 = vmatprep.mubr.msk.f32.mxu1 %vm361_vm2, %v281_v16  ;;  %v286_v21 = vsel %vm278_vm1, %v284_v10, %v285_v12  ;;  %v290_v23 = vrot.slane %v4567_v18, 1  ;;  %v292_v24 = vrot.slane %v4571_v20, 1  ;;  %v4579_v25 = vld [vmem:[%s4536_s21 + $0x48] sm:$0xff]  ;;  %v4582_v26 = vld [vmem:[%s4536_s21 + $0x50] sm:$0xff]  ;;  %v4585_v27 = vld [vmem:[%s4536_s21 + $0x58] sm:$0x3] }
  0x18   : > { %v283_v22 = vsel %vm278_vm1, %v280_v8, %v282_v13  ;;  %3962 = vmatprep.mubr.msk.f32.mxu0 %vm361_vm2, %v286_v21  ;;  %v288_v28 = vsel %vm278_vm1, %v285_v12, %v287_v17  ;;  %v294_v29 = vrot.slane %v4579_v25, 1  ;;  %v295_v30 = vrot.slane %v4582_v26, 1  ;;  %v4593_v31 = vld [vmem:[%s4536_s21 + $0x60] sm:$0xff]  ;;  %v4596_v32 = vld [vmem:[%s4536_s21 + $0x68] sm:$0xff]  ;;  %v4627_v41 = vld [vmem:[%s4536_s21 + $0x70] sm:$0x3] }
  0x19   : > { %3763 = vmatmul.mubr.msk.f32.vlgmr.msra.gmra.mrb[0].mxu1 %vm361_vm2, %v283_v22  ;;  %3963 = vmatmul.mubr.msk.f32.vlgmr.msra.gmra.mrb[0].mxu0 %vm361_vm2, %v288_v28  ;;  %v4606_v34 = vsel %vm278_vm1, %v289_v19, %v290_v23  ;;  %v4616_v36 = vsel %vm278_vm1, %v290_v23, %v292_v24  ;;  %v297_v37 = vrot.slane %v4585_v27, 1  ;;  %v299_v39 = vrot.slane %v4593_v31, 1  ;;  %v4633_v42 = vld [vmem:[%s4536_s21 + $0x78] sm:$0xff]  ;;  %v4636_v43 = vld [vmem:[%s4536_s21 + $0x80] sm:$0xff]  ;;  %v4656_v49 = vld [vmem:[%s4536_s21 + $0x88] sm:$0x3] }
  0x1a   : > { %3811 = vmatpush3.msk.msra.mxu1 %vm426_vm0, %v225_v0  ;;  %5827 = vst [vmem:[#allocation4_spill] sm:$0xff] %v4606_v34  ;;  %4011 = vmatpush3.msk.msra.mxu0 %vm426_vm0, %v1891_v3  ;;  %5828 = vst [vmem:[#allocation5_spill] sm:$0xff] %v4616_v36  ;;  %v4622_v38 = vsel %vm278_vm1, %v294_v29, %v295_v30  ;;  %v300_v40 = vrot.slane %v4596_v32, 1  ;;  %v302_v45 = vrot.slane %v4627_v41, 1  ;;  %v304_v47 = vrot.slane %v4633_v42, 1  ;;  %v4661_v50 = vld [vmem:[%s4536_s21 + $0x90] sm:$0xff] }
  0x1b   : > { %3765 = vmatprep.mubr.msk.f32.mxu1 %vm361_vm2, %v286_v21  ;;  %3965 = vmatprep.mubr.msk.f32.mxu0 %vm361_vm2, %v4606_v34  ;;  %5829 = vst [vmem:[#allocation6_spill] sm:$0xff] %v4622_v38  ;;  %v4647_v44 = vsel %vm278_vm1, %v295_v30, %v297_v37  ;;  %v305_v48 = vrot.slane %v4636_v43, 1  ;;  %v4664_v51 = vld [vmem:[%s4536_s21 + $0x98] sm:$0xff]  ;;  %v307_v53 = vrot.slane %v4656_v49, 1  ;;  %v309_v55 = vrot.slane %v4661_v50, 1  ;;  %v4687_v58 = vld [vmem:[%s4536_s21 + $0xa8] sm:$0xff] }
  0x1c   : > { %4060 = vmatprep.subr.msk.mxu0 %vm426_vm0, %v4601_v33  ;;  %3860 = vmatprep.subr.msk.mxu1 %vm426_vm0, %v4611_v35  ;;  %5830 = vst [vmem:[#allocation7_spill] sm:$0xff] %v4647_v44  ;;  %v4651_v46 = vsel %vm278_vm1, %v299_v39, %v300_v40  ;;  %v4673_v52 = vsel %vm278_vm1, %v300_v40, %v302_v45  ;;  %v310_v56 = vrot.slane %v4664_v51, 1  ;;  %v4682_v57 = vld [vmem:[%s4536_s21 + $0xa0] sm:$0x3]  ;;  %v4690_v59 = vld [vmem:[%s4536_s21 + $0xb0] sm:$0xff]  ;;  %v314_v63 = vrot.slane %v4687_v58, 1 }
  0x1d   : > { %3766 = vmatmul.mubr.msk.f32.gmra.mrb[2].mxu1 %vm361_vm2, %v288_v28  ;;  %3966 = vmatmul.mubr.msk.f32.gmra.mrb[2].mxu0 %vm361_vm2, %v4616_v36  ;;  %5831 = vst [vmem:[#allocation8_spill] sm:$0xff] %v4651_v46  ;;  %5832 = vst [vmem:[#allocation9_spill] sm:$0xff] %v4673_v52  ;;  %v4677_v54 = vsel %vm278_vm1, %v304_v47, %v305_v48  ;;  %v4699_v60 = vsel %vm278_vm1, %v305_v48, %v307_v53  ;;  %v312_v61 = vrot.slane %v4682_v57, 1  ;;  %v4708_v2 = vld [vmem:[%s4536_s21 + $0xb8] sm:$0x3]  ;;  %v4713_v3 = vld [vmem:[%s4536_s21 + $0xc0] sm:$0xff] }
  0x1e   : > { %3768 = vmatprep.mubr.msk.f32.mxu1 %vm361_vm2, %v4606_v34  ;;  %3968 = vmatprep.mubr.msk.f32.mxu0 %vm361_vm2, %v4622_v38  ;;  %5833 = vst [vmem:[#allocation10_spill] sm:$0xff] %v4677_v54  ;;  %5834 = vst [vmem:[#allocation11_spill] sm:$0xff] %v4699_v60  ;;  %v4703_v62 = vsel %vm278_vm1, %v309_v55, %v310_v56  ;;  %v315_v0 = vrot.slane %v4690_v59, 1  ;;  %v4716_v7 = vld [vmem:[%s4536_s21 + $0xc8] sm:$0xff]  ;;  %v317_v10 = vrot.slane %v4708_v2, 1  ;;  %v319_v13 = vrot.slane %v4713_v3, 1 }
  0x1f   : > { %5835 = vst [vmem:[#allocation12_spill] sm:$0xff] %v4703_v62  ;;  %v4725_v8 = vsel %vm278_vm1, %v310_v56, %v312_v61  ;;  %v320_v16 = vrot.slane %v4716_v7, 1  ;;  %v4734_v17 = vld [vmem:[%s4536_s21 + $0xd0] sm:$0x3]  ;;  %v951_v23 = vrot.slane %v4545_v6, 2  ;;  %v952_v24 = vrot.slane %v4550_v9, 2 }
  0x20   : > { %5836 = vst [vmem:[#allocation13_spill] sm:$0xff] %v4725_v8  ;;  %v4729_v12 = vsel %vm278_vm1, %v314_v63, %v315_v0  ;;  %v4745_v19 = vsel %vm278_vm1, %v315_v0, %v317_v10  ;;  %v322_v21 = vrot.slane %v4734_v17, 1  ;;  %v4754_v28 = vld [vmem:[%s4536_s21 + $0xd8] sm:$0xff]  ;;  %v4757_v29 = vld [vmem:[%s4536_s21 + $0xe0] sm:$0xff]  ;;  %v954_v30 = vrot.slane %v4559_v14, 2  ;;  %v4782_v53 = vld [vmem:[%s4536_s21 + $0xf0] sm:$0xff] }
  0x21   : > { %3769 = vmatmul.mubr.msk.f32.gmra.mrb[4].mxu1 %vm361_vm2, %v4616_v36  ;;  %3969 = vmatmul.mubr.msk.f32.gmra.mrb[4].mxu0 %vm361_vm2, %v4647_v44  ;;  %5837 = vst [vmem:[#allocation14_spill] sm:$0xff] %v4729_v12  ;;  %5838 = vst [vmem:[#allocation15_spill] sm:$0xff] %v4745_v19  ;;  %v4749_v22 = vsel %vm278_vm1, %v319_v13, %v320_v16  ;;  %v324_v39 = vrot.slane %v4754_v28, 1  ;;  %v325_v40 = vrot.slane %v4757_v29, 1  ;;  %v4774_v45 = vld [vmem:[%s4536_s21 + $0xe8] sm:$0x3] }
  0x22   : > { %3771 = vmatprep.mubr.msk.f32.mxu1 %vm361_vm2, %v4622_v38  ;;  %3971 = vmatprep.mubr.msk.f32.mxu0 %vm361_vm2, %v4651_v46  ;;  %5839 = vst [vmem:[#allocation16_spill] sm:$0xff] %v4749_v22  ;;  %v4769_v37 = vsel %vm278_vm1, %v320_v16, %v322_v21  ;;  %v4777_v47 = vsel %vm945_vm3, %v951_v23, %v952_v24  ;;  %v956_v48 = vrot.slane %v4562_v15, 2  ;;  %v957_v14 = vrot.slane %v4567_v18, 2  ;;  %v4785_v55 = vld [vmem:[%s4536_s21 + $0xf8] sm:$0xff]  ;;  %v4806_v16 = vld [vmem:[%s4536_s21 + $0x100] sm:$0x3] }
  0x23   : > { %5840 = vst [vmem:[#allocation17_spill] sm:$0xff] %v4769_v37  ;;  %v327_v56 = vrot.slane %v4774_v45, 1  ;;  %v959_v61 = vrot.slane %v4571_v20, 2  ;;  %v4798_v63 = vsel %vm945_vm3, %v952_v24, %v954_v30  ;;  %v4801_v0 = vsel %vm278_vm1, %v324_v39, %v325_v40  ;;  %v4815_v30 = vld [vmem:[%s4536_s21 + $0x108] sm:$0xff]  ;;  %v4818_v39 = vld [vmem:[%s4536_s21 + $0x110] sm:$0xff] }
  0x24   : > { %5841 = vst [vmem:[#allocation18_spill] sm:$0xff] %v4801_v0  ;;  %v329_v10 = vrot.slane %v4782_v53, 1  ;;  %v330_v13 = vrot.slane %v4785_v55, 1  ;;  %v4810_v23 = vsel %vm945_vm3, %v956_v48, %v957_v14  ;;  %v961_v20 = vrot.slane %v4579_v25, 2  ;;  %v4917_v36 = vld [vmem:[%s4536_s21 + $0x148] sm:$0x3] }
  0x25   : > { %3772 = vmatmul.mubr.msk.f32.gmra.mrb[6].mxu1 %vm361_vm2, %v4647_v44  ;;  %3972 = vmatmul.mubr.msk.f32.gmra.mrb[6].mxu0 %vm361_vm2, %v4673_v52  ;;  %v962_v24 = vrot.slane %v4582_v26, 2  ;;  %v4827_v48 = vsel %vm278_vm1, %v325_v40, %v327_v56  ;;  %v4830_v21 = vsel %vm945_vm3, %v957_v14, %v959_v61  ;;  %v335_v40 = vrot.slane %v4818_v39, 1  ;;  %v4844_v56 = vld [vmem:[%s4536_s21 + $0x118] sm:$0x3] }
  0x26   : > { %3774 = vmatprep.mubr.msk.f32.mxu1 %vm361_vm2, %v4651_v46  ;;  %3974 = vmatprep.mubr.msk.f32.mxu0 %vm361_vm2, %v4677_v54  ;;  %5842 = vst [vmem:[#allocation19_spill] sm:$0xff] %v4827_v48  ;;  %5843 = vst [vmem:[#allocation20_spill] sm:$0xff] %v4830_v21  ;;  %v966_v61 = vrot.slane %v4593_v31, 2  ;;  %v4890_v46 = vld [vmem:[%s4536_s21 + $0x138] sm:$0xff]  ;;  %v974_v44 = vrot.slane %v4656_v49, 2  ;;  %v979_v34 = vrot.slane %v4682_v57, 2 }
  0x27   : > { %v4847_v14 = vsel %vm945_vm3, %v961_v20, %v962_v24  ;;  %v344_v38 = vrot.slane %v4890_v46, 1  ;;  %v981_v57 = vrot.slane %v4687_v58, 2 }
  0x28   : > { %5845 = vst [vmem:[#allocation22_spill] sm:$0xff] %v4847_v14 }
  0x29   : > { %3775 = vmatmul.mubr.msk.f32.gmra.mrb[8].mxu1 %vm361_vm2, %v4673_v52  ;;  %3975 = vmatmul.mubr.msk.f32.gmra.mrb[8].mxu0 %vm361_vm2, %v4699_v60  ;;  %v4882_v52 = vld [vmem:[%s4536_s21 + $0x130] sm:$0x3] }
  0x2a   : > { %3777 = vmatprep.mubr.msk.f32.mxu1 %vm361_vm2, %v4677_v54  ;;  %3977 = vmatprep.mubr.msk.f32.mxu0 %vm361_vm2, %v4703_v62 }
  0x2d   : > { %3778 = vmatmul.mubr.msk.f32.gmra.mrb[10].mxu1 %vm361_vm2, %v4699_v60  ;;  %3978 = vmatmul.mubr.msk.f32.gmra.mrb[10].mxu0 %vm361_vm2, %v4725_v8  ;;  %v969_v60 = vrot.slane %v4627_v41, 2  ;;  %v971_v41 = vrot.slane %v4633_v42, 2 }
  0x2e   : > { %3780 = vmatprep.mubr.msk.f32.mxu1 %vm361_vm2, %v4703_v62  ;;  %3980 = vmatprep.mubr.msk.f32.mxu0 %vm361_vm2, %v4729_v12  ;;  %v337_v62 = vrot.slane %v4844_v56, 1 }
  0x31   : > { %3781 = vmatmul.mubr.msk.f32.gmra.mrb[12].mxu1 %vm361_vm2, %v4725_v8  ;;  %3981 = vmatmul.mubr.msk.f32.gmra.mrb[12].mxu0 %vm361_vm2, %v4745_v19  ;;  %v4852_v8 = vld [vmem:[%s4536_s21 + $0x120] sm:$0xff] }
  0x32   : > { %3783 = vmatprep.mubr.msk.f32.mxu1 %vm361_vm2, %v4729_v12  ;;  %3983 = vmatprep.mubr.msk.f32.mxu0 %vm361_vm2, %v4749_v22  ;;  %v967_v12 = vrot.slane %v4596_v32, 2  ;;  %v339_v54 = vrot.slane %v4852_v8, 1 }
  0x35   : > { %3784 = vmatmul.mubr.msk.f32.gmra.mrb[14].mxu1 %vm361_vm2, %v4745_v19  ;;  %3984 = vmatmul.mubr.msk.f32.gmra.mrb[14].mxu0 %vm361_vm2, %v4769_v37  ;;  %v964_v19 = vrot.slane %v4585_v27, 2  ;;  %v5846_v27 = vrot.slane %v4601_v33, 4 }
  0x36   : > { %3786 = vmatprep.mubr.msk.f32.mxu1 %vm361_vm2, %v4749_v22  ;;  %4012 = vmatprep.mubr.msk.f32.mxu0 %vm361_vm2, %v4777_v47  ;;  %v332_v22 = vrot.slane %v4806_v16, 1 }
  0x38   : > { %v4867_v20 = vsel %vm278_vm1, %v330_v13, %v332_v22  ;;  %v4885_v22 = vsel %vm945_vm3, %v966_v61, %v967_v12  ;;  %v342_v61 = vrot.slane %v4882_v52, 1 }
  0x39   : > { %3787 = vmatmul.mubr.msk.f32.gmra.mrb[16].mxu1 %vm361_vm2, %v4769_v37  ;;  %4013 = vmatmul.mubr.msk.f32.vlgmr.msra.gmra.mrb[0].mxu0 %vm361_vm2, %v4798_v63  ;;  %v4838_v37 = vsel %vm278_vm1, %v329_v10, %v330_v13  ;;  %v4855_v10 = vld [vmem:[%s4536_s21 + $0x128] sm:$0xff]  ;;  %5847 = vst [vmem:[#allocation23_spill] sm:$0xff] %v4867_v20  ;;  %5850 = vst [vmem:[#allocation26_spill] sm:$0xff] %v4885_v22  ;;  %v972_v13 = vrot.slane %v4636_v43, 2 }
  0x3a   : > { %3789 = vmatprep.mubr.msk.f32.mxu1 %vm361_vm2, %v4801_v0  ;;  %4061 = vmatpush3.msk.msra.mxu0 %vm426_vm0, %v4601_v33  ;;  %5844 = vst [vmem:[#allocation21_spill] sm:$0xff] %v4838_v37  ;;  %v334_v0 = vrot.slane %v4815_v30, 1 }
  0x3b   : > { %4015 = vmatprep.mubr.msk.f32.mxu0 %vm361_vm2, %v4810_v23  ;;  %4110 = vmatprep.subr.msk.mxu0 %vm426_vm0, %v5846_v27  ;;  %v4874_v27 = vsel %vm945_vm3, %v962_v24, %v964_v19  ;;  %v4893_v19 = vld [vmem:[%s4536_s21 + $0x140] sm:$0xff]  ;;  %v4905_v24 = vsel %vm945_vm3, %v967_v12, %v969_v60  ;;  %v976_v60 = vrot.slane %v4661_v50, 2  ;;  %v977_v12 = vrot.slane %v4664_v51, 2 }
  0x3c   : > { %5848 = vst [vmem:[#allocation24_spill] sm:$0xff] %v4874_v27  ;;  %5852 = vst [vmem:[#allocation28_spill] sm:$0xff] %v4905_v24 }
  0x3d   : > { %3790 = vmatmul.mubr.msk.f32.gmra.mrb[18].mxu1 %vm361_vm2, %v4827_v48  ;;  %4016 = vmatmul.mubr.msk.f32.gmra.mrb[2].mxu0 %vm361_vm2, %v4830_v21  ;;  %v4877_v48 = vsel %vm278_vm1, %v334_v0, %v335_v40  ;;  %v4902_v0 = vsel %vm278_vm1, %v335_v40, %v337_v62  ;;  %v4920_v62 = vsel %vm945_vm3, %v971_v41, %v972_v13  ;;  %v4925_v40 = vld [vmem:[%s4536_s21 + $0x150] sm:$0xff]  ;;  %v347_v41 = vrot.slane %v4917_v36, 1  ;;  %v4987_v21 = vld [vmem:[%s4536_s21 + $0x178] sm:$0x3] }
  0x3e   : > { %3792 = vmatprep.mubr.msk.f32.mxu1 %vm361_vm2, %v4838_v37  ;;  %4018 = vmatprep.mubr.msk.f32.mxu0 %vm361_vm2, %v4847_v14  ;;  %5849 = vst [vmem:[#allocation25_spill] sm:$0xff] %v4877_v48  ;;  %v340_v37 = vrot.slane %v4855_v10, 1  ;;  %5851 = vst [vmem:[#allocation27_spill] sm:$0xff] %v4902_v0 }
  0x3f   : > { %5854 = vst [vmem:[#allocation30_spill] sm:$0xff] %v4920_v62 }
  0x40   : > { %v4937_v49 = vsel %vm278_vm1, %v340_v37, %v342_v61  ;;  %v982_v61 = vrot.slane %v4690_v59, 2 }
  0x41   : > { %3793 = vmatmul.mubr.msk.f32.gmra.mrb[20].mxu1 %vm361_vm2, %v4867_v20  ;;  %4019 = vmatmul.mubr.msk.f32.gmra.mrb[4].mxu0 %vm361_vm2, %v4874_v27  ;;  %v4911_v20 = vsel %vm278_vm1, %v339_v54, %v340_v37  ;;  %v4928_v54 = vld [vmem:[%s4536_s21 + $0x158] sm:$0xff]  ;;  %5855 = vst [vmem:[#allocation31_spill] sm:$0xff] %v4937_v49  ;;  %v4952_v27 = vld [vmem:[%s4536_s21 + $0x160] sm:$0x3]  ;;  %v4955_v37 = vsel %vm945_vm3, %v976_v60, %v977_v12 }
  0x42   : > { %3795 = vmatprep.mubr.msk.f32.mxu1 %vm361_vm2, %v4877_v48  ;;  %4021 = vmatprep.mubr.msk.f32.mxu0 %vm361_vm2, %v4885_v22  ;;  %5853 = vst [vmem:[#allocation29_spill] sm:$0xff] %v4911_v20  ;;  %v345_v48 = vrot.slane %v4893_v19, 1  ;;  %v4944_v22 = vsel %vm945_vm3, %v972_v13, %v974_v44  ;;  %v4963_v44 = vld [vmem:[%s4536_s21 + $0x170] sm:$0xff]  ;;  %v4975_v13 = vsel %vm945_vm3, %v977_v12, %v979_v34  ;;  %v352_v60 = vrot.slane %v4952_v27, 1 }
  0x43   : > { %5856 = vst [vmem:[#allocation32_spill] sm:$0xff] %v4944_v22  ;;  %5858 = vst [vmem:[#allocation34_spill] sm:$0xff] %v4963_v44  ;;  %v986_v34 = vrot.slane %v4713_v3, 2  ;;  %v987_v12 = vrot.slane %v4716_v7, 2 }
  0x44   : > { %5860 = vst [vmem:[#allocation36_spill] sm:$0xff] %v4975_v13 }
  0x45   : > { %3796 = vmatmul.mubr.msk.f32.gmra.mrb[22].mxu1 %vm361_vm2, %v4902_v0  ;;  %4022 = vmatmul.mubr.msk.f32.gmra.mrb[6].mxu0 %vm361_vm2, %v4905_v24  ;;  %v4947_v0 = vsel %vm278_vm1, %v344_v38, %v345_v48  ;;  %v349_v24 = vrot.slane %v4925_v40, 1  ;;  %v4972_v38 = vsel %vm278_vm1, %v345_v48, %v347_v41  ;;  %v4990_v48 = vsel %vm945_vm3, %v981_v57, %v982_v61 }
  0x46   : > { %3798 = vmatprep.mubr.msk.f32.mxu1 %vm361_vm2, %v4911_v20  ;;  %4024 = vmatprep.mubr.msk.f32.mxu0 %vm361_vm2, %v4920_v62  ;;  %5857 = vst [vmem:[#allocation33_spill] sm:$0xff] %v4947_v0  ;;  %v350_v20 = vrot.slane %v4928_v54, 1  ;;  %v4960_v62 = vld [vmem:[%s4536_s21 + $0x168] sm:$0xff]  ;;  %5859 = vst [vmem:[#allocation35_spill] sm:$0xff] %v4972_v38 }
  0x48   : > { %v4981_v14 = vsel %vm278_vm1, %v349_v24, %v350_v20  ;;  %v357_v24 = vrot.slane %v4987_v21, 1 }
  0x49   : > { %3799 = vmatmul.mubr.msk.f32.gmra.mrb[24].mxu1 %vm361_vm2, %v4937_v49  ;;  %4025 = vmatmul.mubr.msk.f32.gmra.mrb[8].mxu0 %vm361_vm2, %v4944_v22  ;;  %5861 = vst [vmem:[#allocation37_spill] sm:$0xff] %v4981_v14  ;;  %v984_v49 = vrot.slane %v4708_v2, 2  ;;  %v354_v22 = vrot.slane %v4960_v62, 1  ;;  %v5001_v2 = vsel %vm278_vm1, %v350_v20, %v352_v60  ;;  %v992_v20 = vrot.slane %v4757_v29, 2 }
  0x4a   : > { %3801 = vmatprep.mubr.msk.f32.mxu1 %vm361_vm2, %v4947_v0  ;;  %4027 = vmatprep.mubr.msk.f32.mxu0 %vm361_vm2, %v4955_v37  ;;  %v355_v0 = vrot.slane %v4963_v44, 1  ;;  %5862 = vst [vmem:[#allocation38_spill] sm:$0xff] %v5001_v2  ;;  %v996_v60 = vrot.slane %v4782_v53, 2 }
  0x4b   : > { %v5007_v41 = vsel %vm945_vm3, %v982_v61, %v984_v49  ;;  %v994_v49 = vrot.slane %v4774_v45, 2 }
  0x4c   : > { %v5010_v57 = vsel %vm278_vm1, %v354_v22, %v355_v0  ;;  %v5025_v22 = vsel %vm278_vm1, %v355_v0, %v357_v24  ;;  %v1002_v24 = vrot.slane %v4818_v39, 2  ;;  %v1007_v0 = vrot.slane %v4855_v10, 2 }
  0x4d   : > { %3802 = vmatmul.mubr.msk.f32.gmra.mrb[26].mxu1 %vm361_vm2, %v4972_v38  ;;  %4028 = vmatmul.mubr.msk.f32.gmra.mrb[10].mxu0 %vm361_vm2, %v4975_v13  ;;  %5863 = vst [vmem:[#allocation39_spill] sm:$0xff] %v5010_v57  ;;  %v989_v38 = vrot.slane %v4734_v17, 2  ;;  %v5014_v13 = vsel %vm945_vm3, %v986_v34, %v987_v12  ;;  %5864 = vst [vmem:[#allocation40_spill] sm:$0xff] %v5025_v22  ;;  %v997_v34 = vrot.slane %v4785_v55, 2 }
  0x4e   : > { %3804 = vmatprep.mubr.msk.f32.mxu1 %vm361_vm2, %v4981_v14  ;;  %4030 = vmatprep.mubr.msk.f32.mxu0 %vm361_vm2, %v4990_v48  ;;  %v991_v14 = vrot.slane %v4754_v28, 2  ;;  %v5047_v45 = vsel %vm945_vm3, %v992_v20, %v994_v49 }
  0x4f   : > { %v5030_v17 = vsel %vm945_vm3, %v987_v12, %v989_v38  ;;  %v5052_v38 = vsel %vm945_vm3, %v996_v60, %v997_v34  ;;  %v1001_v12 = vrot.slane %v4815_v30, 2  ;;  %v1006_v60 = vrot.slane %v4852_v8, 2 }
  0x50   : > { %v5034_v61 = vsel %vm945_vm3, %v991_v14, %v992_v20  ;;  %v999_v14 = vrot.slane %v4806_v16, 2  ;;  %v1004_v20 = vrot.slane %v4844_v56, 2 }
  0x51   : > { %3805 = vmatmul.mubr.msk.f32.gmra.mrb[28].mxu1 %vm361_vm2, %v5001_v2  ;;  %4031 = vmatmul.mubr.msk.f32.gmra.mrb[12].mxu0 %vm361_vm2, %v5007_v41  ;;  %v5071_v49 = vsel %vm945_vm3, %v1001_v12, %v1002_v24  ;;  %v1012_v12 = vrot.slane %v4893_v19, 2  ;;  %v1022_v2 = vrot.slane %v4963_v44, 2 }
  0x52   : > { %3807 = vmatprep.mubr.msk.f32.mxu1 %vm361_vm2, %v5010_v57  ;;  %4033 = vmatprep.mubr.msk.f32.mxu0 %vm361_vm2, %v5014_v13  ;;  %v5067_v16 = vsel %vm945_vm3, %v997_v34, %v999_v14  ;;  %5865 = vst [vmem:[#allocation41_spill] sm:$0xff] %v5071_v49  ;;  %v5087_v56 = vsel %vm945_vm3, %v1002_v24, %v1004_v20  ;;  %v1009_v34 = vrot.slane %v4882_v52, 2  ;;  %v1014_v24 = vrot.slane %v4917_v36, 2 }
  0x53   : > { %v5091_v14 = vsel %vm945_vm3, %v1006_v60, %v1007_v0  ;;  %v1016_v60 = vrot.slane %v4925_v40, 2  ;;  %v1017_v57 = vrot.slane %v4928_v54, 2 }
  0x54   : > { %v5104_v52 = vsel %vm945_vm3, %v1007_v0, %v1009_v34  ;;  %v5121_v36 = vsel %vm945_vm3, %v1012_v12, %v1014_v24  ;;  %v1019_v0 = vrot.slane %v4952_v27, 2 }
  0x55   : > { %3808 = vmatmul.mubr.msk.f32.gmra.mrb[30].mxu1 %vm361_vm2, %v5025_v22  ;;  %4034 = vmatmul.mubr.msk.f32.gmra.mrb[14].mxu0 %vm361_vm2, %v5030_v17  ;;  %v5866_v22 = vrot.slane %v4611_v35, 4  ;;  %5867 = vst [vmem:[#allocation42_spill] sm:$0xff] %v5104_v52  ;;  %5869 = vst [vmem:[#allocation44_spill] sm:$0xff] %v5121_v36  ;;  %v5125_v34 = vsel %vm945_vm3, %v1016_v60, %v1017_v57 }
  0x56   : > { %3812 = vmatprep.mubr.msk.f32.mxu1 %vm361_vm2, %v4539_v4  ;;  %4036 = vmatprep.mubr.msk.f32.mxu0 %vm361_vm2, %v5034_v61  ;;  %5870 = vst [vmem:[#allocation45_spill] sm:$0xff] %v5125_v34  ;;  %v5144_v27 = vsel %vm945_vm3, %v1017_v57, %v1019_v0 }
  0x57   : > { %5871 = vst [vmem:[#allocation46_spill] sm:$0xff] %v5144_v27 }
  0x59   : > { %3813 = vmatmul.mubr.msk.f32.vlgmr.msra.gmra.mrb[0].mxu1 %vm361_vm2, %v4542_v5  ;;  %4037 = vmatmul.mubr.msk.f32.gmra.mrb[16].mxu0 %vm361_vm2, %v5047_v45 }
  0x5a   : > { %3861 = vmatpush3.msk.msra.mxu1 %vm426_vm0, %v4611_v35  ;;  %3815 = vmatprep.mubr.msk.f32.mxu1 %vm361_vm2, %v4545_v6  ;;  %v5135_v6 = vld [vmem:[%s4536_s21 + $0x188] sm:$0xff] }
  0x5b   : > { %4039 = vmatprep.mubr.msk.f32.mxu0 %vm361_vm2, %v5052_v38  ;;  %3910 = vmatprep.subr.msk.mxu1 %vm426_vm0, %v5866_v22  ;;  %v1011_v22 = vrot.slane %v4890_v46, 2 }
  0x5d   : > { %3816 = vmatmul.mubr.msk.f32.gmra.mrb[2].mxu1 %vm361_vm2, %v4550_v9  ;;  %4040 = vmatmul.mubr.msk.f32.gmra.mrb[18].mxu0 %vm361_vm2, %v5067_v16  ;;  %v5108_v20 = vsel %vm945_vm3, %v1011_v22, %v1012_v12  ;;  %v1021_v22 = vrot.slane %v4960_v62, 2  ;;  %v5132_v9 = vld [vmem:[%s4536_s21 + $0x180] sm:$0xff]  ;;  %v1024_v12 = vrot.slane %v4987_v21, 2 }
  0x5e   : > { %3818 = vmatprep.mubr.msk.f32.mxu1 %vm361_vm2, %v4562_v15  ;;  %4042 = vmatprep.mubr.msk.f32.mxu0 %vm361_vm2, %v5071_v49  ;;  %5868 = vst [vmem:[#allocation43_spill] sm:$0xff] %v5108_v20  ;;  %v1886_v60 = vrot.slane %v5132_v9, 2 }
  0x5f   : > { %v5148_v24 = vsel %vm945_vm3, %v1021_v22, %v1022_v2  ;;  %v5164_v21 = vsel %vm945_vm3, %v1022_v2, %v1024_v12  ;;  %v5876_v22 = vrot.slane %v4601_v33, 4  ;;  %v946_v33 = vrot.slane %v4539_v4, 2 }
  0x60   : > { %5872 = vst [vmem:[#allocation47_spill] sm:$0xff] %v5148_v24  ;;  %5873 = vst [vmem:[#allocation48_spill] sm:$0xff] %v5164_v21  ;;  %v947_v12 = vrot.slane %v4542_v5, 2  ;;  %v5877_v5 = vrot.slane %v4611_v35, 4  ;;  %v5879_v35 = vld [vmem:[#allocation22_spill] sm:$0xff] }
  0x61   : > { %3819 = vmatmul.mubr.msk.f32.gmra.mrb[4].mxu1 %vm361_vm2, %v4567_v18  ;;  %4043 = vmatmul.mubr.msk.f32.gmra.mrb[20].mxu0 %vm361_vm2, %v5087_v56 }
  0x62   : > { %3821 = vmatprep.mubr.msk.f32.mxu1 %vm361_vm2, %v4579_v25  ;;  %4045 = vmatprep.mubr.msk.f32.mxu0 %vm361_vm2, %v5091_v14 }
  0x65   : > { %3822 = vmatmul.mubr.msk.f32.gmra.mrb[6].mxu1 %vm361_vm2, %v4582_v26  ;;  %4046 = vmatmul.mubr.msk.f32.gmra.mrb[22].mxu0 %vm361_vm2, %v5104_v52  ;;  %v5153_v52 = vld [vmem:[%s4536_s21 + $0x190] sm:$0x3] }
  0x66   : > { %3824 = vmatprep.mubr.msk.f32.mxu1 %vm361_vm2, %v4593_v31  ;;  %4048 = vmatprep.mubr.msk.f32.mxu0 %vm361_vm2, %v5108_v20  ;;  %v1887_v20 = vrot.slane %v5135_v6, 2  ;;  %v1889_v57 = vrot.slane %v5153_v52, 2 }
  0x68   : > { %v5168_v0 = vsel %vm945_vm3, %v1886_v60, %v1887_v20  ;;  %v5179_v2 = vsel %vm945_vm3, %v1887_v20, %v1889_v57  ;;  %v5194_v20 = vld [vmem:[%s5749_s1 + $0x20] sm:$0xf]  ;;  %v949_v60 = vrot.slane %v4554_v11, 2  ;;  %v948_v57 = vsel %vm945_vm3, %v946_v33, %v947_v12  ;;  %v5878_v11 = vld [vmem:[#allocation20_spill] sm:$0xff] }
  0x69   : > { %3825 = vmatmul.mubr.msk.f32.gmra.mrb[8].mxu1 %vm361_vm2, %v4596_v32  ;;  %4049 = vmatmul.mubr.msk.f32.gmra.mrb[24].mxu0 %vm361_vm2, %v5121_v36  ;;  %5874 = vst [vmem:[#allocation49_spill] sm:$0xff] %v5168_v0  ;;  %5875 = vst [vmem:[#allocation50_spill] sm:$0xff] %v5179_v2  ;;  %v5883_v33 = vld [vmem:[#allocation30_spill] sm:$0xff] }
  0x6a   : > { %3827 = vmatprep.mubr.msk.f32.mxu1 %vm361_vm2, %v4633_v42  ;;  %4051 = vmatprep.mubr.msk.f32.mxu0 %vm361_vm2, %v5125_v34  ;;  %v950_v4 = vsel %vm945_vm3, %v947_v12, %v949_v60  ;;  %v5884_v12 = vld [vmem:[#allocation32_spill] sm:$0xff]  ;;  %v5320_v60 = vld [vmem:[%s4536_s21 + $0x198] sm:$0xff] }
  0x6d   : > { %3828 = vmatmul.mubr.msk.f32.gmra.mrb[10].mxu1 %vm361_vm2, %v4636_v43  ;;  %4052 = vmatmul.mubr.msk.f32.gmra.mrb[26].mxu0 %vm361_vm2, %v5144_v27 }
  0x6e   : > { %3830 = vmatprep.mubr.msk.f32.mxu1 %vm361_vm2, %v4661_v50  ;;  %4054 = vmatprep.mubr.msk.f32.mxu0 %vm361_vm2, %v5148_v24 }
  0x71   : > { %3831 = vmatmul.mubr.msk.f32.gmra.mrb[12].mxu1 %vm361_vm2, %v4664_v51  ;;  %4055 = vmatmul.mubr.msk.f32.gmra.mrb[28].mxu0 %vm361_vm2, %v5164_v21 }
  0x72   : > { %3833 = vmatprep.mubr.msk.f32.mxu1 %vm361_vm2, %v4687_v58  ;;  %4057 = vmatprep.mubr.msk.f32.mxu0 %vm361_vm2, %v5168_v0  ;;  %v5888_v0 = vld [vmem:[#allocation6_spill] sm:$0xff] }
  0x75   : > { %3834 = vmatmul.mubr.msk.f32.gmra.mrb[14].mxu1 %vm361_vm2, %v4690_v59  ;;  %4058 = vmatmul.mubr.msk.f32.gmra.mrb[30].mxu0 %vm361_vm2, %v5179_v2  ;;  %v5887_v2 = vld [vmem:[#allocation5_spill] sm:$0xff] }
  0x76   : > { %3836 = vmatprep.mubr.msk.f32.mxu1 %vm361_vm2, %v4713_v3  ;;  %4062 = vmatprep.mubr.msk.f32.mxu0 %vm361_vm2, %v4562_v15 }
  0x79   : > { %3837 = vmatmul.mubr.msk.f32.gmra.mrb[16].mxu1 %vm361_vm2, %v4716_v7  ;;  %4063 = vmatmul.mubr.msk.f32.vlgmr.msra.gmra.mrb[0].mxu0 %vm361_vm2, %v4567_v18 }
  0x7a   : > { %3839 = vmatprep.mubr.msk.f32.mxu1 %vm361_vm2, %v4754_v28  ;;  %4111 = vmatpush3.msk.msra.mxu0 %vm426_vm0, %v5876_v22  ;;  %v5882_v22 = vld [vmem:[#allocation28_spill] sm:$0xff] }
  0x7b   : > { %4065 = vmatprep.mubr.msk.f32.mxu0 %vm361_vm2, %v4579_v25  ;;  %4160 = vmatprep.subr.msk.mxu0 %vm426_vm0, %v5194_v20 }
  0x7d   : > { %3840 = vmatmul.mubr.msk.f32.gmra.mrb[18].mxu1 %vm361_vm2, %v4757_v29  ;;  %4066 = vmatmul.mubr.msk.f32.gmra.mrb[2].mxu0 %vm361_vm2, %v4582_v26 }
  0x7e   : > { %3842 = vmatprep.mubr.msk.f32.mxu1 %vm361_vm2, %v4782_v53  ;;  %4068 = vmatprep.mubr.msk.f32.mxu0 %vm361_vm2, %v4593_v31 }
  0x81   : > { %3843 = vmatmul.mubr.msk.f32.gmra.mrb[20].mxu1 %vm361_vm2, %v4785_v55  ;;  %4069 = vmatmul.mubr.msk.f32.gmra.mrb[4].mxu0 %vm361_vm2, %v4596_v32 }
  0x82   : > { %3845 = vmatprep.mubr.msk.f32.mxu1 %vm361_vm2, %v4815_v30  ;;  %4071 = vmatprep.mubr.msk.f32.mxu0 %vm361_vm2, %v4633_v42 }
  0x85   : > { %3846 = vmatmul.mubr.msk.f32.gmra.mrb[22].mxu1 %vm361_vm2, %v4818_v39  ;;  %4072 = vmatmul.mubr.msk.f32.gmra.mrb[6].mxu0 %vm361_vm2, %v4636_v43 }
  0x86   : > { %3848 = vmatprep.mubr.msk.f32.mxu1 %vm361_vm2, %v4852_v8  ;;  %4074 = vmatprep.mubr.msk.f32.mxu0 %vm361_vm2, %v4661_v50 }
  0x89   : > { %3849 = vmatmul.mubr.msk.f32.gmra.mrb[24].mxu1 %vm361_vm2, %v4855_v10  ;;  %4075 = vmatmul.mubr.msk.f32.gmra.mrb[8].mxu0 %vm361_vm2, %v4664_v51 }
  0x8a   : > { %3851 = vmatprep.mubr.msk.f32.mxu1 %vm361_vm2, %v4890_v46  ;;  %4077 = vmatprep.mubr.msk.f32.mxu0 %vm361_vm2, %v4687_v58 }
  0x8d   : > { %3852 = vmatmul.mubr.msk.f32.gmra.mrb[26].mxu1 %vm361_vm2, %v4893_v19  ;;  %4078 = vmatmul.mubr.msk.f32.gmra.mrb[10].mxu0 %vm361_vm2, %v4690_v59 }
  0x8e   : > { %3854 = vmatprep.mubr.msk.f32.mxu1 %vm361_vm2, %v4925_v40  ;;  %4080 = vmatprep.mubr.msk.f32.mxu0 %vm361_vm2, %v4713_v3 }
  0x91   : > { %3855 = vmatmul.mubr.msk.f32.gmra.mrb[28].mxu1 %vm361_vm2, %v4928_v54  ;;  %4081 = vmatmul.mubr.msk.f32.gmra.mrb[12].mxu0 %vm361_vm2, %v4716_v7 }
  0x92   : > { %3857 = vmatprep.mubr.msk.f32.mxu1 %vm361_vm2, %v4960_v62  ;;  %4083 = vmatprep.mubr.msk.f32.mxu0 %vm361_vm2, %v4754_v28 }
  0x95   : > { %3858 = vmatmul.mubr.msk.f32.gmra.mrb[30].mxu1 %vm361_vm2, %v4963_v44  ;;  %4084 = vmatmul.mubr.msk.f32.gmra.mrb[14].mxu0 %vm361_vm2, %v4757_v29 }
  0x96   : > { %3862 = vmatprep.mubr.msk.f32.mxu1 %vm361_vm2, %v948_v57  ;;  %4086 = vmatprep.mubr.msk.f32.mxu0 %vm361_vm2, %v4782_v53  ;;  %v5885_v57 = vld [vmem:[#allocation36_spill] sm:$0xff] }
  0x99   : > { %3863 = vmatmul.mubr.msk.f32.vlgmr.msra.gmra.mrb[0].mxu1 %vm361_vm2, %v950_v4  ;;  %4087 = vmatmul.mubr.msk.f32.gmra.mrb[16].mxu0 %vm361_vm2, %v4785_v55  ;;  %v5331_v4 = vld [vmem:[%s4536_s21 + $0x1a0] sm:$0xff] }
  0x9a   : > { %3911 = vmatpush3.msk.msra.mxu1 %vm426_vm0, %v5877_v5  ;;  %3865 = vmatprep.mubr.msk.f32.mxu1 %vm361_vm2, %v4777_v47  ;;  %v5880_v47 = vld [vmem:[#allocation24_spill] sm:$0xff] }
  0x9b   : > { %4089 = vmatprep.mubr.msk.f32.mxu0 %vm361_vm2, %v4815_v30  ;;  %4210 = vmatprep.subr.msk.mxu1 %vm426_vm0, %v4519_v1  ;;  %v5886_v5 = vld [vmem:[#allocation4_spill] sm:$0xff] }
  0x9d   : > { %3866 = vmatmul.mubr.msk.f32.gmra.mrb[2].mxu1 %vm361_vm2, %v4798_v63  ;;  %4090 = vmatmul.mubr.msk.f32.gmra.mrb[18].mxu0 %vm361_vm2, %v4818_v39  ;;  %v5881_v63 = vld [vmem:[#allocation26_spill] sm:$0xff] }
  0x9e   : > { %3868 = vmatprep.mubr.msk.f32.mxu1 %vm361_vm2, %v4810_v23  ;;  %4092 = vmatprep.mubr.msk.f32.mxu0 %vm361_vm2, %v4852_v8 }
  0xa1   : > { %3869 = vmatmul.mubr.msk.f32.gmra.mrb[4].mxu1 %vm361_vm2, %v5878_v11  ;;  %4093 = vmatmul.mubr.msk.f32.gmra.mrb[20].mxu0 %vm361_vm2, %v4855_v10 }
  0xa2   : > { %3871 = vmatprep.mubr.msk.f32.mxu1 %vm361_vm2, %v5879_v35  ;;  %4095 = vmatprep.mubr.msk.f32.mxu0 %vm361_vm2, %v4890_v46 }
  0xa5   : > { %3872 = vmatmul.mubr.msk.f32.gmra.mrb[6].mxu1 %vm361_vm2, %v5880_v47  ;;  %4096 = vmatmul.mubr.msk.f32.gmra.mrb[22].mxu0 %vm361_vm2, %v4893_v19 }
  0xa6   : > { %3874 = vmatprep.mubr.msk.f32.mxu1 %vm361_vm2, %v5881_v63  ;;  %4098 = vmatprep.mubr.msk.f32.mxu0 %vm361_vm2, %v4925_v40 }
  0xa9   : > { %3875 = vmatmul.mubr.msk.f32.gmra.mrb[8].mxu1 %vm361_vm2, %v5882_v22  ;;  %4099 = vmatmul.mubr.msk.f32.gmra.mrb[24].mxu0 %vm361_vm2, %v4928_v54 }
  0xaa   : > { %3877 = vmatprep.mubr.msk.f32.mxu1 %vm361_vm2, %v5883_v33  ;;  %4101 = vmatprep.mubr.msk.f32.mxu0 %vm361_vm2, %v4960_v62 }
  0xad   : > { %3878 = vmatmul.mubr.msk.f32.gmra.mrb[10].mxu1 %vm361_vm2, %v5884_v12  ;;  %4102 = vmatmul.mubr.msk.f32.gmra.mrb[26].mxu0 %vm361_vm2, %v4963_v44  ;;  %v5889_v44 = vld [vmem:[#allocation7_spill] sm:$0xff] }
  0xae   : > { %3880 = vmatprep.mubr.msk.f32.mxu1 %vm361_vm2, %v4955_v37  ;;  %4104 = vmatprep.mubr.msk.f32.mxu0 %vm361_vm2, %v5132_v9 }
  0xb1   : > { %3881 = vmatmul.mubr.msk.f32.gmra.mrb[12].mxu1 %vm361_vm2, %v5885_v57  ;;  %4105 = vmatmul.mubr.msk.f32.gmra.mrb[28].mxu0 %vm361_vm2, %v5135_v6 }
  0xb2   : > { %3883 = vmatprep.mubr.msk.f32.mxu1 %vm361_vm2, %v4990_v48  ;;  %4107 = vmatprep.mubr.msk.f32.mxu0 %vm361_vm2, %v5320_v60 }
  0xb5   : > { %3884 = vmatmul.mubr.msk.f32.gmra.mrb[14].mxu1 %vm361_vm2, %v5007_v41  ;;  %4108 = vmatmul.mubr.msk.f32.gmra.mrb[30].mxu0 %vm361_vm2, %v5331_v4 }
  0xb6   : > { %3886 = vmatprep.mubr.msk.f32.mxu1 %vm361_vm2, %v5014_v13  ;;  %4112 = vmatprep.mubr.msk.f32.mxu0 %vm361_vm2, %v5886_v5  ;;  %v5890_v5 = vld [vmem:[#allocation8_spill] sm:$0xff] }
  0xb9   : > { %3887 = vmatmul.mubr.msk.f32.gmra.mrb[16].mxu1 %vm361_vm2, %v5030_v17  ;;  %4113 = vmatmul.mubr.msk.f32.vlgmr.msra.gmra.mrb[0].mxu0 %vm361_vm2, %v5887_v2  ;;  %v5891_v2 = vld [vmem:[#allocation9_spill] sm:$0xff] }
  0xba   : > { %3889 = vmatprep.mubr.msk.f32.mxu1 %vm361_vm2, %v5034_v61  ;;  %4161 = vmatpush3.msk.msra.mxu0 %vm426_vm0, %v5194_v20  ;;  %v5894_v20 = vld [vmem:[#allocation12_spill] sm:$0xff] }
  0xbb   : > { %4115 = vmatprep.mubr.msk.f32.mxu0 %vm361_vm2, %v5888_v0  ;;  %v5892_v0 = vld [vmem:[#allocation10_spill] sm:$0xff] }
  0xbd   : > { %3890 = vmatmul.mubr.msk.f32.gmra.mrb[18].mxu1 %vm361_vm2, %v5047_v45  ;;  %4116 = vmatmul.mubr.msk.f32.gmra.mrb[2].mxu0 %vm361_vm2, %v5889_v44  ;;  %v5893_v44 = vld [vmem:[#allocation11_spill] sm:$0xff] }
  0xbe   : > { %3892 = vmatprep.mubr.msk.f32.mxu1 %vm361_vm2, %v5052_v38  ;;  %4118 = vmatprep.mubr.msk.f32.mxu0 %vm361_vm2, %v5890_v5  ;;  %v5895_v5 = vld [vmem:[#allocation42_spill] sm:$0xff] }
  0xc1   : > { %3893 = vmatmul.mubr.msk.f32.gmra.mrb[20].mxu1 %vm361_vm2, %v5067_v16  ;;  %4119 = vmatmul.mubr.msk.f32.gmra.mrb[4].mxu0 %vm361_vm2, %v5891_v2  ;;  %v5896_v2 = vld [vmem:[#allocation13_spill] sm:$0xff] }
  0xc2   : > { %3895 = vmatprep.mubr.msk.f32.mxu1 %vm361_vm2, %v5071_v49  ;;  %4121 = vmatprep.mubr.msk.f32.mxu0 %vm361_vm2, %v5892_v0  ;;  %v5897_v49 = vld [vmem:[#allocation43_spill] sm:$0xff]  ;;  %v5898_v0 = vld [vmem:[#allocation14_spill] sm:$0xff] }
  0xc5   : > { %3896 = vmatmul.mubr.msk.f32.gmra.mrb[22].mxu1 %vm361_vm2, %v5087_v56  ;;  %4122 = vmatmul.mubr.msk.f32.gmra.mrb[6].mxu0 %vm361_vm2, %v5893_v44  ;;  %v5899_v44 = vld [vmem:[#allocation15_spill] sm:$0xff] }
  0xc6   : > { %3898 = vmatprep.mubr.msk.f32.mxu1 %vm361_vm2, %v5091_v14  ;;  %4124 = vmatprep.mubr.msk.f32.mxu0 %vm361_vm2, %v5894_v20  ;;  %v5900_v20 = vld [vmem:[#allocation16_spill] sm:$0xff] }
  0xc9   : > { %3899 = vmatmul.mubr.msk.f32.gmra.mrb[24].mxu1 %vm361_vm2, %v5895_v5  ;;  %4125 = vmatmul.mubr.msk.f32.gmra.mrb[8].mxu0 %vm361_vm2, %v5896_v2  ;;  %v5901_v2 = vld [vmem:[#allocation17_spill] sm:$0xff] }
  0xca   : > { %3901 = vmatprep.mubr.msk.f32.mxu1 %vm361_vm2, %v5897_v49  ;;  %4127 = vmatprep.mubr.msk.f32.mxu0 %vm361_vm2, %v5898_v0  ;;  %v5902_v0 = vld [vmem:[#allocation18_spill] sm:$0xff] }
  0xcd   : > { %3902 = vmatmul.mubr.msk.f32.gmra.mrb[26].mxu1 %vm361_vm2, %v5121_v36  ;;  %4128 = vmatmul.mubr.msk.f32.gmra.mrb[10].mxu0 %vm361_vm2, %v5899_v44  ;;  %v5903_v44 = vld [vmem:[#allocation19_spill] sm:$0xff] }
  0xce   : > { %3904 = vmatprep.mubr.msk.f32.mxu1 %vm361_vm2, %v5125_v34  ;;  %4130 = vmatprep.mubr.msk.f32.mxu0 %vm361_vm2, %v5900_v20  ;;  %v5904_v34 = vld [vmem:[#allocation2_spill] sm:$0xff]  ;;  %v5905_v20 = vld [vmem:[#allocation21_spill] sm:$0xff]  ;;  %v5458_v36 = vld [vmem:[%s4536_s21 + $0x1a8] sm:$0x3] }
  0xd1   : > { %3905 = vmatmul.mubr.msk.f32.gmra.mrb[28].mxu1 %vm361_vm2, %v5144_v27  ;;  %4131 = vmatmul.mubr.msk.f32.gmra.mrb[12].mxu0 %vm361_vm2, %v5901_v2  ;;  %v5906_v27 = vld [vmem:[#allocation3_spill] sm:$0xff] }
  0xd2   : > { %3907 = vmatprep.mubr.msk.f32.mxu1 %vm361_vm2, %v5148_v24  ;;  %4133 = vmatprep.mubr.msk.f32.mxu0 %vm361_vm2, %v5902_v0  ;;  %v5907_v2 = vld [vmem:[#allocation23_spill] sm:$0xff]  ;;  %v5915_v24 = vld [vmem:[#allocation38_spill] sm:$0xff] }
  0xd5   : > { %3908 = vmatmul.mubr.msk.f32.gmra.mrb[30].mxu1 %vm361_vm2, %v5164_v21  ;;  %4134 = vmatmul.mubr.msk.f32.gmra.mrb[14].mxu0 %vm361_vm2, %v5903_v44  ;;  %v5908_v21 = vld [vmem:[#allocation25_spill] sm:$0xff] }
  0xd6   : > { %3912 = vmatprep.mubr.msk.f32.mxu1 %vm361_vm2, %v5904_v34  ;;  %4136 = vmatprep.mubr.msk.f32.mxu0 %vm361_vm2, %v5905_v20  ;;  %v5909_v34 = vld [vmem:[#allocation27_spill] sm:$0xff] }
  0xd9   : > { %3913 = vmatmul.mubr.msk.f32.vlgmr.msra.gmra.mrb[0].mxu1 %vm361_vm2, %v5906_v27  ;;  %4137 = vmatmul.mubr.msk.f32.gmra.mrb[16].mxu0 %vm361_vm2, %v5907_v2  ;;  %v5910_v27 = vld [vmem:[#allocation29_spill] sm:$0xff] }
  0xda   : > { %4211 = vmatpush3.msk.msra.mxu1 %vm426_vm0, %v4519_v1  ;;  %3915 = vmatprep.mubr.msk.f32.mxu1 %vm361_vm2, %v4562_v15  ;;  %v5911_v1 = vld [vmem:[#allocation31_spill] sm:$0xff]  ;;  %v5912_v15 = vld [vmem:[#allocation33_spill] sm:$0xff] }
  0xdb   : > { %4139 = vmatprep.mubr.msk.f32.mxu0 %vm361_vm2, %v5908_v21 }
  0xdd   : > { %3916 = vmatmul.mubr.msk.f32.gmra.mrb[2].mxu1 %vm361_vm2, %v4567_v18  ;;  %4140 = vmatmul.mubr.msk.f32.gmra.mrb[18].mxu0 %vm361_vm2, %v5909_v34  ;;  %v5913_v18 = vld [vmem:[#allocation35_spill] sm:$0xff] }
  0xde   : > { %3918 = vmatprep.mubr.msk.f32.mxu1 %vm361_vm2, %v4579_v25  ;;  %4142 = vmatprep.mubr.msk.f32.mxu0 %vm361_vm2, %v5910_v27  ;;  %v5914_v25 = vld [vmem:[#allocation37_spill] sm:$0xff] }
  0xe1   : > { %3919 = vmatmul.mubr.msk.f32.gmra.mrb[4].mxu1 %vm361_vm2, %v4582_v26  ;;  %4143 = vmatmul.mubr.msk.f32.gmra.mrb[20].mxu0 %vm361_vm2, %v5911_v1  ;;  %v1617_v26 = vrot.slane %v5132_v9, 1 }
  0xe2   : > { %3921 = vmatprep.mubr.msk.f32.mxu1 %vm361_vm2, %v4593_v31  ;;  %4145 = vmatprep.mubr.msk.f32.mxu0 %vm361_vm2, %v5912_v15  ;;  %v1618_v31 = vrot.slane %v5135_v6, 1 }
  0xe4   : > { %v5455_v15 = vsel %vm278_vm1, %v1617_v26, %v1618_v31 }
  0xe5   : > { %3922 = vmatmul.mubr.msk.f32.gmra.mrb[6].mxu1 %vm361_vm2, %v4596_v32  ;;  %4146 = vmatmul.mubr.msk.f32.gmra.mrb[22].mxu0 %vm361_vm2, %v5913_v18  ;;  %v5916_v32 = vld [vmem:[#allocation39_spill] sm:$0xff]  ;;  %v2423_v18 = vrot.slane %v5331_v4, 1 }
  0xe6   : > { %3924 = vmatprep.mubr.msk.f32.mxu1 %vm361_vm2, %v4633_v42  ;;  %4148 = vmatprep.mubr.msk.f32.mxu0 %vm361_vm2, %v5914_v25  ;;  %v1620_v42 = vrot.slane %v5153_v52, 1  ;;  %v2422_v25 = vrot.slane %v5320_v60, 1  ;;  %v2425_v52 = vrot.slane %v5458_v36, 1 }
  0xe8   : > { %v2424_v26 = vsel %vm278_vm1, %v2422_v25, %v2423_v18 }
  0xe9   : > { %3925 = vmatmul.mubr.msk.f32.gmra.mrb[8].mxu1 %vm361_vm2, %v4636_v43  ;;  %4149 = vmatmul.mubr.msk.f32.gmra.mrb[24].mxu0 %vm361_vm2, %v5915_v24  ;;  %v5917_v43 = vld [vmem:[#allocation40_spill] sm:$0xff] }
  0xea   : > { %3927 = vmatprep.mubr.msk.f32.mxu1 %vm361_vm2, %v4661_v50  ;;  %4151 = vmatprep.mubr.msk.f32.mxu0 %vm361_vm2, %v5916_v32  ;;  %v5469_v50 = vsel %vm278_vm1, %v1618_v31, %v1620_v42 }
  0xed   : > { %3928 = vmatmul.mubr.msk.f32.gmra.mrb[10].mxu1 %vm361_vm2, %v4664_v51  ;;  %4152 = vmatmul.mubr.msk.f32.gmra.mrb[26].mxu0 %vm361_vm2, %v5917_v43  ;;  %v2426_v51 = vsel %vm278_vm1, %v2423_v18, %v2425_v52 }
  0xee   : > { %3930 = vmatprep.mubr.msk.f32.mxu1 %vm361_vm2, %v4687_v58  ;;  %4154 = vmatprep.mubr.msk.f32.mxu0 %vm361_vm2, %v5455_v15  ;;  %v5921_v58 = vld [vmem:[#allocation33_spill] sm:$0xff] }
  0xf1   : > { %3931 = vmatmul.mubr.msk.f32.gmra.mrb[12].mxu1 %vm361_vm2, %v4690_v59  ;;  %4155 = vmatmul.mubr.msk.f32.gmra.mrb[28].mxu0 %vm361_vm2, %v5469_v50  ;;  %v5922_v59 = vld [vmem:[#allocation45_spill] sm:$0xff] }
  0xf2   : > { %3933 = vmatprep.mubr.msk.f32.mxu1 %vm361_vm2, %v4713_v3  ;;  %4157 = vmatprep.mubr.msk.f32.mxu0 %vm361_vm2, %v2424_v26  ;;  %v5923_v3 = vld [vmem:[#allocation35_spill] sm:$0xff] }
  0xf5   : > { %3934 = vmatmul.mubr.msk.f32.gmra.mrb[14].mxu1 %vm361_vm2, %v4716_v7  ;;  %4158 = vmatmul.mubr.msk.f32.gmra.mrb[30].mxu0 %vm361_vm2, %v2426_v51  ;;  %v5924_v7 = vld [vmem:[#allocation46_spill] sm:$0xff] }
  0xf6   : > { %3936 = vmatprep.mubr.msk.f32.mxu1 %vm361_vm2, %v4754_v28  ;;  %4162 = vmatprep.mubr.msk.f32.mxu0 %vm361_vm2, %v4810_v23  ;;  %v5926_v28 = vld [vmem:[#allocation47_spill] sm:$0xff]  ;;  %v5928_v23 = vld [vmem:[#allocation49_spill] sm:$0xff] }
  0xf9   : > { %3937 = vmatmul.mubr.msk.f32.gmra.mrb[16].mxu1 %vm361_vm2, %v4757_v29  ;;  %4163 = vmatmul.mubr.msk.f32.vlgmr.msra.gmra.mrb[0].mxu0 %vm361_vm2, %v5878_v11  ;;  %v2691_v29 = vrot.slane %v5320_v60, 2 }
  0xfa   : > { %3939 = vmatprep.mubr.msk.f32.mxu1 %vm361_vm2, %v4782_v53  ;;  %4165 = vmatprep.mubr.msk.f32.mxu0 %vm361_vm2, %v5879_v35  ;;  %v2692_v53 = vrot.slane %v5331_v4, 2 }
  0xfd   : > { %3940 = vmatmul.mubr.msk.f32.gmra.mrb[18].mxu1 %vm361_vm2, %v4785_v55  ;;  %4166 = vmatmul.mubr.msk.f32.gmra.mrb[2].mxu0 %vm361_vm2, %v5880_v47  ;;  %v5927_v55 = vld [vmem:[#allocation48_spill] sm:$0xff]  ;;  %v5635_v47 = vld [vmem:[%s5750_s2 + $0x1] ss:$0 sm:$0xff] }
  0xfe   : > { %3942 = vmatprep.mubr.msk.f32.mxu1 %vm361_vm2, %v4815_v30  ;;  %4168 = vmatprep.mubr.msk.f32.mxu0 %vm361_vm2, %v5881_v63  ;;  %v2694_v30 = vrot.slane %v5458_v36, 2 }
 0x101   : > { %3943 = vmatmul.mubr.msk.f32.gmra.mrb[20].mxu1 %vm361_vm2, %v4818_v39  ;;  %4169 = vmatmul.mubr.msk.f32.gmra.mrb[4].mxu0 %vm361_vm2, %v5882_v22  ;;  %v2693_v39 = vsel %vm945_vm3, %v2691_v29, %v2692_v53 }
 0x102   : > { %3945 = vmatprep.mubr.msk.f32.mxu1 %vm361_vm2, %v4852_v8  ;;  %4171 = vmatprep.mubr.msk.f32.mxu0 %vm361_vm2, %v5883_v33  ;;  %v5925_v8 = vld [vmem:[#allocation37_spill] sm:$0xff] }
 0x105   : > { %3946 = vmatmul.mubr.msk.f32.gmra.mrb[22].mxu1 %vm361_vm2, %v4855_v10  ;;  %4172 = vmatmul.mubr.msk.f32.gmra.mrb[6].mxu0 %vm361_vm2, %v5884_v12  ;;  %v5929_v10 = vld [vmem:[#allocation50_spill] sm:$0xff] }
 0x106   : > { %3948 = vmatprep.mubr.msk.f32.mxu1 %vm361_vm2, %v4890_v46  ;;  %4174 = vmatprep.mubr.msk.f32.mxu0 %vm361_vm2, %v4955_v37  ;;  %v5918_v46 = vld [vmem:[#allocation34_spill] sm:$0xff] }
 0x109   : > { %3949 = vmatmul.mubr.msk.f32.gmra.mrb[24].mxu1 %vm361_vm2, %v4893_v19  ;;  %4175 = vmatmul.mubr.msk.f32.gmra.mrb[8].mxu0 %vm361_vm2, %v5885_v57  ;;  %v2695_v19 = vsel %vm945_vm3, %v2692_v53, %v2694_v30 }
 0x10a   : > { %3951 = vmatprep.mubr.msk.f32.mxu1 %vm361_vm2, %v4925_v40  ;;  %4177 = vmatprep.mubr.msk.f32.mxu0 %vm361_vm2, %v4990_v48 }
 0x10d   : > { %3952 = vmatmul.mubr.msk.f32.gmra.mrb[26].mxu1 %vm361_vm2, %v4928_v54  ;;  %4178 = vmatmul.mubr.msk.f32.gmra.mrb[10].mxu0 %vm361_vm2, %v5007_v41 }
 0x10e   : > { %3954 = vmatprep.mubr.msk.f32.mxu1 %vm361_vm2, %v4960_v62  ;;  %4180 = vmatprep.mubr.msk.f32.mxu0 %vm361_vm2, %v5014_v13 }
 0x111   : > { %3955 = vmatmul.mubr.msk.f32.gmra.mrb[28].mxu1 %vm361_vm2, %v5918_v46  ;;  %4181 = vmatmul.mubr.msk.f32.gmra.mrb[12].mxu0 %vm361_vm2, %v5030_v17 }
 0x112   : > { %3957 = vmatprep.mubr.msk.f32.mxu1 %vm361_vm2, %v5132_v9  ;;  %4183 = vmatprep.mubr.msk.f32.mxu0 %vm361_vm2, %v5034_v61  ;;  %v5919_v9 = vld [vmem:[#allocation41_spill] sm:$0xff] }
 0x115   : > { %3958 = vmatmul.mubr.msk.f32.gmra.mrb[30].mxu1 %vm361_vm2, %v5135_v6  ;;  %4184 = vmatmul.mubr.msk.f32.gmra.mrb[14].mxu0 %vm361_vm2, %v5047_v45  ;;  %v5920_v6 = vld [vmem:[#allocation44_spill] sm:$0xff] }
 0x116   : > { %3986 = vmatprep.mubr.msk.f32.mxu1 %vm361_vm2, %v5902_v0  ;;  %4186 = vmatprep.mubr.msk.f32.mxu0 %vm361_vm2, %v5052_v38 }
 0x119   : > { %3987 = vmatmul.mubr.msk.f32.vlgmr.msra.gmra.mrb[16].mxu1 %vm361_vm2, %v5903_v44  ;;  %4187 = vmatmul.mubr.msk.f32.gmra.mrb[16].mxu0 %vm361_vm2, %v5067_v16 }
 0x11a   : > { %3989 = vmatprep.mubr.msk.f32.mxu1 %vm361_vm2, %v5905_v20  ;;  %4189 = vmatprep.mubr.msk.f32.mxu0 %vm361_vm2, %v5919_v9 }
 0x11d   : > { %3990 = vmatmul.mubr.msk.f32.gmra.mrb[18].mxu1 %vm361_vm2, %v5907_v2  ;;  %4190 = vmatmul.mubr.msk.f32.gmra.mrb[18].mxu0 %vm361_vm2, %v5087_v56 }
 0x11e   : > { %3992 = vmatprep.mubr.msk.f32.mxu1 %vm361_vm2, %v5908_v21  ;;  %4192 = vmatprep.mubr.msk.f32.mxu0 %vm361_vm2, %v5091_v14  ;;  %v5630_v21 = vld [vmem:[%s5750_s2] ss:$0 sm:$0xff] }
 0x121   : > { %3993 = vmatmul.mubr.msk.f32.gmra.mrb[20].mxu1 %vm361_vm2, %v5909_v34  ;;  %4193 = vmatmul.mubr.msk.f32.gmra.mrb[20].mxu0 %vm361_vm2, %v5895_v5 }
 0x122   : > { %3995 = vmatprep.mubr.msk.f32.mxu1 %vm361_vm2, %v5910_v27  ;;  %4195 = vmatprep.mubr.msk.f32.mxu0 %vm361_vm2, %v5897_v49 }
 0x125   : > { %3996 = vmatmul.mubr.msk.f32.gmra.mrb[22].mxu1 %vm361_vm2, %v5911_v1  ;;  %4196 = vmatmul.mubr.msk.f32.gmra.mrb[22].mxu0 %vm361_vm2, %v5920_v6 }
 0x126   : > { %3998 = vmatprep.mubr.msk.f32.mxu1 %vm361_vm2, %v5921_v58  ;;  %4198 = vmatprep.mubr.msk.f32.mxu0 %vm361_vm2, %v5922_v59 }
 0x129   : > { %3999 = vmatmul.mubr.msk.f32.gmra.mrb[24].mxu1 %vm361_vm2, %v5923_v3  ;;  %4199 = vmatmul.mubr.msk.f32.gmra.mrb[24].mxu0 %vm361_vm2, %v5924_v7 }
 0x12a   : > { %4001 = vmatprep.mubr.msk.f32.mxu1 %vm361_vm2, %v5925_v8  ;;  %4201 = vmatprep.mubr.msk.f32.mxu0 %vm361_vm2, %v5926_v28 }
 0x12d   : > { %4002 = vmatmul.mubr.msk.f32.gmra.mrb[26].mxu1 %vm361_vm2, %v5915_v24  ;;  %4202 = vmatmul.mubr.msk.f32.gmra.mrb[26].mxu0 %vm361_vm2, %v5927_v55 }
 0x12e   : > { %4004 = vmatprep.mubr.msk.f32.mxu1 %vm361_vm2, %v5916_v32  ;;  %4204 = vmatprep.mubr.msk.f32.mxu0 %vm361_vm2, %v5928_v23 }
 0x131   : > { %4005 = vmatmul.mubr.msk.f32.gmra.mrb[28].mxu1 %vm361_vm2, %v5917_v43  ;;  %4205 = vmatmul.mubr.msk.f32.gmra.mrb[28].mxu0 %vm361_vm2, %v5929_v10 }
 0x132   : > { %4007 = vmatprep.mubr.msk.f32.mxu1 %vm361_vm2, %v5455_v15  ;;  %4207 = vmatprep.mubr.msk.f32.mxu0 %vm361_vm2, %v2693_v39 }
 0x135   : > { %4008 = vmatmul.mubr.msk.f32.gmra.mrb[30].mxu1 %vm361_vm2, %v5469_v50  ;;  %4208 = vmatmul.mubr.msk.f32.gmra.mrb[30].mxu0 %vm361_vm2, %v2695_v19 }
 0x1ac   : > { %v3914_v62 = vpop.f32.mrb[0].mxu1 }
 0x1ad   : > { %v1425_v40 = vpop.f32.mrb[1].mxu1 }
 0x1b0   : > { %v3917_v54 = vpop.f32.mrb[2].mxu1 }
 0x1b1   : > { %v1435_v37 = vpop.f32.mrb[3].mxu1 }
 0x1b4   : > { %v3920_v13 = vpop.f32.mrb[4].mxu1 }
 0x1b5   : > { %v1445_v48 = vpop.f32.mrb[5].mxu1 }
 0x1b8   : > { %v3923_v41 = vpop.f32.mrb[6].mxu1 }
 0x1b9   : > { %v1455_v17 = vpop.f32.mrb[7].mxu1 }
 0x1bc   : > { %v3926_v61 = vpop.f32.mrb[8].mxu1 }
 0x1bd   : > { %v1465_v45 = vpop.f32.mrb[9].mxu1 }
 0x1c0   : > { %v5615_v38 = vpop.f32.mrb[10].mxu1 }
 0x1c1   : > { %v5617_v16 = vpop.f32.mrb[11].mxu1 }
 0x1c4   : > { %v5619_v49 = vpop.f32.mrb[12].mxu1 }
 0x1c5   : > { %v5621_v56 = vpop.f32.mrb[13].mxu1 }
 0x1c8   : > { %v5623_v14 = vpop.f32.mrb[14].mxu1 }
 0x1c9   : > { %v5625_v36 = vpop.f32.mrb[15].mxu1 }
 0x1cc   : > { %v4164_v24 = vpop.f32.mrb[0].mxu0 }
 0x1cd   : > { %v4212_v11 = vadd.f32 %v4164_v24, %v3914_v62  ;;  %v2769_v35 = vpop.f32.mrb[1].mxu0 }
 0x1ce   : > { %v4213_v63 = vadd.f32 %v2769_v35, %v1425_v40 }
 0x1cf   : > { %v2967_v22 = vmul.f32 %v4212_v11, %v5630_v21 }
 0x1d0   : > { %v2966_v33 = vmul.f32 %v4213_v63, %v5630_v21  ;;  %v4167_v12 = vpop.f32.mrb[2].mxu0 }
 0x1d1   : > { %v3003_v60 = vadd.f32 %v5635_v47, %v2967_v22  ;;  %v4214_v57 = vadd.f32 %v4167_v12, %v3917_v54  ;;  %v2779_v4 = vpop.f32.mrb[3].mxu0 }
 0x1d2   : > { %v3002_v5 = vadd.f32 %v5635_v47, %v2966_v33  ;;  %v4215_v0 = vadd.f32 %v2779_v4, %v1435_v37 }
 0x1d3   : > { %v3035_v44 = vmax.f32 %v3003_v60, 0.0  ;;  %v2969_v20 = vmul.f32 %v4214_v57, %v5630_v21 }
 0x1d4   : > { %v3034_v2 = vmax.f32 %v3002_v5, 0.0  ;;  %v2968_v34 = vmul.f32 %v4215_v0, %v5630_v21  ;;  %v4170_v27 = vpop.f32.mrb[4].mxu0 }
 0x1d5   : > { %3067 = vst [vmem:[%s5644_s8 + $0x8] sm:$0xff] %v3035_v44  ;;  %v3005_v1 = vadd.f32 %v5635_v47, %v2969_v20  ;;  %v4216_v15 = vadd.f32 %v4170_v27, %v3920_v13  ;;  %v2789_v18 = vpop.f32.mrb[5].mxu0 }
 0x1d6   : > { %3066 = vst [vmem:[%s5644_s8] sm:$0xff] %v3034_v2  ;;  %v3004_v25 = vadd.f32 %v5635_v47, %v2968_v34  ;;  %v4217_v31 = vadd.f32 %v2789_v18, %v1445_v48 }
 0x1d7   : > { %v3037_v32 = vmax.f32 %v3005_v1, 0.0  ;;  %v2971_v42 = vmul.f32 %v4216_v15, %v5630_v21 }
 0x1d8   : > { %v3036_v43 = vmax.f32 %v3004_v25, 0.0  ;;  %v2970_v50 = vmul.f32 %v4217_v31, %v5630_v21  ;;  %v4173_v52 = vpop.f32.mrb[6].mxu0 }
 0x1d9   : > { %3069 = vst [vmem:[%s5644_s8 + $0x18] sm:$0xff] %v3037_v32  ;;  %v3007_v26 = vadd.f32 %v5635_v47, %v2971_v42  ;;  %v4218_v51 = vadd.f32 %v4173_v52, %v3923_v41  ;;  %v2799_v46 = vpop.f32.mrb[7].mxu0 }
 0x1da   : > { %3068 = vst [vmem:[%s5644_s8 + $0x10] sm:$0xff] %v3036_v43  ;;  %v3006_v9 = vadd.f32 %v5635_v47, %v2970_v50  ;;  %v4219_v6 = vadd.f32 %v2799_v46, %v1455_v17 }
 0x1db   : > { %v3039_v58 = vmax.f32 %v3007_v26, 0.0  ;;  %v2973_v59 = vmul.f32 %v4218_v51, %v5630_v21 }
 0x1dc   : > { %v3038_v3 = vmax.f32 %v3006_v9, 0.0  ;;  %v2972_v7 = vmul.f32 %v4219_v6, %v5630_v21  ;;  %v4176_v8 = vpop.f32.mrb[8].mxu0 }
 0x1dd   : > { %3071 = vst [vmem:[%s5644_s8 + $0x28] sm:$0xff] %v3039_v58  ;;  %v3009_v28 = vadd.f32 %v5635_v47, %v2973_v59  ;;  %v4220_v29 = vadd.f32 %v4176_v8, %v3926_v61  ;;  %v2809_v53 = vpop.f32.mrb[9].mxu0 }
 0x1de   : > { %3070 = vst [vmem:[%s5644_s8 + $0x20] sm:$0xff] %v3038_v3  ;;  %v3008_v55 = vadd.f32 %v5635_v47, %v2972_v7  ;;  %v4221_v23 = vadd.f32 %v2809_v53, %v1465_v45 }
 0x1df   : > { %v3041_v30 = vmax.f32 %v3009_v28, 0.0  ;;  %v2975_v39 = vmul.f32 %v4220_v29, %v5630_v21 }
 0x1e0   : > { %v3040_v10 = vmax.f32 %v3008_v55, 0.0  ;;  %v2974_v19 = vmul.f32 %v4221_v23, %v5630_v21  ;;  %v4179_v62 = vpop.f32.mrb[10].mxu0 }
 0x1e1   : > { %3073 = vst [vmem:[%s5644_s8 + $0x38] sm:$0xff] %v3041_v30  ;;  %v3011_v40 = vadd.f32 %v5635_v47, %v2975_v39  ;;  %v4222_v54 = vadd.f32 %v4179_v62, %v5615_v38  ;;  %v2819_v37 = vpop.f32.mrb[11].mxu0 }
 0x1e2   : > { %3072 = vst [vmem:[%s5644_s8 + $0x30] sm:$0xff] %v3040_v10  ;;  %v3010_v13 = vadd.f32 %v5635_v47, %v2974_v19  ;;  %v4223_v48 = vadd.f32 %v2819_v37, %v5617_v16 }
 0x1e3   : > { %v3043_v41 = vmax.f32 %v3011_v40, 0.0  ;;  %v2977_v17 = vmul.f32 %v4222_v54, %v5630_v21 }
 0x1e4   : > { %v3042_v61 = vmax.f32 %v3010_v13, 0.0  ;;  %v2976_v45 = vmul.f32 %v4223_v48, %v5630_v21  ;;  %v4182_v24 = vpop.f32.mrb[12].mxu0 }
 0x1e5   : > { %3075 = vst [vmem:[%s5644_s8 + $0x48] sm:$0xff] %v3043_v41  ;;  %v3013_v11 = vadd.f32 %v5635_v47, %v2977_v17  ;;  %v4224_v38 = vadd.f32 %v4182_v24, %v5619_v49  ;;  %v2829_v35 = vpop.f32.mrb[13].mxu0 }
 0x1e6   : > { %3074 = vst [vmem:[%s5644_s8 + $0x40] sm:$0xff] %v3042_v61  ;;  %v3012_v63 = vadd.f32 %v5635_v47, %v2976_v45  ;;  %v4225_v16 = vadd.f32 %v2829_v35, %v5621_v56 }
 0x1e7   : > { %v3045_v22 = vmax.f32 %v3013_v11, 0.0  ;;  %v2979_v33 = vmul.f32 %v4224_v38, %v5630_v21 }
 0x1e8   : > { %v3044_v12 = vmax.f32 %v3012_v63, 0.0  ;;  %v2978_v60 = vmul.f32 %v4225_v16, %v5630_v21  ;;  %v4185_v57 = vpop.f32.mrb[14].mxu0 }
 0x1e9   : > { %3077 = vst [vmem:[%s5644_s8 + $0x58] sm:$0xff] %v3045_v22  ;;  %v3015_v4 = vadd.f32 %v5635_v47, %v2979_v33  ;;  %v4226_v5 = vadd.f32 %v4185_v57, %v5623_v14  ;;  %v2839_v49 = vpop.f32.mrb[15].mxu0 }
 0x1ea   : > { %3076 = vst [vmem:[%s5644_s8 + $0x50] sm:$0xff] %v3044_v12  ;;  %v3014_v0 = vadd.f32 %v5635_v47, %v2978_v60  ;;  %v4227_v56 = vadd.f32 %v2839_v49, %v5625_v36 }
 0x1eb   : > { %v3047_v44 = vmax.f32 %v3015_v4, 0.0  ;;  %v2981_v20 = vmul.f32 %v4226_v5, %v5630_v21 }
 0x1ec   : > { %v3988_v2 = vpop.f32.mrb[16].mxu1  ;;  %v3046_v34 = vmax.f32 %v3014_v0, 0.0  ;;  %v2980_v27 = vmul.f32 %v4227_v56, %v5630_v21  ;;  %v4188_v1 = vpop.f32.mrb[16].mxu0 }
 0x1ed   : > { %v1775_v15 = vpop.f32.mrb[17].mxu1  ;;  %3079 = vst [vmem:[%s5644_s8 + $0x68] sm:$0xff] %v3047_v44  ;;  %v3017_v14 = vadd.f32 %v5635_v47, %v2981_v20  ;;  %v4228_v18 = vadd.f32 %v4188_v1, %v3988_v2  ;;  %v2849_v25 = vpop.f32.mrb[17].mxu0 }
 0x1ee   : > { %3078 = vst [vmem:[%s5644_s8 + $0x60] sm:$0xff] %v3046_v34  ;;  %v3016_v31 = vadd.f32 %v5635_v47, %v2980_v27  ;;  %v4229_v36 = vadd.f32 %v2849_v25, %v1775_v15 }
 0x1ef   : > { %v3049_v32 = vmax.f32 %v3017_v14, 0.0  ;;  %v2983_v42 = vmul.f32 %v4228_v18, %v5630_v21 }
 0x1f0   : > { %v3991_v43 = vpop.f32.mrb[18].mxu1  ;;  %v3048_v50 = vmax.f32 %v3016_v31, 0.0  ;;  %v2982_v52 = vmul.f32 %v4229_v36, %v5630_v21  ;;  %v4191_v26 = vpop.f32.mrb[18].mxu0 }
 0x1f1   : > { %v1785_v51 = vpop.f32.mrb[19].mxu1  ;;  %3081 = vst [vmem:[%s5644_s8 + $0x78] sm:$0xff] %v3049_v32  ;;  %v3019_v46 = vadd.f32 %v5635_v47, %v2983_v42  ;;  %v4230_v9 = vadd.f32 %v4191_v26, %v3991_v43  ;;  %v2859_v6 = vpop.f32.mrb[19].mxu0 }
 0x1f2   : > { %3080 = vst [vmem:[%s5644_s8 + $0x70] sm:$0xff] %v3048_v50  ;;  %v3018_v58 = vadd.f32 %v5635_v47, %v2982_v52  ;;  %v4231_v59 = vadd.f32 %v2859_v6, %v1785_v51 }
 0x1f3   : > { %v3051_v3 = vmax.f32 %v3019_v46, 0.0  ;;  %v2985_v7 = vmul.f32 %v4230_v9, %v5630_v21 }
 0x1f4   : > { %v3994_v8 = vpop.f32.mrb[20].mxu1  ;;  %v3050_v28 = vmax.f32 %v3018_v58, 0.0  ;;  %v2984_v29 = vmul.f32 %v4231_v59, %v5630_v21  ;;  %v4194_v53 = vpop.f32.mrb[20].mxu0 }
 0x1f5   : > { %v1795_v55 = vpop.f32.mrb[21].mxu1  ;;  %3083 = vst [vmem:[%s5644_s8 + $0x88] sm:$0xff] %v3051_v3  ;;  %v3021_v23 = vadd.f32 %v5635_v47, %v2985_v7  ;;  %v4232_v30 = vadd.f32 %v4194_v53, %v3994_v8  ;;  %v2869_v39 = vpop.f32.mrb[21].mxu0 }
 0x1f6   : > { %3082 = vst [vmem:[%s5644_s8 + $0x80] sm:$0xff] %v3050_v28  ;;  %v3020_v10 = vadd.f32 %v5635_v47, %v2984_v29  ;;  %v4233_v19 = vadd.f32 %v2869_v39, %v1795_v55 }
 0x1f7   : > { %v3053_v62 = vmax.f32 %v3021_v23, 0.0  ;;  %v2987_v40 = vmul.f32 %v4232_v30, %v5630_v21 }
 0x1f8   : > { %v3997_v54 = vpop.f32.mrb[22].mxu1  ;;  %v3052_v37 = vmax.f32 %v3020_v10, 0.0  ;;  %v2986_v13 = vmul.f32 %v4233_v19, %v5630_v21  ;;  %v4197_v48 = vpop.f32.mrb[22].mxu0 }
 0x1f9   : > { %v1805_v41 = vpop.f32.mrb[23].mxu1  ;;  %3085 = vst [vmem:[%s5644_s8 + $0x98] sm:$0xff] %v3053_v62  ;;  %v3023_v17 = vadd.f32 %v5635_v47, %v2987_v40  ;;  %v4234_v61 = vadd.f32 %v4197_v48, %v3997_v54  ;;  %v2879_v45 = vpop.f32.mrb[23].mxu0 }
 0x1fa   : > { %3084 = vst [vmem:[%s5644_s8 + $0x90] sm:$0xff] %v3052_v37  ;;  %v3022_v24 = vadd.f32 %v5635_v47, %v2986_v13  ;;  %v4235_v11 = vadd.f32 %v2879_v45, %v1805_v41 }
 0x1fb   : > { %v3055_v38 = vmax.f32 %v3023_v17, 0.0  ;;  %v2989_v35 = vmul.f32 %v4234_v61, %v5630_v21 }
 0x1fc   : > { %v4000_v63 = vpop.f32.mrb[24].mxu1  ;;  %v3054_v16 = vmax.f32 %v3022_v24, 0.0  ;;  %v2988_v22 = vmul.f32 %v4235_v11, %v5630_v21  ;;  %v4200_v33 = vpop.f32.mrb[24].mxu0 }
 0x1fd   : > { %v1815_v12 = vpop.f32.mrb[25].mxu1  ;;  %3087 = vst [vmem:[%s5644_s8 + $0xa8] sm:$0xff] %v3055_v38  ;;  %v3025_v60 = vadd.f32 %v5635_v47, %v2989_v35  ;;  %v4236_v57 = vadd.f32 %v4200_v33, %v4000_v63  ;;  %v2889_v4 = vpop.f32.mrb[25].mxu0 }
 0x1fe   : > { %3086 = vst [vmem:[%s5644_s8 + $0xa0] sm:$0xff] %v3054_v16  ;;  %v3024_v5 = vadd.f32 %v5635_v47, %v2988_v22  ;;  %v4237_v49 = vadd.f32 %v2889_v4, %v1815_v12 }
 0x1ff   : > { %v3057_v0 = vmax.f32 %v3025_v60, 0.0  ;;  %v2991_v56 = vmul.f32 %v4236_v57, %v5630_v21 }
 0x200   : > { %v4003_v44 = vpop.f32.mrb[26].mxu1  ;;  %v3056_v20 = vmax.f32 %v3024_v5, 0.0  ;;  %v2990_v2 = vmul.f32 %v4237_v49, %v5630_v21  ;;  %v4203_v34 = vpop.f32.mrb[26].mxu0 }
 0x201   : > { %v1825_v27 = vpop.f32.mrb[27].mxu1  ;;  %3089 = vst [vmem:[%s5644_s8 + $0xb8] sm:$0xff] %v3057_v0  ;;  %v3027_v1 = vadd.f32 %v5635_v47, %v2991_v56  ;;  %v4238_v15 = vadd.f32 %v4203_v34, %v4003_v44  ;;  %v2899_v14 = vpop.f32.mrb[27].mxu0 }
 0x202   : > { %3088 = vst [vmem:[%s5644_s8 + $0xb0] sm:$0xff] %v3056_v20  ;;  %v3026_v18 = vadd.f32 %v5635_v47, %v2990_v2  ;;  %v4239_v25 = vadd.f32 %v2899_v14, %v1825_v27 }
 0x203   : > { %v3059_v31 = vmax.f32 %v3027_v1, 0.0  ;;  %v2993_v36 = vmul.f32 %v4238_v15, %v5630_v21 }
 0x204   : > { %v4006_v32 = vpop.f32.mrb[28].mxu1  ;;  %v3058_v42 = vmax.f32 %v3026_v18, 0.0  ;;  %v2992_v43 = vmul.f32 %v4239_v25, %v5630_v21  ;;  %v4206_v50 = vpop.f32.mrb[28].mxu0 }
 0x205   : > { %v1835_v52 = vpop.f32.mrb[29].mxu1  ;;  %3091 = vst [vmem:[%s5644_s8 + $0xc8] sm:$0xff] %v3059_v31  ;;  %v3029_v26 = vadd.f32 %v5635_v47, %v2993_v36  ;;  %v4240_v51 = vadd.f32 %v4206_v50, %v4006_v32  ;;  %v2909_v46 = vpop.f32.mrb[29].mxu0 }
 0x206   : > { %3090 = vst [vmem:[%s5644_s8 + $0xc0] sm:$0xff] %v3058_v42  ;;  %v3028_v9 = vadd.f32 %v5635_v47, %v2992_v43  ;;  %v4241_v6 = vadd.f32 %v2909_v46, %v1835_v52 }
 0x207   : > { %v3061_v58 = vmax.f32 %v3029_v26, 0.0  ;;  %v2995_v59 = vmul.f32 %v4240_v51, %v5630_v21 }
 0x208   : > { %v4009_v3 = vpop.f32.mrb[30].mxu1  ;;  %v3060_v7 = vmax.f32 %v3028_v9, 0.0  ;;  %v2994_v8 = vmul.f32 %v4241_v6, %v5630_v21  ;;  %v4209_v28 = vpop.f32.mrb[30].mxu0 }
 0x209   : > { %v1845_v29 = vpop.f32.mrb[31].mxu1  ;;  %3093 = vst [vmem:[%s5644_s8 + $0xd8] sm:$0xff] %v3061_v58  ;;  %v3031_v53 = vadd.f32 %v5635_v47, %v2995_v59  ;;  %v4242_v55 = vadd.f32 %v4209_v28, %v4009_v3  ;;  %v2919_v23 = vpop.f32.mrb[31].mxu0 }
 0x20a   : > { %3092 = vst [vmem:[%s5644_s8 + $0xd0] sm:$0xff] %v3060_v7  ;;  %v3030_v30 = vadd.f32 %v5635_v47, %v2994_v8  ;;  %v4243_v39 = vadd.f32 %v2919_v23, %v1845_v29 }
 0x20b   : > { %v3063_v10 = vmax.f32 %v3031_v53, 0.0  ;;  %v2997_v19 = vmul.f32 %v4242_v55, %v5630_v21 }
 0x20c   : > { %v3062_v62 = vmax.f32 %v3030_v30, 0.0  ;;  %v2996_v40 = vmul.f32 %v4243_v39, %v5630_v21 }
 0x20d   : > { %3095 = vst [vmem:[%s5644_s8 + $0xe8] sm:$0xff] %v3063_v10  ;;  %v3033_v54 = vadd.f32 %v5635_v47, %v2997_v19 }
 0x20e   : > { %3094 = vst [vmem:[%s5644_s8 + $0xe0] sm:$0xff] %v3062_v62  ;;  %v3032_v37 = vadd.f32 %v5635_v47, %v2996_v40 }
 0x20f   : > { %v3065_v13 = vmax.f32 %v3033_v54, 0.0 }
 0x210   : > { %v3064_v48 = vmax.f32 %v3032_v37, 0.0 }
 0x211   : > { %3097 = vst [vmem:[%s5644_s8 + $0xf8] sm:$0xff] %v3065_v13 }
 0x212   : > { %3096 = vst [vmem:[%s5644_s8 + $0xf0] sm:$0xff] %v3064_v48 }
 0x213 PF: > { %s13_s12 = sadd.s32 1, %s4483_s12  }
 0x214   : > { %p10_p4 = scmp.ge.s32.totalorder %s13_s12, 4  }
 0x216   :  { %12 = sbr.rel (!%p10_p4) target bundleno = 1 (0x1), region = 62 }

</bundles_post_ra>
